<compile_context>
chip_gen: v7x
topology: tpu7x:2x2x1
jax: 0.10.0
libtpu: 0.0.40
codegen_flags: <defaults>
</compile_context>

<pallas_src>
import functools

import numpy as np

import jax
import jax.numpy as jnp
from jax.experimental import pallas as pl
from jax.experimental.pallas import tpu as pltpu

# ----------------------------- configuration --------------------------------
D_MODEL = 32          # d_model (small, divisible by n_heads)
N_HEADS = 4           # n_heads
N_LEVELS = 1          # n_depth_levels
N_POINTS = 4          # dpth_n_points
LN_EPS = 1e-5         # nn.LayerNorm default eps


# ------------------------------- the kernel ---------------------------------
def _layer_kernel(tgt_ref, pos_ref, ref_ref, src_ref,
                  wq_ref, bq_ref, sel_ref, cst_ref, wcc_ref, vec_ref,
                  out_ref,
                  value_ref, heads_ref,
                  *, n_heads, n_points, n_levels, eps):
  """One (batch, query-row-tile) grid step."""
  M = n_heads
  LP = n_levels * n_points
  MLP = M * LP

  tgt = tgt_ref[...]                       # (TQ, C) f32
  pos = pos_ref[...]                       # (TQ, C) f32
  refpt = ref_ref[...]                     # (TQ, RP) f32 (zero-padded past 2L)
  TQ, C = tgt.shape
  S = value_ref.shape[0]
  D = C // M

  vec = vec_ref[...]                       # (11, C) f32 bias / LayerNorm slab
  # vec rows: 0 b_dsa, 1 g_nd, 2 bt_nd, 3 b_vp, 4 b_out, 5 b_csa,
  #           6 g1, 7 bt1, 8 b_l1, 9 g3, 10 bt3

  def layernorm(x, g_row, b_row):
    mu = jnp.mean(x, axis=-1, keepdims=True)
    var = jnp.mean(jnp.square(x - mu), axis=-1, keepdims=True)
    return ((x - mu) * jax.lax.rsqrt(var + eps) *
            vec[g_row:g_row + 1, :] + vec[b_row:b_row + 1, :])

  # ---- value cache (per batch): value = value_proj(norm_depth_scale(dsa(src)))
  # The query-tile grid axis is inner & sequential ("arbitrary"), so computing
  # this only at tile 0 caches it for the whole batch.
  @pl.when(pl.program_id(1) == 0)
  def _():
    s = src_ref[...].astype(jnp.bfloat16)                               # (S, C)
    x = jnp.dot(s, wcc_ref[0:C, :],
                preferred_element_type=jnp.float32) + vec[0:1, :]
    x = layernorm(x, 1, 2)
    v = jnp.dot(x.astype(jnp.bfloat16), wcc_ref[C:2 * C, :],
                preferred_element_type=jnp.float32) + vec[3:4, :]
    value_ref[...] = v.astype(jnp.bfloat16)

  # ---- query-side projections (one dot: offsets-x | offsets-y | attn logits)
  q = (tgt + pos).astype(jnp.bfloat16)
  qp = jnp.dot(q, wq_ref[...],
               preferred_element_type=jnp.float32) + bq_ref[...]        # (TQ, 3*MLP)
  off_x = qp[:, 0:MLP]
  off_y = qp[:, MLP:2 * MLP]
  logits = qp[:, 2 * MLP:3 * MLP]

  # per-head softmax over (levels*points), hoisted to full width: subtract the
  # global row max (valid for any segment softmax), block-diagonal ones matmul
  # for per-head sums, EUP reciprocal.
  e = jnp.exp(logits - jnp.max(logits, axis=-1, keepdims=True))         # (TQ, MLP)
  seg = cst_ref[0:MLP, :]                                               # (MLP, MLP)
  denom = jnp.dot(e, seg, preferred_element_type=jnp.float32)           # per-head sums
  aw = e * pl.reciprocal(denom, approx=True)                            # (TQ, MLP)

  # ---- sampling locations / bilinear corners at full (TQ, MLP) width ----
  wv = cst_ref[MLP + 0:MLP + 1, :]                                      # per-column W_l
  hv = cst_ref[MLP + 1:MLP + 2, :]                                      # per-column H_l
  sv = cst_ref[MLP + 2:MLP + 3, :]                                      # per-column level start
  rxy = jnp.dot(refpt, sel_ref[...],
                preferred_element_type=jnp.float32)                     # (TQ, 2*MLP)
  # F.grid_sample coords (align_corners=False); offset normalization folds:
  #   xi = (rx + ox/W)*W - 0.5 = rx*W + ox - 0.5
  xi = rxy[:, 0:MLP] * wv + off_x - 0.5
  yi = rxy[:, MLP:2 * MLP] * hv + off_y - 0.5
  x0 = jnp.floor(xi)
  y0 = jnp.floor(yi)
  fx = xi - x0
  fy = yi - y0

  corners = []
  for dx, dy, wgt_x, wgt_y in ((0.0, 0.0, 1.0 - fx, 1.0 - fy),
                               (1.0, 0.0, fx,       1.0 - fy),
                               (0.0, 1.0, 1.0 - fx, fy),
                               (1.0, 1.0, fx,       fy)):
    cx = x0 + dx
    cy = y0 + dy
    valid = ((cx >= 0.0) & (cx <= wv - 1.0) &
             (cy >= 0.0) & (cy <= hv - 1.0))
    w = jnp.where(valid, aw * wgt_x * wgt_y, 0.0)                       # (TQ, MLP)
    # clip BEFORE forming the flat index (padding_mode='zeros' via the mask)
    cxc = jnp.clip(cx, 0.0, wv - 1.0)
    cyc = jnp.clip(cy, 0.0, hv - 1.0)
    idx = (sv + cyc * wv + cxc).astype(jnp.int32)                       # flat in [0, S)
    corners.append((idx, w))

  # ---- per-head sampling matrix (TQ, S) built from per-corner slices, then
  #      one MXU dot per head written into the (TQ, C) heads scratch ----
  iota_s = jax.lax.broadcasted_iota(jnp.int32, (1, 1, S), 2)
  for m in range(M):
    lo = m * LP
    b_m = jnp.zeros((TQ, S), jnp.float32)
    for idx, w in corners:
      hit = idx[:, lo:lo + LP][:, :, None] == iota_s                    # (TQ, LP, S)
      b_m = b_m + jnp.sum(
          jnp.where(hit, w[:, lo:lo + LP][:, :, None], 0.0), axis=1)
    head = jnp.dot(b_m.astype(jnp.bfloat16),
                   value_ref[:, m * D:(m + 1) * D],
                   preferred_element_type=jnp.float32)                  # (TQ, D)
    heads_ref[:, m * D:(m + 1) * D] = head.astype(jnp.bfloat16)

  # ---- output_proj -> cross_scale_adapt -> residual + norm1 -> FFN + norm3 ---
  attn = jnp.dot(heads_ref[...], wcc_ref[2 * C:3 * C, :],
                 preferred_element_type=jnp.float32) + vec[4:5, :]
  tgt2 = jnp.dot(attn.astype(jnp.bfloat16), wcc_ref[3 * C:4 * C, :],
                 preferred_element_type=jnp.float32) + vec[5:6, :]
  t = layernorm(tgt + tgt2, 6, 7)
  f = jnp.maximum(
      jnp.dot(t.astype(jnp.bfloat16), wcc_ref[4 * C:5 * C, :],
              preferred_element_type=jnp.float32) + vec[8:9, :], 0.0)
  out_ref[...] = layernorm(t + f, 9, 10)


# ------------------------------- the wrapper ---------------------------------
def depth_deformable_encoder_layer(tgt, query_pos, reference_points, src,
                                   spatial_shapes, params):
  """tgt/query_pos: (N, Lq, C); reference_points: (N, Lq, L, 2); src: (N, S, C)."""
  N, Lq, C = tgt.shape
  S = src.shape[1]
  L = len(spatial_shapes)
  M, P = N_HEADS, N_POINTS
  LP = L * P
  MLP = M * LP
  assert C % M == 0

  level_starts, acc = [], 0
  for (h, w) in spatial_shapes:
    level_starts.append(acc)
    acc += h * w
  assert acc == S

  # query-row tile (biggest of the standard sizes that divides Lq)
  TQ = Lq
  for cand in (256, 128, 64, 32, 16, 8):
    if Lq % cand == 0:
      TQ = cand
      break
  QT = Lq // TQ

  tgt2 = tgt.astype(jnp.float32)
  pos2 = query_pos.astype(jnp.float32)
  src2 = src.astype(jnp.float32)
  # pad reference points to >= 8 lanes so the refpt-selection matmul has a
  # comfortable contraction dim
  RP = max(8, 2 * L)
  ref2 = jnp.zeros((N, Lq, RP), jnp.float32).at[:, :, :2 * L].set(
      reference_points.reshape(N, Lq, 2 * L).astype(jnp.float32))

  # --- packed parameter slabs -------------------------------------------------
  # query-side projections: de-interleave offset x/y and fuse with attn-weights
  w_off3 = params['w_off'].reshape(C, MLP, 2)
  b_off3 = params['b_off'].reshape(1, MLP, 2)
  w_q = jnp.concatenate([w_off3[..., 0], w_off3[..., 1], params['w_aw']],
                        axis=1).astype(jnp.bfloat16)                    # (C, 3*MLP)
  b_q = jnp.concatenate([b_off3[..., 0], b_off3[..., 1], params['b_aw']],
                        axis=1).astype(jnp.float32)                     # (1, 3*MLP)

  # (C,C) weights: depth_scale_adapt | value_proj | output_proj |
  #                cross_scale_adapt | linear1
  w_cc = jnp.concatenate([params['w_dsa'], params['w_vp'], params['w_out'],
                          params['w_csa'], params['w_l1']],
                         axis=0).astype(jnp.bfloat16)                   # (5C, C)

  # bias / LayerNorm row vectors (f32)
  vecs = jnp.concatenate([params['b_dsa'], params['g_nd'], params['bt_nd'],
                          params['b_vp'], params['b_out'], params['b_csa'],
                          params['g1'], params['bt1'], params['b_l1'],
                          params['g3'], params['bt3']], axis=0)         # (11, C)

  # per-column (head-major k = m*L*P + l*P + p) level constants + head-segment
  # ones matrix, packed into one (MLP+3, MLP) f32 slab
  kcol = np.arange(MLP)
  lev = (kcol % LP) // P
  head_of = kcol // LP
  seg = (head_of[:, None] == head_of[None, :]).astype(np.float32)       # (MLP, MLP)
  w_row = np.array([spatial_shapes[l][1] for l in lev], np.float32)
  h_row = np.array([spatial_shapes[l][0] for l in lev], np.float32)
  s_row = np.array([level_starts[l] for l in lev], np.float32)
  cst = jnp.asarray(
      np.concatenate([seg, np.stack([w_row, h_row, s_row], axis=0)], axis=0))

  # reference-point selection matrix: rx/ry per column via one tiny matmul
  selx = np.zeros((RP, MLP), np.float32)
  sely = np.zeros((RP, MLP), np.float32)
  selx[2 * lev, kcol] = 1.0
  sely[2 * lev + 1, kcol] = 1.0
  sel = jnp.asarray(np.concatenate([selx, sely], axis=1))               # (RP, 2*MLP)

  def const_spec(shape):
    nd = len(shape)
    return pl.BlockSpec(tuple(shape), lambda b, t, _nd=nd: (0,) * _nd)

  in_specs = [
      pl.BlockSpec((None, TQ, C), lambda b, t: (b, t, 0)),      # tgt
      pl.BlockSpec((None, TQ, C), lambda b, t: (b, t, 0)),      # query_pos
      pl.BlockSpec((None, TQ, RP), lambda b, t: (b, t, 0)),     # reference points
      pl.BlockSpec((None, S, C), lambda b, t: (b, 0, 0)),       # src (per batch)
      const_spec(w_q.shape), const_spec(b_q.shape),
      const_spec(sel.shape), const_spec(cst.shape),
      const_spec(w_cc.shape), const_spec(vecs.shape),
  ]
  out_spec = pl.BlockSpec((None, TQ, C), lambda b, t: (b, t, 0))

  kernel = functools.partial(_layer_kernel, n_heads=M, n_points=P,
                             n_levels=L, eps=LN_EPS)

  out = pl.pallas_call(
      kernel,
      out_shape=jax.ShapeDtypeStruct((N, Lq, C), jnp.float32),
      grid_spec=pltpu.PrefetchScalarGridSpec(
          num_scalar_prefetch=0,
          grid=(N, QT),
          in_specs=in_specs,
          out_specs=out_spec,
          scratch_shapes=[pltpu.VMEM((S, C), jnp.bfloat16),    # cached value rows
                          pltpu.VMEM((TQ, C), jnp.bfloat16)],  # per-head outputs
      ),
      compiler_params=pltpu.CompilerParams(
          dimension_semantics=("parallel", "arbitrary"),
          vmem_limit_bytes=48 * 1024 * 1024),
  )(tgt2, pos2, ref2, src2, w_q, b_q, sel, cst, w_cc, vecs)

  return out


# --------------------------- deterministic params ----------------------------
def init_params(key, C, M, L, P):
  ks = jax.random.split(key, 8)

  def lin(k, din, dout, scale=0.05):
    kw, kb = jax.random.split(k)
    # weights stored (in, out): y = x @ W + b  (transpose of torch nn.Linear.weight)
    return (scale * jax.random.normal(kw, (din, dout), jnp.float32),
            scale * jax.random.normal(kb, (1, dout), jnp.float32))

  p = {}
  p['w_dsa'], p['b_dsa'] = lin(ks[0], C, C)                   # depth_scale_adapt
  p['g_nd'] = jnp.ones((1, C), jnp.float32)                   # norm_depth_scale
  p['bt_nd'] = jnp.zeros((1, C), jnp.float32)
  p['w_vp'], p['b_vp'] = lin(ks[1], C, C)                     # cross_attn.value_proj
  p['w_off'], p['b_off'] = lin(ks[2], C, M * L * P * 2, 0.1)  # cross_attn.sampling_offsets
  p['w_aw'], p['b_aw'] = lin(ks[3], C, M * L * P)             # cross_attn.attention_weights
  p['w_out'], p['b_out'] = lin(ks[4], C, C)                   # cross_attn.output_proj
  p['w_csa'], p['b_csa'] = lin(ks[5], C, C)                   # cross_scale_adapt
  p['g1'] = jnp.ones((1, C), jnp.float32)                     # norm1
  p['bt1'] = jnp.zeros((1, C), jnp.float32)
  p['w_l1'], p['b_l1'] = lin(ks[6], C, C)                     # linear1 (d_model->d_model)
  p['g3'] = jnp.ones((1, C), jnp.float32)                     # norm3
  p['bt3'] = jnp.zeros((1, C), jnp.float32)
  return p


# ----------------------------- pure-JAX reference ----------------------------
def _reference_single(tgt, pos, refpt, src, params, *,
                      spatial_shapes, level_starts, n_heads, n_points, eps):
  M, P, L = n_heads, n_points, len(spatial_shapes)
  Lq, C = tgt.shape
  D = C // M

  def ln(x, g, b):
    mu = x.mean(-1, keepdims=True)
    var = ((x - mu) ** 2).mean(-1, keepdims=True)
    return (x - mu) * jax.lax.rsqrt(var + eps) * g + b

  x = ln(src @ params['w_dsa'] + params['b_dsa'], params['g_nd'], params['bt_nd'])
  value = x @ params['w_vp'] + params['b_vp']                                   # (S, C)
  q = tgt + pos
  off = (q @ params['w_off'] + params['b_off']).reshape(Lq, M, L, P, 2)
  aw = (q @ params['w_aw'] + params['b_aw']).reshape(Lq, M, L * P)
  aw = jax.nn.softmax(aw, axis=-1).reshape(Lq, M, L, P)

  out = jnp.zeros((Lq, M, D), jnp.float32)
  for l, (H, W) in enumerate(spatial_shapes):
    s0 = level_starts[l]
    v_l = value[s0:s0 + H * W].reshape(H * W, M, D)
    loc_x = refpt[:, 2 * l][:, None, None] + off[:, :, l, :, 0] / W             # (Lq, M, P)
    loc_y = refpt[:, 2 * l + 1][:, None, None] + off[:, :, l, :, 1] / H
    xi = loc_x * W - 0.5
    yi = loc_y * H - 0.5
    x0 = jnp.floor(xi)
    y0 = jnp.floor(yi)
    wx1, wy1 = xi - x0, yi - y0
    for cx, cy, wx, wy in ((x0, y0, 1 - wx1, 1 - wy1), (x0 + 1, y0, wx1, 1 - wy1),
                           (x0, y0 + 1, 1 - wx1, wy1), (x0 + 1, y0 + 1, wx1, wy1)):
      valid = (cx >= 0) & (cx <= W - 1) & (cy >= 0) & (cy <= H - 1)
      w = jnp.where(valid, wx * wy, 0.0) * aw[:, :, l, :]
      idx = (jnp.clip(cy.astype(jnp.int32), 0, H - 1) * W +
             jnp.clip(cx.astype(jnp.int32), 0, W - 1))                          # (Lq, M, P)
      g = jax.vmap(lambda vh, ih: vh[ih], in_axes=(1, 1), out_axes=1)(v_l, idx)  # (Lq,M,P,D)
      out = out + jnp.einsum('qmp,qmpd->qmd', w, g)

  attn = out.reshape(Lq, C) @ params['w_out'] + params['b_out']
  tgt2 = attn @ params['w_csa'] + params['b_csa']
  t = ln(tgt + tgt2, params['g1'], params['bt1'])
  f = jnp.maximum(t @ params['w_l1'] + params['b_l1'], 0.0)
  return ln(t + f, params['g3'], params['bt3'])


# ----------------------------------- main ------------------------------------
if __name__ == "__main__":
  key = jax.random.PRNGKey(0)
  N, Lq = 2, 8
  H, W = 8, 8
  spatial_shapes = ((H, W),)
  S = H * W
  C = D_MODEL

  ks = jax.random.split(key, 5)
  tgt = jax.random.normal(ks[0], (N, Lq, C), jnp.float32)
  query_pos = jax.random.normal(ks[1], (N, Lq, C), jnp.float32)
  src = jax.random.normal(ks[2], (N, S, C), jnp.float32)
  reference_points = jax.random.uniform(ks[3], (N, Lq, N_LEVELS, 2), jnp.float32)
  params = init_params(ks[4], C, N_HEADS, N_LEVELS, N_POINTS)

  out = depth_deformable_encoder_layer(tgt, query_pos, reference_points, src,
                                       spatial_shapes, params)
  out = jax.block_until_ready(out)

  # numerical check against a pure-JAX (XLA, f32) reference of the same math;
  # the kernel uses bf16 MXU operands + approx reciprocal, so allow ~1e-2 level
  # differences.
  ref_fn = functools.partial(_reference_single,
                             spatial_shapes=spatial_shapes, level_starts=(0,),
                             n_heads=N_HEADS, n_points=N_POINTS, eps=LN_EPS)
  ref_flat = reference_points.reshape(N, Lq, N_LEVELS * 2)
  ref_out = jax.vmap(lambda a, b, c, d: ref_fn(a, b, c, d, params))(
      tgt, query_pos, ref_flat, src)

  assert out.shape == (N, Lq, C)
  assert bool(jnp.all(jnp.isfinite(out)))
  max_err = float(jnp.max(jnp.abs(out - ref_out)))
  assert max_err < 3e-2, f"max abs err {max_err}"
  print("KERNEL_OK")
</pallas_src>

<mosaic_0001>
module attributes {stable_mosaic.version = 11 : i64} {
  func.func @_layer_kernel(%arg0: i32, %arg1: i32, %arg2: memref<1x8x32xf32, #tpu.memory_space<vmem>>, %arg3: memref<1x8x32xf32, #tpu.memory_space<vmem>>, %arg4: memref<1x8x8xf32, #tpu.memory_space<vmem>>, %arg5: memref<1x64x32xf32, #tpu.memory_space<vmem>>, %arg6: memref<32x48xbf16, #tpu.memory_space<vmem>>, %arg7: memref<1x48xf32, #tpu.memory_space<vmem>>, %arg8: memref<8x32xf32, #tpu.memory_space<vmem>>, %arg9: memref<19x16xf32, #tpu.memory_space<vmem>>, %arg10: memref<160x32xbf16, #tpu.memory_space<vmem>>, %arg11: memref<11x32xf32, #tpu.memory_space<vmem>>, %arg12: memref<1x8x32xf32, #tpu.memory_space<vmem>>, %arg13: memref<64x32xbf16, #tpu.memory_space<vmem>>, %arg14: memref<8x32xbf16, #tpu.memory_space<vmem>>) attributes {dimension_semantics = [#tpu.dimension_semantics<parallel>, #tpu.dimension_semantics<arbitrary>], iteration_bounds = array<i64: 2, 1>, scalar_prefetch = 0 : i64, scratch_operands = 2 : i64, tpu.core_type = #tpu.core_type<tc>, window_params = [{transform_indices = @transform_0, window_bounds = array<i64: 1, 8, 32>}, {transform_indices = @transform_1, window_bounds = array<i64: 1, 8, 32>}, {transform_indices = @transform_2, window_bounds = array<i64: 1, 8, 8>}, {transform_indices = @transform_3, window_bounds = array<i64: 1, 64, 32>}, {pipeline_mode = #tpu.pipeline_mode<synchronous>, transform_indices = @transform_4, window_bounds = array<i64: 32, 48>}, {pipeline_mode = #tpu.pipeline_mode<synchronous>, transform_indices = @transform_5, window_bounds = array<i64: 1, 48>}, {pipeline_mode = #tpu.pipeline_mode<synchronous>, transform_indices = @transform_6, window_bounds = array<i64: 8, 32>}, {pipeline_mode = #tpu.pipeline_mode<synchronous>, transform_indices = @transform_7, window_bounds = array<i64: 19, 16>}, {pipeline_mode = #tpu.pipeline_mode<synchronous>, transform_indices = @transform_8, window_bounds = array<i64: 160, 32>}, {pipeline_mode = #tpu.pipeline_mode<synchronous>, transform_indices = @transform_9, window_bounds = array<i64: 11, 32>}, {transform_indices = @transform_10, window_bounds = array<i64: 1, 8, 32>}]} {
    %c0 = arith.constant 0 : index
    %c0_0 = arith.constant 0 : index
    %c0_1 = arith.constant 0 : index
    %0 = vector.load %arg2[%c0, %c0_0, %c0_1] : memref<1x8x32xf32, #tpu.memory_space<vmem>>, vector<1x8x32xf32>
    %1 = vector.shape_cast %0 : vector<1x8x32xf32> to vector<8x32xf32>
    %c0_2 = arith.constant 0 : index
    %c0_3 = arith.constant 0 : index
    %c0_4 = arith.constant 0 : index
    %2 = vector.load %arg3[%c0_2, %c0_3, %c0_4] : memref<1x8x32xf32, #tpu.memory_space<vmem>>, vector<1x8x32xf32>
    %3 = vector.shape_cast %2 : vector<1x8x32xf32> to vector<8x32xf32>
    %c0_5 = arith.constant 0 : index
    %c0_6 = arith.constant 0 : index
    %c0_7 = arith.constant 0 : index
    %4 = vector.load %arg4[%c0_5, %c0_6, %c0_7] : memref<1x8x8xf32, #tpu.memory_space<vmem>>, vector<1x8x8xf32>
    %5 = vector.shape_cast %4 : vector<1x8x8xf32> to vector<8x8xf32>
    %c0_8 = arith.constant 0 : index
    %c0_9 = arith.constant 0 : index
    %6 = vector.load %arg11[%c0_8, %c0_9] : memref<11x32xf32, #tpu.memory_space<vmem>>, vector<11x32xf32>
    %c0_i32 = arith.constant 0 : i32
    %7 = arith.cmpi eq, %arg1, %c0_i32 : i32
    %8 = arith.extui %7 : i1 to i32
    %c0_i32_10 = arith.constant 0 : i32
    %9 = arith.cmpi ne, %8, %c0_i32_10 : i32
    scf.if %9 {
      %c0_151 = arith.constant 0 : index
      %c0_152 = arith.constant 0 : index
      %c0_153 = arith.constant 0 : index
      %528 = vector.load %arg5[%c0_151, %c0_152, %c0_153] : memref<1x64x32xf32, #tpu.memory_space<vmem>>, vector<1x64x32xf32>
      %529 = vector.shape_cast %528 : vector<1x64x32xf32> to vector<64x32xf32>
      %530 = arith.truncf %529 : vector<64x32xf32> to vector<64x32xbf16>
      %c0_154 = arith.constant 0 : index
      %c0_155 = arith.constant 0 : index
      %531 = vector.load %arg10[%c0_154, %c0_155] : memref<160x32xbf16, #tpu.memory_space<vmem>>, vector<32x32xbf16>
      %cst_156 = arith.constant dense<0.000000e+00> : vector<64x32xf32>
      %532 = tpu.matmul %530, %531, %cst_156 {dimension_numbers = #tpu.dot_dimension_numbers<[1], [0], [0], [1], [0, 0, 1, 1], [], []>} : vector<64x32xbf16>, vector<32x32xbf16>, vector<64x32xf32> -> vector<64x32xf32>
      %533 = vector.extract_strided_slice %6 {offsets = [0, 0], sizes = [1, 32], strides = [1, 1]} : vector<11x32xf32> to vector<1x32xf32>
      %534 = vector.broadcast %533 : vector<1x32xf32> to vector<64x32xf32>
      %535 = arith.addf %532, %534 : vector<64x32xf32>
      %cst_157 = arith.constant dense<0.000000e+00> : vector<64xf32>
      %536 = vector.multi_reduction <add>, %535, %cst_157 [1] : vector<64x32xf32> to vector<64xf32>
      %537 = vector.shape_cast %536 : vector<64xf32> to vector<64x1xf32>
      %cst_158 = arith.constant 3.200000e+01 : f32
      %538 = vector.broadcast %cst_158 : f32 to vector<64x1xf32>
      %539 = arith.divf %537, %538 : vector<64x1xf32>
      %540 = vector.broadcast %539 : vector<64x1xf32> to vector<64x32xf32>
      %541 = arith.subf %535, %540 : vector<64x32xf32>
      %542 = arith.mulf %541, %541 : vector<64x32xf32>
      %cst_159 = arith.constant dense<0.000000e+00> : vector<64xf32>
      %543 = vector.multi_reduction <add>, %542, %cst_159 [1] : vector<64x32xf32> to vector<64xf32>
      %544 = vector.shape_cast %543 : vector<64xf32> to vector<64x1xf32>
      %cst_160 = arith.constant 3.200000e+01 : f32
      %545 = vector.broadcast %cst_160 : f32 to vector<64x1xf32>
      %546 = arith.divf %544, %545 : vector<64x1xf32>
      %547 = vector.broadcast %539 : vector<64x1xf32> to vector<64x32xf32>
      %548 = arith.subf %535, %547 : vector<64x32xf32>
      %cst_161 = arith.constant 9.99999974E-6 : f32
      %549 = vector.broadcast %cst_161 : f32 to vector<64x1xf32>
      %550 = arith.addf %546, %549 : vector<64x1xf32>
      %551 = math.rsqrt %550 : vector<64x1xf32>
      %552 = vector.broadcast %551 : vector<64x1xf32> to vector<64x32xf32>
      %553 = arith.mulf %548, %552 : vector<64x32xf32>
      %554 = vector.extract_strided_slice %6 {offsets = [1, 0], sizes = [1, 32], strides = [1, 1]} : vector<11x32xf32> to vector<1x32xf32>
      %555 = vector.broadcast %554 : vector<1x32xf32> to vector<64x32xf32>
      %556 = arith.mulf %553, %555 : vector<64x32xf32>
      %557 = vector.extract_strided_slice %6 {offsets = [2, 0], sizes = [1, 32], strides = [1, 1]} : vector<11x32xf32> to vector<1x32xf32>
      %558 = vector.broadcast %557 : vector<1x32xf32> to vector<64x32xf32>
      %559 = arith.addf %556, %558 : vector<64x32xf32>
      %560 = arith.truncf %559 : vector<64x32xf32> to vector<64x32xbf16>
      %c32 = arith.constant 32 : index
      %c0_162 = arith.constant 0 : index
      %561 = vector.load %arg10[%c32, %c0_162] : memref<160x32xbf16, #tpu.memory_space<vmem>>, vector<32x32xbf16>
      %cst_163 = arith.constant dense<0.000000e+00> : vector<64x32xf32>
      %562 = tpu.matmul %560, %561, %cst_163 {dimension_numbers = #tpu.dot_dimension_numbers<[1], [0], [0], [1], [0, 0, 1, 1], [], []>} : vector<64x32xbf16>, vector<32x32xbf16>, vector<64x32xf32> -> vector<64x32xf32>
      %563 = vector.extract_strided_slice %6 {offsets = [3, 0], sizes = [1, 32], strides = [1, 1]} : vector<11x32xf32> to vector<1x32xf32>
      %564 = vector.broadcast %563 : vector<1x32xf32> to vector<64x32xf32>
      %565 = arith.addf %562, %564 : vector<64x32xf32>
      %566 = arith.truncf %565 : vector<64x32xf32> to vector<64x32xbf16>
      %c0_164 = arith.constant 0 : index
      %c0_165 = arith.constant 0 : index
      %567 = vector.load %arg13[%c0_164, %c0_165] : memref<64x32xbf16, #tpu.memory_space<vmem>>, vector<64x32xbf16>
      tpu.vector_store %arg13[%c0_164, %c0_165], %566 {strides = array<i32>} : memref<64x32xbf16, #tpu.memory_space<vmem>>, vector<64x32xbf16>,
    } else {
    }
    %10 = arith.addf %1, %3 : vector<8x32xf32>
    %11 = arith.truncf %10 : vector<8x32xf32> to vector<8x32xbf16>
    %c0_11 = arith.constant 0 : index
    %c0_12 = arith.constant 0 : index
    %12 = vector.load %arg6[%c0_11, %c0_12] : memref<32x48xbf16, #tpu.memory_space<vmem>>, vector<32x48xbf16>
    %cst = arith.constant dense<0.000000e+00> : vector<8x48xf32>
    %13 = tpu.matmul %11, %12, %cst {dimension_numbers = #tpu.dot_dimension_numbers<[1], [0], [0], [1], [0, 0, 1, 1], [], []>} : vector<8x32xbf16>, vector<32x48xbf16>, vector<8x48xf32> -> vector<8x48xf32>
    %c0_13 = arith.constant 0 : index
    %c0_14 = arith.constant 0 : index
    %14 = vector.load %arg7[%c0_13, %c0_14] : memref<1x48xf32, #tpu.memory_space<vmem>>, vector<1x48xf32>
    %15 = vector.broadcast %14 : vector<1x48xf32> to vector<8x48xf32>
    %16 = arith.addf %13, %15 : vector<8x48xf32>
    %17 = vector.extract_strided_slice %16 {offsets = [0, 0], sizes = [8, 16], strides = [1, 1]} : vector<8x48xf32> to vector<8x16xf32>
    %18 = vector.extract_strided_slice %16 {offsets = [0, 16], sizes = [8, 16], strides = [1, 1]} : vector<8x48xf32> to vector<8x16xf32>
    %19 = vector.extract_strided_slice %16 {offsets = [0, 32], sizes = [8, 16], strides = [1, 1]} : vector<8x48xf32> to vector<8x16xf32>
    %cst_15 = arith.constant dense<0xFF800000> : vector<8xf32>
    %20 = vector.multi_reduction <maximumf>, %19, %cst_15 [1] : vector<8x16xf32> to vector<8xf32>
    %21 = vector.shape_cast %20 : vector<8xf32> to vector<8x1xf32>
    %22 = vector.broadcast %21 : vector<8x1xf32> to vector<8x16xf32>
    %23 = arith.subf %19, %22 : vector<8x16xf32>
    %24 = math.exp %23 : vector<8x16xf32>
    %c0_16 = arith.constant 0 : index
    %c0_17 = arith.constant 0 : index
    %25 = vector.load %arg9[%c0_16, %c0_17] : memref<19x16xf32, #tpu.memory_space<vmem>>, vector<16x16xf32>
    %cst_18 = arith.constant dense<0.000000e+00> : vector<8x16xf32>
    %26 = tpu.matmul %24, %25, %cst_18 {dimension_numbers = #tpu.dot_dimension_numbers<[1], [0], [0], [1], [0, 0, 1, 1], [], []>} : vector<8x16xf32>, vector<16x16xf32>, vector<8x16xf32> -> vector<8x16xf32>
    %27 = tpu.reciprocal %26 {approx = true} : vector<8x16xf32> -> vector<8x16xf32>
    %28 = arith.mulf %24, %27 : vector<8x16xf32>
    %c16 = arith.constant 16 : index
    %c0_19 = arith.constant 0 : index
    %29 = vector.load %arg9[%c16, %c0_19] : memref<19x16xf32, #tpu.memory_space<vmem>>, vector<1x16xf32>
    %c17 = arith.constant 17 : index
    %c0_20 = arith.constant 0 : index
    %30 = vector.load %arg9[%c17, %c0_20] : memref<19x16xf32, #tpu.memory_space<vmem>>, vector<1x16xf32>
    %c18 = arith.constant 18 : index
    %c0_21 = arith.constant 0 : index
    %31 = vector.load %arg9[%c18, %c0_21] : memref<19x16xf32, #tpu.memory_space<vmem>>, vector<1x16xf32>
    %c0_22 = arith.constant 0 : index
    %c0_23 = arith.constant 0 : index
    %32 = vector.load %arg8[%c0_22, %c0_23] : memref<8x32xf32, #tpu.memory_space<vmem>>, vector<8x32xf32>
    %cst_24 = arith.constant dense<0.000000e+00> : vector<8x32xf32>
    %33 = tpu.matmul %5, %32, %cst_24 {dimension_numbers = #tpu.dot_dimension_numbers<[1], [0], [0], [1], [0, 0, 1, 1], [], []>} : vector<8x8xf32>, vector<8x32xf32>, vector<8x32xf32> -> vector<8x32xf32>
    %34 = vector.extract_strided_slice %33 {offsets = [0, 0], sizes = [8, 16], strides = [1, 1]} : vector<8x32xf32> to vector<8x16xf32>
    %35 = vector.broadcast %29 : vector<1x16xf32> to vector<8x16xf32>
    %36 = arith.mulf %34, %35 : vector<8x16xf32>
    %37 = arith.addf %36, %17 : vector<8x16xf32>
    %cst_25 = arith.constant 5.000000e-01 : f32
    %38 = vector.broadcast %cst_25 : f32 to vector<8x16xf32>
    %39 = arith.subf %37, %38 : vector<8x16xf32>
    %40 = vector.extract_strided_slice %33 {offsets = [0, 16], sizes = [8, 16], strides = [1, 1]} : vector<8x32xf32> to vector<8x16xf32>
    %41 = vector.broadcast %30 : vector<1x16xf32> to vector<8x16xf32>
    %42 = arith.mulf %40, %41 : vector<8x16xf32>
    %43 = arith.addf %42, %18 : vector<8x16xf32>
    %cst_26 = arith.constant 5.000000e-01 : f32
    %44 = vector.broadcast %cst_26 : f32 to vector<8x16xf32>
    %45 = arith.subf %43, %44 : vector<8x16xf32>
    %46 = math.floor %39 : vector<8x16xf32>
    %47 = math.floor %45 : vector<8x16xf32>
    %48 = arith.subf %39, %46 : vector<8x16xf32>
    %49 = arith.subf %45, %47 : vector<8x16xf32>
    %cst_27 = arith.constant 1.000000e+00 : f32
    %50 = vector.broadcast %cst_27 : f32 to vector<8x16xf32>
    %51 = arith.subf %50, %48 : vector<8x16xf32>
    %cst_28 = arith.constant 1.000000e+00 : f32
    %52 = vector.broadcast %cst_28 : f32 to vector<8x16xf32>
    %53 = arith.subf %52, %49 : vector<8x16xf32>
    %cst_29 = arith.constant 1.000000e+00 : f32
    %54 = vector.broadcast %cst_29 : f32 to vector<8x16xf32>
    %55 = arith.subf %54, %49 : vector<8x16xf32>
    %cst_30 = arith.constant 1.000000e+00 : f32
    %56 = vector.broadcast %cst_30 : f32 to vector<8x16xf32>
    %57 = arith.subf %56, %48 : vector<8x16xf32>
    %cst_31 = arith.constant 0.000000e+00 : f32
    %58 = vector.broadcast %cst_31 : f32 to vector<8x16xf32>
    %59 = arith.addf %46, %58 : vector<8x16xf32>
    %cst_32 = arith.constant 0.000000e+00 : f32
    %60 = vector.broadcast %cst_32 : f32 to vector<8x16xf32>
    %61 = arith.addf %47, %60 : vector<8x16xf32>
    %cst_33 = arith.constant 0.000000e+00 : f32
    %62 = vector.broadcast %cst_33 : f32 to vector<8x16xf32>
    %63 = arith.cmpf oge, %59, %62 : vector<8x16xf32>
    %cst_34 = arith.constant 1.000000e+00 : f32
    %64 = vector.broadcast %cst_34 : f32 to vector<1x16xf32>
    %65 = arith.subf %29, %64 : vector<1x16xf32>
    %66 = vector.broadcast %65 : vector<1x16xf32> to vector<8x16xf32>
    %67 = arith.cmpf ole, %59, %66 : vector<8x16xf32>
    %68 = arith.andi %63, %67 : vector<8x16xi1>
    %cst_35 = arith.constant 0.000000e+00 : f32
    %69 = vector.broadcast %cst_35 : f32 to vector<8x16xf32>
    %70 = arith.cmpf oge, %61, %69 : vector<8x16xf32>
    %71 = arith.andi %68, %70 : vector<8x16xi1>
    %cst_36 = arith.constant 1.000000e+00 : f32
    %72 = vector.broadcast %cst_36 : f32 to vector<1x16xf32>
    %73 = arith.subf %30, %72 : vector<1x16xf32>
    %74 = vector.broadcast %73 : vector<1x16xf32> to vector<8x16xf32>
    %75 = arith.cmpf ole, %61, %74 : vector<8x16xf32>
    %76 = arith.andi %71, %75 : vector<8x16xi1>
    %77 = arith.mulf %28, %51 : vector<8x16xf32>
    %78 = arith.mulf %77, %53 : vector<8x16xf32>
    %cst_37 = arith.constant 0.000000e+00 : f32
    %79 = vector.broadcast %cst_37 : f32 to vector<8x16xf32>
    %80 = arith.select %76, %78, %79 : vector<8x16xi1>, vector<8x16xf32>
    %cst_38 = arith.constant 1.000000e+00 : f32
    %81 = vector.broadcast %cst_38 : f32 to vector<1x16xf32>
    %82 = arith.subf %29, %81 : vector<1x16xf32>
    %cst_39 = arith.constant 0.000000e+00 : f32
    %83 = vector.broadcast %cst_39 : f32 to vector<8x16xf32>
    %84 = arith.maximumf %83, %59 : vector<8x16xf32>
    %85 = vector.broadcast %82 : vector<1x16xf32> to vector<8x16xf32>
    %86 = arith.minimumf %85, %84 : vector<8x16xf32>
    %cst_40 = arith.constant 1.000000e+00 : f32
    %87 = vector.broadcast %cst_40 : f32 to vector<1x16xf32>
    %88 = arith.subf %30, %87 : vector<1x16xf32>
    %cst_41 = arith.constant 0.000000e+00 : f32
    %89 = vector.broadcast %cst_41 : f32 to vector<8x16xf32>
    %90 = arith.maximumf %89, %61 : vector<8x16xf32>
    %91 = vector.broadcast %88 : vector<1x16xf32> to vector<8x16xf32>
    %92 = arith.minimumf %91, %90 : vector<8x16xf32>
    %93 = vector.broadcast %29 : vector<1x16xf32> to vector<8x16xf32>
    %94 = arith.mulf %92, %93 : vector<8x16xf32>
    %95 = vector.broadcast %31 : vector<1x16xf32> to vector<8x16xf32>
    %96 = arith.addf %95, %94 : vector<8x16xf32>
    %97 = arith.addf %96, %86 : vector<8x16xf32>
    %98 = arith.fptosi %97 : vector<8x16xf32> to vector<8x16xi32>
    %cst_42 = arith.constant 1.000000e+00 : f32
    %99 = vector.broadcast %cst_42 : f32 to vector<8x16xf32>
    %100 = arith.addf %46, %99 : vector<8x16xf32>
    %cst_43 = arith.constant 0.000000e+00 : f32
    %101 = vector.broadcast %cst_43 : f32 to vector<8x16xf32>
    %102 = arith.addf %47, %101 : vector<8x16xf32>
    %cst_44 = arith.constant 0.000000e+00 : f32
    %103 = vector.broadcast %cst_44 : f32 to vector<8x16xf32>
    %104 = arith.cmpf oge, %100, %103 : vector<8x16xf32>
    %cst_45 = arith.constant 1.000000e+00 : f32
    %105 = vector.broadcast %cst_45 : f32 to vector<1x16xf32>
    %106 = arith.subf %29, %105 : vector<1x16xf32>
    %107 = vector.broadcast %106 : vector<1x16xf32> to vector<8x16xf32>
    %108 = arith.cmpf ole, %100, %107 : vector<8x16xf32>
    %109 = arith.andi %104, %108 : vector<8x16xi1>
    %cst_46 = arith.constant 0.000000e+00 : f32
    %110 = vector.broadcast %cst_46 : f32 to vector<8x16xf32>
    %111 = arith.cmpf oge, %102, %110 : vector<8x16xf32>
    %112 = arith.andi %109, %111 : vector<8x16xi1>
    %cst_47 = arith.constant 1.000000e+00 : f32
    %113 = vector.broadcast %cst_47 : f32 to vector<1x16xf32>
    %114 = arith.subf %30, %113 : vector<1x16xf32>
    %115 = vector.broadcast %114 : vector<1x16xf32> to vector<8x16xf32>
    %116 = arith.cmpf ole, %102, %115 : vector<8x16xf32>
    %117 = arith.andi %112, %116 : vector<8x16xi1>
    %118 = arith.mulf %28, %48 : vector<8x16xf32>
    %119 = arith.mulf %118, %55 : vector<8x16xf32>
    %cst_48 = arith.constant 0.000000e+00 : f32
    %120 = vector.broadcast %cst_48 : f32 to vector<8x16xf32>
    %121 = arith.select %117, %119, %120 : vector<8x16xi1>, vector<8x16xf32>
    %cst_49 = arith.constant 1.000000e+00 : f32
    %122 = vector.broadcast %cst_49 : f32 to vector<1x16xf32>
    %123 = arith.subf %29, %122 : vector<1x16xf32>
    %cst_50 = arith.constant 0.000000e+00 : f32
    %124 = vector.broadcast %cst_50 : f32 to vector<8x16xf32>
    %125 = arith.maximumf %124, %100 : vector<8x16xf32>
    %126 = vector.broadcast %123 : vector<1x16xf32> to vector<8x16xf32>
    %127 = arith.minimumf %126, %125 : vector<8x16xf32>
    %cst_51 = arith.constant 1.000000e+00 : f32
    %128 = vector.broadcast %cst_51 : f32 to vector<1x16xf32>
    %129 = arith.subf %30, %128 : vector<1x16xf32>
    %cst_52 = arith.constant 0.000000e+00 : f32
    %130 = vector.broadcast %cst_52 : f32 to vector<8x16xf32>
    %131 = arith.maximumf %130, %102 : vector<8x16xf32>
    %132 = vector.broadcast %129 : vector<1x16xf32> to vector<8x16xf32>
    %133 = arith.minimumf %132, %131 : vector<8x16xf32>
    %134 = vector.broadcast %29 : vector<1x16xf32> to vector<8x16xf32>
    %135 = arith.mulf %133, %134 : vector<8x16xf32>
    %136 = vector.broadcast %31 : vector<1x16xf32> to vector<8x16xf32>
    %137 = arith.addf %136, %135 : vector<8x16xf32>
    %138 = arith.addf %137, %127 : vector<8x16xf32>
    %139 = arith.fptosi %138 : vector<8x16xf32> to vector<8x16xi32>
    %cst_53 = arith.constant 0.000000e+00 : f32
    %140 = vector.broadcast %cst_53 : f32 to vector<8x16xf32>
    %141 = arith.addf %46, %140 : vector<8x16xf32>
    %cst_54 = arith.constant 1.000000e+00 : f32
    %142 = vector.broadcast %cst_54 : f32 to vector<8x16xf32>
    %143 = arith.addf %47, %142 : vector<8x16xf32>
    %cst_55 = arith.constant 0.000000e+00 : f32
    %144 = vector.broadcast %cst_55 : f32 to vector<8x16xf32>
    %145 = arith.cmpf oge, %141, %144 : vector<8x16xf32>
    %cst_56 = arith.constant 1.000000e+00 : f32
    %146 = vector.broadcast %cst_56 : f32 to vector<1x16xf32>
    %147 = arith.subf %29, %146 : vector<1x16xf32>
    %148 = vector.broadcast %147 : vector<1x16xf32> to vector<8x16xf32>
    %149 = arith.cmpf ole, %141, %148 : vector<8x16xf32>
    %150 = arith.andi %145, %149 : vector<8x16xi1>
    %cst_57 = arith.constant 0.000000e+00 : f32
    %151 = vector.broadcast %cst_57 : f32 to vector<8x16xf32>
    %152 = arith.cmpf oge, %143, %151 : vector<8x16xf32>
    %153 = arith.andi %150, %152 : vector<8x16xi1>
    %cst_58 = arith.constant 1.000000e+00 : f32
    %154 = vector.broadcast %cst_58 : f32 to vector<1x16xf32>
    %155 = arith.subf %30, %154 : vector<1x16xf32>
    %156 = vector.broadcast %155 : vector<1x16xf32> to vector<8x16xf32>
    %157 = arith.cmpf ole, %143, %156 : vector<8x16xf32>
    %158 = arith.andi %153, %157 : vector<8x16xi1>
    %159 = arith.mulf %28, %57 : vector<8x16xf32>
    %160 = arith.mulf %159, %49 : vector<8x16xf32>
    %cst_59 = arith.constant 0.000000e+00 : f32
    %161 = vector.broadcast %cst_59 : f32 to vector<8x16xf32>
    %162 = arith.select %158, %160, %161 : vector<8x16xi1>, vector<8x16xf32>
    %cst_60 = arith.constant 1.000000e+00 : f32
    %163 = vector.broadcast %cst_60 : f32 to vector<1x16xf32>
    %164 = arith.subf %29, %163 : vector<1x16xf32>
    %cst_61 = arith.constant 0.000000e+00 : f32
    %165 = vector.broadcast %cst_61 : f32 to vector<8x16xf32>
    %166 = arith.maximumf %165, %141 : vector<8x16xf32>
    %167 = vector.broadcast %164 : vector<1x16xf32> to vector<8x16xf32>
    %168 = arith.minimumf %167, %166 : vector<8x16xf32>
    %cst_62 = arith.constant 1.000000e+00 : f32
    %169 = vector.broadcast %cst_62 : f32 to vector<1x16xf32>
    %170 = arith.subf %30, %169 : vector<1x16xf32>
    %cst_63 = arith.constant 0.000000e+00 : f32
    %171 = vector.broadcast %cst_63 : f32 to vector<8x16xf32>
    %172 = arith.maximumf %171, %143 : vector<8x16xf32>
    %173 = vector.broadcast %170 : vector<1x16xf32> to vector<8x16xf32>
    %174 = arith.minimumf %173, %172 : vector<8x16xf32>
    %175 = vector.broadcast %29 : vector<1x16xf32> to vector<8x16xf32>
    %176 = arith.mulf %174, %175 : vector<8x16xf32>
    %177 = vector.broadcast %31 : vector<1x16xf32> to vector<8x16xf32>
    %178 = arith.addf %177, %176 : vector<8x16xf32>
    %179 = arith.addf %178, %168 : vector<8x16xf32>
    %180 = arith.fptosi %179 : vector<8x16xf32> to vector<8x16xi32>
    %cst_64 = arith.constant 1.000000e+00 : f32
    %181 = vector.broadcast %cst_64 : f32 to vector<8x16xf32>
    %182 = arith.addf %46, %181 : vector<8x16xf32>
    %cst_65 = arith.constant 1.000000e+00 : f32
    %183 = vector.broadcast %cst_65 : f32 to vector<8x16xf32>
    %184 = arith.addf %47, %183 : vector<8x16xf32>
    %cst_66 = arith.constant 0.000000e+00 : f32
    %185 = vector.broadcast %cst_66 : f32 to vector<8x16xf32>
    %186 = arith.cmpf oge, %182, %185 : vector<8x16xf32>
    %cst_67 = arith.constant 1.000000e+00 : f32
    %187 = vector.broadcast %cst_67 : f32 to vector<1x16xf32>
    %188 = arith.subf %29, %187 : vector<1x16xf32>
    %189 = vector.broadcast %188 : vector<1x16xf32> to vector<8x16xf32>
    %190 = arith.cmpf ole, %182, %189 : vector<8x16xf32>
    %191 = arith.andi %186, %190 : vector<8x16xi1>
    %cst_68 = arith.constant 0.000000e+00 : f32
    %192 = vector.broadcast %cst_68 : f32 to vector<8x16xf32>
    %193 = arith.cmpf oge, %184, %192 : vector<8x16xf32>
    %194 = arith.andi %191, %193 : vector<8x16xi1>
    %cst_69 = arith.constant 1.000000e+00 : f32
    %195 = vector.broadcast %cst_69 : f32 to vector<1x16xf32>
    %196 = arith.subf %30, %195 : vector<1x16xf32>
    %197 = vector.broadcast %196 : vector<1x16xf32> to vector<8x16xf32>
    %198 = arith.cmpf ole, %184, %197 : vector<8x16xf32>
    %199 = arith.andi %194, %198 : vector<8x16xi1>
    %200 = arith.mulf %28, %48 : vector<8x16xf32>
    %201 = arith.mulf %200, %49 : vector<8x16xf32>
    %cst_70 = arith.constant 0.000000e+00 : f32
    %202 = vector.broadcast %cst_70 : f32 to vector<8x16xf32>
    %203 = arith.select %199, %201, %202 : vector<8x16xi1>, vector<8x16xf32>
    %cst_71 = arith.constant 1.000000e+00 : f32
    %204 = vector.broadcast %cst_71 : f32 to vector<1x16xf32>
    %205 = arith.subf %29, %204 : vector<1x16xf32>
    %cst_72 = arith.constant 0.000000e+00 : f32
    %206 = vector.broadcast %cst_72 : f32 to vector<8x16xf32>
    %207 = arith.maximumf %206, %182 : vector<8x16xf32>
    %208 = vector.broadcast %205 : vector<1x16xf32> to vector<8x16xf32>
    %209 = arith.minimumf %208, %207 : vector<8x16xf32>
    %cst_73 = arith.constant 1.000000e+00 : f32
    %210 = vector.broadcast %cst_73 : f32 to vector<1x16xf32>
    %211 = arith.subf %30, %210 : vector<1x16xf32>
    %cst_74 = arith.constant 0.000000e+00 : f32
    %212 = vector.broadcast %cst_74 : f32 to vector<8x16xf32>
    %213 = arith.maximumf %212, %184 : vector<8x16xf32>
    %214 = vector.broadcast %211 : vector<1x16xf32> to vector<8x16xf32>
    %215 = arith.minimumf %214, %213 : vector<8x16xf32>
    %216 = vector.broadcast %29 : vector<1x16xf32> to vector<8x16xf32>
    %217 = arith.mulf %215, %216 : vector<8x16xf32>
    %218 = vector.broadcast %31 : vector<1x16xf32> to vector<8x16xf32>
    %219 = arith.addf %218, %217 : vector<8x16xf32>
    %220 = arith.addf %219, %209 : vector<8x16xf32>
    %221 = arith.fptosi %220 : vector<8x16xf32> to vector<8x16xi32>
    %222 = tpu.iota {dimensions = array<i32: 2>} : vector<1x1x64xi32>
    %cst_75 = arith.constant 0.000000e+00 : f32
    %223 = vector.broadcast %cst_75 : f32 to vector<8x64xf32>
    %224 = vector.extract_strided_slice %98 {offsets = [0, 0], sizes = [8, 4], strides = [1, 1]} : vector<8x16xi32> to vector<8x4xi32>
    %225 = vector.shape_cast %224 : vector<8x4xi32> to vector<8x4x1xi32>
    %226 = vector.broadcast %225 : vector<8x4x1xi32> to vector<8x4x64xi32>
    %227 = vector.broadcast %222 : vector<1x1x64xi32> to vector<8x4x64xi32>
    %228 = arith.cmpi eq, %226, %227 : vector<8x4x64xi32>
    %229 = vector.extract_strided_slice %80 {offsets = [0, 0], sizes = [8, 4], strides = [1, 1]} : vector<8x16xf32> to vector<8x4xf32>
    %230 = vector.shape_cast %229 : vector<8x4xf32> to vector<8x4x1xf32>
    %cst_76 = arith.constant 0.000000e+00 : f32
    %231 = vector.shape_cast %230 : vector<8x4x1xf32> to vector<8x4x1xf32>
    %232 = vector.broadcast %231 : vector<8x4x1xf32> to vector<8x4x64xf32>
    %233 = vector.broadcast %cst_76 : f32 to vector<8x4x64xf32>
    %234 = arith.select %228, %232, %233 : vector<8x4x64xi1>, vector<8x4x64xf32>
    %cst_77 = arith.constant dense<0.000000e+00> : vector<8x64xf32>
    %235 = vector.multi_reduction <add>, %234, %cst_77 [1] : vector<8x4x64xf32> to vector<8x64xf32>
    %236 = arith.addf %223, %235 : vector<8x64xf32>
    %237 = vector.extract_strided_slice %139 {offsets = [0, 0], sizes = [8, 4], strides = [1, 1]} : vector<8x16xi32> to vector<8x4xi32>
    %238 = vector.shape_cast %237 : vector<8x4xi32> to vector<8x4x1xi32>
    %239 = vector.broadcast %238 : vector<8x4x1xi32> to vector<8x4x64xi32>
    %240 = vector.broadcast %222 : vector<1x1x64xi32> to vector<8x4x64xi32>
    %241 = arith.cmpi eq, %239, %240 : vector<8x4x64xi32>
    %242 = vector.extract_strided_slice %121 {offsets = [0, 0], sizes = [8, 4], strides = [1, 1]} : vector<8x16xf32> to vector<8x4xf32>
    %243 = vector.shape_cast %242 : vector<8x4xf32> to vector<8x4x1xf32>
    %cst_78 = arith.constant 0.000000e+00 : f32
    %244 = vector.shape_cast %243 : vector<8x4x1xf32> to vector<8x4x1xf32>
    %245 = vector.broadcast %244 : vector<8x4x1xf32> to vector<8x4x64xf32>
    %246 = vector.broadcast %cst_78 : f32 to vector<8x4x64xf32>
    %247 = arith.select %241, %245, %246 : vector<8x4x64xi1>, vector<8x4x64xf32>
    %cst_79 = arith.constant dense<0.000000e+00> : vector<8x64xf32>
    %248 = vector.multi_reduction <add>, %247, %cst_79 [1] : vector<8x4x64xf32> to vector<8x64xf32>
    %249 = arith.addf %236, %248 : vector<8x64xf32>
    %250 = vector.extract_strided_slice %180 {offsets = [0, 0], sizes = [8, 4], strides = [1, 1]} : vector<8x16xi32> to vector<8x4xi32>
    %251 = vector.shape_cast %250 : vector<8x4xi32> to vector<8x4x1xi32>
    %252 = vector.broadcast %251 : vector<8x4x1xi32> to vector<8x4x64xi32>
    %253 = vector.broadcast %222 : vector<1x1x64xi32> to vector<8x4x64xi32>
    %254 = arith.cmpi eq, %252, %253 : vector<8x4x64xi32>
    %255 = vector.extract_strided_slice %162 {offsets = [0, 0], sizes = [8, 4], strides = [1, 1]} : vector<8x16xf32> to vector<8x4xf32>
    %256 = vector.shape_cast %255 : vector<8x4xf32> to vector<8x4x1xf32>
    %cst_80 = arith.constant 0.000000e+00 : f32
    %257 = vector.shape_cast %256 : vector<8x4x1xf32> to vector<8x4x1xf32>
    %258 = vector.broadcast %257 : vector<8x4x1xf32> to vector<8x4x64xf32>
    %259 = vector.broadcast %cst_80 : f32 to vector<8x4x64xf32>
    %260 = arith.select %254, %258, %259 : vector<8x4x64xi1>, vector<8x4x64xf32>
    %cst_81 = arith.constant dense<0.000000e+00> : vector<8x64xf32>
    %261 = vector.multi_reduction <add>, %260, %cst_81 [1] : vector<8x4x64xf32> to vector<8x64xf32>
    %262 = arith.addf %249, %261 : vector<8x64xf32>
    %263 = vector.extract_strided_slice %221 {offsets = [0, 0], sizes = [8, 4], strides = [1, 1]} : vector<8x16xi32> to vector<8x4xi32>
    %264 = vector.shape_cast %263 : vector<8x4xi32> to vector<8x4x1xi32>
    %265 = vector.broadcast %264 : vector<8x4x1xi32> to vector<8x4x64xi32>
    %266 = vector.broadcast %222 : vector<1x1x64xi32> to vector<8x4x64xi32>
    %267 = arith.cmpi eq, %265, %266 : vector<8x4x64xi32>
    %268 = vector.extract_strided_slice %203 {offsets = [0, 0], sizes = [8, 4], strides = [1, 1]} : vector<8x16xf32> to vector<8x4xf32>
    %269 = vector.shape_cast %268 : vector<8x4xf32> to vector<8x4x1xf32>
    %cst_82 = arith.constant 0.000000e+00 : f32
    %270 = vector.shape_cast %269 : vector<8x4x1xf32> to vector<8x4x1xf32>
    %271 = vector.broadcast %270 : vector<8x4x1xf32> to vector<8x4x64xf32>
    %272 = vector.broadcast %cst_82 : f32 to vector<8x4x64xf32>
    %273 = arith.select %267, %271, %272 : vector<8x4x64xi1>, vector<8x4x64xf32>
    %cst_83 = arith.constant dense<0.000000e+00> : vector<8x64xf32>
    %274 = vector.multi_reduction <add>, %273, %cst_83 [1] : vector<8x4x64xf32> to vector<8x64xf32>
    %275 = arith.addf %262, %274 : vector<8x64xf32>
    %276 = arith.truncf %275 : vector<8x64xf32> to vector<8x64xbf16>
    %c0_84 = arith.constant 0 : index
    %c0_85 = arith.constant 0 : index
    %277 = vector.load %arg13[%c0_84, %c0_85] : memref<64x32xbf16, #tpu.memory_space<vmem>>, vector<64x8xbf16>
    %cst_86 = arith.constant dense<0.000000e+00> : vector<8x8xf32>
    %278 = tpu.matmul %276, %277, %cst_86 {dimension_numbers = #tpu.dot_dimension_numbers<[1], [0], [0], [1], [0, 0, 1, 1], [], []>} : vector<8x64xbf16>, vector<64x8xbf16>, vector<8x8xf32> -> vector<8x8xf32>
    %279 = arith.truncf %278 : vector<8x8xf32> to vector<8x8xbf16>
    %c0_87 = arith.constant 0 : index
    %c0_88 = arith.constant 0 : index
    %280 = vector.load %arg14[%c0_87, %c0_88] : memref<8x32xbf16, #tpu.memory_space<vmem>>, vector<8x8xbf16>
    tpu.vector_store %arg14[%c0_87, %c0_88], %279 {strides = array<i32>} : memref<8x32xbf16, #tpu.memory_space<vmem>>, vector<8x8xbf16>,
    %cst_89 = arith.constant 0.000000e+00 : f32
    %281 = vector.broadcast %cst_89 : f32 to vector<8x64xf32>
    %282 = vector.extract_strided_slice %98 {offsets = [0, 4], sizes = [8, 4], strides = [1, 1]} : vector<8x16xi32> to vector<8x4xi32>
    %283 = vector.shape_cast %282 : vector<8x4xi32> to vector<8x4x1xi32>
    %284 = vector.broadcast %283 : vector<8x4x1xi32> to vector<8x4x64xi32>
    %285 = vector.broadcast %222 : vector<1x1x64xi32> to vector<8x4x64xi32>
    %286 = arith.cmpi eq, %284, %285 : vector<8x4x64xi32>
    %287 = vector.extract_strided_slice %80 {offsets = [0, 4], sizes = [8, 4], strides = [1, 1]} : vector<8x16xf32> to vector<8x4xf32>
    %288 = vector.shape_cast %287 : vector<8x4xf32> to vector<8x4x1xf32>
    %cst_90 = arith.constant 0.000000e+00 : f32
    %289 = vector.shape_cast %288 : vector<8x4x1xf32> to vector<8x4x1xf32>
    %290 = vector.broadcast %289 : vector<8x4x1xf32> to vector<8x4x64xf32>
    %291 = vector.broadcast %cst_90 : f32 to vector<8x4x64xf32>
    %292 = arith.select %286, %290, %291 : vector<8x4x64xi1>, vector<8x4x64xf32>
    %cst_91 = arith.constant dense<0.000000e+00> : vector<8x64xf32>
    %293 = vector.multi_reduction <add>, %292, %cst_91 [1] : vector<8x4x64xf32> to vector<8x64xf32>
    %294 = arith.addf %281, %293 : vector<8x64xf32>
    %295 = vector.extract_strided_slice %139 {offsets = [0, 4], sizes = [8, 4], strides = [1, 1]} : vector<8x16xi32> to vector<8x4xi32>
    %296 = vector.shape_cast %295 : vector<8x4xi32> to vector<8x4x1xi32>
    %297 = vector.broadcast %296 : vector<8x4x1xi32> to vector<8x4x64xi32>
    %298 = vector.broadcast %222 : vector<1x1x64xi32> to vector<8x4x64xi32>
    %299 = arith.cmpi eq, %297, %298 : vector<8x4x64xi32>
    %300 = vector.extract_strided_slice %121 {offsets = [0, 4], sizes = [8, 4], strides = [1, 1]} : vector<8x16xf32> to vector<8x4xf32>
    %301 = vector.shape_cast %300 : vector<8x4xf32> to vector<8x4x1xf32>
    %cst_92 = arith.constant 0.000000e+00 : f32
    %302 = vector.shape_cast %301 : vector<8x4x1xf32> to vector<8x4x1xf32>
    %303 = vector.broadcast %302 : vector<8x4x1xf32> to vector<8x4x64xf32>
    %304 = vector.broadcast %cst_92 : f32 to vector<8x4x64xf32>
    %305 = arith.select %299, %303, %304 : vector<8x4x64xi1>, vector<8x4x64xf32>
    %cst_93 = arith.constant dense<0.000000e+00> : vector<8x64xf32>
    %306 = vector.multi_reduction <add>, %305, %cst_93 [1] : vector<8x4x64xf32> to vector<8x64xf32>
    %307 = arith.addf %294, %306 : vector<8x64xf32>
    %308 = vector.extract_strided_slice %180 {offsets = [0, 4], sizes = [8, 4], strides = [1, 1]} : vector<8x16xi32> to vector<8x4xi32>
    %309 = vector.shape_cast %308 : vector<8x4xi32> to vector<8x4x1xi32>
    %310 = vector.broadcast %309 : vector<8x4x1xi32> to vector<8x4x64xi32>
    %311 = vector.broadcast %222 : vector<1x1x64xi32> to vector<8x4x64xi32>
    %312 = arith.cmpi eq, %310, %311 : vector<8x4x64xi32>
    %313 = vector.extract_strided_slice %162 {offsets = [0, 4], sizes = [8, 4], strides = [1, 1]} : vector<8x16xf32> to vector<8x4xf32>
    %314 = vector.shape_cast %313 : vector<8x4xf32> to vector<8x4x1xf32>
    %cst_94 = arith.constant 0.000000e+00 : f32
    %315 = vector.shape_cast %314 : vector<8x4x1xf32> to vector<8x4x1xf32>
    %316 = vector.broadcast %315 : vector<8x4x1xf32> to vector<8x4x64xf32>
    %317 = vector.broadcast %cst_94 : f32 to vector<8x4x64xf32>
    %318 = arith.select %312, %316, %317 : vector<8x4x64xi1>, vector<8x4x64xf32>
    %cst_95 = arith.constant dense<0.000000e+00> : vector<8x64xf32>
    %319 = vector.multi_reduction <add>, %318, %cst_95 [1] : vector<8x4x64xf32> to vector<8x64xf32>
    %320 = arith.addf %307, %319 : vector<8x64xf32>
    %321 = vector.extract_strided_slice %221 {offsets = [0, 4], sizes = [8, 4], strides = [1, 1]} : vector<8x16xi32> to vector<8x4xi32>
    %322 = vector.shape_cast %321 : vector<8x4xi32> to vector<8x4x1xi32>
    %323 = vector.broadcast %322 : vector<8x4x1xi32> to vector<8x4x64xi32>
    %324 = vector.broadcast %222 : vector<1x1x64xi32> to vector<8x4x64xi32>
    %325 = arith.cmpi eq, %323, %324 : vector<8x4x64xi32>
    %326 = vector.extract_strided_slice %203 {offsets = [0, 4], sizes = [8, 4], strides = [1, 1]} : vector<8x16xf32> to vector<8x4xf32>
    %327 = vector.shape_cast %326 : vector<8x4xf32> to vector<8x4x1xf32>
    %cst_96 = arith.constant 0.000000e+00 : f32
    %328 = vector.shape_cast %327 : vector<8x4x1xf32> to vector<8x4x1xf32>
    %329 = vector.broadcast %328 : vector<8x4x1xf32> to vector<8x4x64xf32>
    %330 = vector.broadcast %cst_96 : f32 to vector<8x4x64xf32>
    %331 = arith.select %325, %329, %330 : vector<8x4x64xi1>, vector<8x4x64xf32>
    %cst_97 = arith.constant dense<0.000000e+00> : vector<8x64xf32>
    %332 = vector.multi_reduction <add>, %331, %cst_97 [1] : vector<8x4x64xf32> to vector<8x64xf32>
    %333 = arith.addf %320, %332 : vector<8x64xf32>
    %334 = arith.truncf %333 : vector<8x64xf32> to vector<8x64xbf16>
    %c0_98 = arith.constant 0 : index
    %c8 = arith.constant 8 : index
    %335 = vector.load %arg13[%c0_98, %c8] : memref<64x32xbf16, #tpu.memory_space<vmem>>, vector<64x8xbf16>
    %cst_99 = arith.constant dense<0.000000e+00> : vector<8x8xf32>
    %336 = tpu.matmul %334, %335, %cst_99 {dimension_numbers = #tpu.dot_dimension_numbers<[1], [0], [0], [1], [0, 0, 1, 1], [], []>} : vector<8x64xbf16>, vector<64x8xbf16>, vector<8x8xf32> -> vector<8x8xf32>
    %337 = arith.truncf %336 : vector<8x8xf32> to vector<8x8xbf16>
    %c0_100 = arith.constant 0 : index
    %c8_101 = arith.constant 8 : index
    %338 = vector.load %arg14[%c0_100, %c8_101] : memref<8x32xbf16, #tpu.memory_space<vmem>>, vector<8x8xbf16>
    tpu.vector_store %arg14[%c0_100, %c8_101], %337 {strides = array<i32>} : memref<8x32xbf16, #tpu.memory_space<vmem>>, vector<8x8xbf16>,
    %cst_102 = arith.constant 0.000000e+00 : f32
    %339 = vector.broadcast %cst_102 : f32 to vector<8x64xf32>
    %340 = vector.extract_strided_slice %98 {offsets = [0, 8], sizes = [8, 4], strides = [1, 1]} : vector<8x16xi32> to vector<8x4xi32>
    %341 = vector.shape_cast %340 : vector<8x4xi32> to vector<8x4x1xi32>
    %342 = vector.broadcast %341 : vector<8x4x1xi32> to vector<8x4x64xi32>
    %343 = vector.broadcast %222 : vector<1x1x64xi32> to vector<8x4x64xi32>
    %344 = arith.cmpi eq, %342, %343 : vector<8x4x64xi32>
    %345 = vector.extract_strided_slice %80 {offsets = [0, 8], sizes = [8, 4], strides = [1, 1]} : vector<8x16xf32> to vector<8x4xf32>
    %346 = vector.shape_cast %345 : vector<8x4xf32> to vector<8x4x1xf32>
    %cst_103 = arith.constant 0.000000e+00 : f32
    %347 = vector.shape_cast %346 : vector<8x4x1xf32> to vector<8x4x1xf32>
    %348 = vector.broadcast %347 : vector<8x4x1xf32> to vector<8x4x64xf32>
    %349 = vector.broadcast %cst_103 : f32 to vector<8x4x64xf32>
    %350 = arith.select %344, %348, %349 : vector<8x4x64xi1>, vector<8x4x64xf32>
    %cst_104 = arith.constant dense<0.000000e+00> : vector<8x64xf32>
    %351 = vector.multi_reduction <add>, %350, %cst_104 [1] : vector<8x4x64xf32> to vector<8x64xf32>
    %352 = arith.addf %339, %351 : vector<8x64xf32>
    %353 = vector.extract_strided_slice %139 {offsets = [0, 8], sizes = [8, 4], strides = [1, 1]} : vector<8x16xi32> to vector<8x4xi32>
    %354 = vector.shape_cast %353 : vector<8x4xi32> to vector<8x4x1xi32>
    %355 = vector.broadcast %354 : vector<8x4x1xi32> to vector<8x4x64xi32>
    %356 = vector.broadcast %222 : vector<1x1x64xi32> to vector<8x4x64xi32>
    %357 = arith.cmpi eq, %355, %356 : vector<8x4x64xi32>
    %358 = vector.extract_strided_slice %121 {offsets = [0, 8], sizes = [8, 4], strides = [1, 1]} : vector<8x16xf32> to vector<8x4xf32>
    %359 = vector.shape_cast %358 : vector<8x4xf32> to vector<8x4x1xf32>
    %cst_105 = arith.constant 0.000000e+00 : f32
    %360 = vector.shape_cast %359 : vector<8x4x1xf32> to vector<8x4x1xf32>
    %361 = vector.broadcast %360 : vector<8x4x1xf32> to vector<8x4x64xf32>
    %362 = vector.broadcast %cst_105 : f32 to vector<8x4x64xf32>
    %363 = arith.select %357, %361, %362 : vector<8x4x64xi1>, vector<8x4x64xf32>
    %cst_106 = arith.constant dense<0.000000e+00> : vector<8x64xf32>
    %364 = vector.multi_reduction <add>, %363, %cst_106 [1] : vector<8x4x64xf32> to vector<8x64xf32>
    %365 = arith.addf %352, %364 : vector<8x64xf32>
    %366 = vector.extract_strided_slice %180 {offsets = [0, 8], sizes = [8, 4], strides = [1, 1]} : vector<8x16xi32> to vector<8x4xi32>
    %367 = vector.shape_cast %366 : vector<8x4xi32> to vector<8x4x1xi32>
    %368 = vector.broadcast %367 : vector<8x4x1xi32> to vector<8x4x64xi32>
    %369 = vector.broadcast %222 : vector<1x1x64xi32> to vector<8x4x64xi32>
    %370 = arith.cmpi eq, %368, %369 : vector<8x4x64xi32>
    %371 = vector.extract_strided_slice %162 {offsets = [0, 8], sizes = [8, 4], strides = [1, 1]} : vector<8x16xf32> to vector<8x4xf32>
    %372 = vector.shape_cast %371 : vector<8x4xf32> to vector<8x4x1xf32>
    %cst_107 = arith.constant 0.000000e+00 : f32
    %373 = vector.shape_cast %372 : vector<8x4x1xf32> to vector<8x4x1xf32>
    %374 = vector.broadcast %373 : vector<8x4x1xf32> to vector<8x4x64xf32>
    %375 = vector.broadcast %cst_107 : f32 to vector<8x4x64xf32>
    %376 = arith.select %370, %374, %375 : vector<8x4x64xi1>, vector<8x4x64xf32>
    %cst_108 = arith.constant dense<0.000000e+00> : vector<8x64xf32>
    %377 = vector.multi_reduction <add>, %376, %cst_108 [1] : vector<8x4x64xf32> to vector<8x64xf32>
    %378 = arith.addf %365, %377 : vector<8x64xf32>
    %379 = vector.extract_strided_slice %221 {offsets = [0, 8], sizes = [8, 4], strides = [1, 1]} : vector<8x16xi32> to vector<8x4xi32>
    %380 = vector.shape_cast %379 : vector<8x4xi32> to vector<8x4x1xi32>
    %381 = vector.broadcast %380 : vector<8x4x1xi32> to vector<8x4x64xi32>
    %382 = vector.broadcast %222 : vector<1x1x64xi32> to vector<8x4x64xi32>
    %383 = arith.cmpi eq, %381, %382 : vector<8x4x64xi32>
    %384 = vector.extract_strided_slice %203 {offsets = [0, 8], sizes = [8, 4], strides = [1, 1]} : vector<8x16xf32> to vector<8x4xf32>
    %385 = vector.shape_cast %384 : vector<8x4xf32> to vector<8x4x1xf32>
    %cst_109 = arith.constant 0.000000e+00 : f32
    %386 = vector.shape_cast %385 : vector<8x4x1xf32> to vector<8x4x1xf32>
    %387 = vector.broadcast %386 : vector<8x4x1xf32> to vector<8x4x64xf32>
    %388 = vector.broadcast %cst_109 : f32 to vector<8x4x64xf32>
    %389 = arith.select %383, %387, %388 : vector<8x4x64xi1>, vector<8x4x64xf32>
    %cst_110 = arith.constant dense<0.000000e+00> : vector<8x64xf32>
    %390 = vector.multi_reduction <add>, %389, %cst_110 [1] : vector<8x4x64xf32> to vector<8x64xf32>
    %391 = arith.addf %378, %390 : vector<8x64xf32>
    %392 = arith.truncf %391 : vector<8x64xf32> to vector<8x64xbf16>
    %c0_111 = arith.constant 0 : index
    %c16_112 = arith.constant 16 : index
    %393 = vector.load %arg13[%c0_111, %c16_112] : memref<64x32xbf16, #tpu.memory_space<vmem>>, vector<64x8xbf16>
    %cst_113 = arith.constant dense<0.000000e+00> : vector<8x8xf32>
    %394 = tpu.matmul %392, %393, %cst_113 {dimension_numbers = #tpu.dot_dimension_numbers<[1], [0], [0], [1], [0, 0, 1, 1], [], []>} : vector<8x64xbf16>, vector<64x8xbf16>, vector<8x8xf32> -> vector<8x8xf32>
    %395 = arith.truncf %394 : vector<8x8xf32> to vector<8x8xbf16>
    %c0_114 = arith.constant 0 : index
    %c16_115 = arith.constant 16 : index
    %396 = vector.load %arg14[%c0_114, %c16_115] : memref<8x32xbf16, #tpu.memory_space<vmem>>, vector<8x8xbf16>
    tpu.vector_store %arg14[%c0_114, %c16_115], %395 {strides = array<i32>} : memref<8x32xbf16, #tpu.memory_space<vmem>>, vector<8x8xbf16>,
    %cst_116 = arith.constant 0.000000e+00 : f32
    %397 = vector.broadcast %cst_116 : f32 to vector<8x64xf32>
    %398 = vector.extract_strided_slice %98 {offsets = [0, 12], sizes = [8, 4], strides = [1, 1]} : vector<8x16xi32> to vector<8x4xi32>
    %399 = vector.shape_cast %398 : vector<8x4xi32> to vector<8x4x1xi32>
    %400 = vector.broadcast %399 : vector<8x4x1xi32> to vector<8x4x64xi32>
    %401 = vector.broadcast %222 : vector<1x1x64xi32> to vector<8x4x64xi32>
    %402 = arith.cmpi eq, %400, %401 : vector<8x4x64xi32>
    %403 = vector.extract_strided_slice %80 {offsets = [0, 12], sizes = [8, 4], strides = [1, 1]} : vector<8x16xf32> to vector<8x4xf32>
    %404 = vector.shape_cast %403 : vector<8x4xf32> to vector<8x4x1xf32>
    %cst_117 = arith.constant 0.000000e+00 : f32
    %405 = vector.shape_cast %404 : vector<8x4x1xf32> to vector<8x4x1xf32>
    %406 = vector.broadcast %405 : vector<8x4x1xf32> to vector<8x4x64xf32>
    %407 = vector.broadcast %cst_117 : f32 to vector<8x4x64xf32>
    %408 = arith.select %402, %406, %407 : vector<8x4x64xi1>, vector<8x4x64xf32>
    %cst_118 = arith.constant dense<0.000000e+00> : vector<8x64xf32>
    %409 = vector.multi_reduction <add>, %408, %cst_118 [1] : vector<8x4x64xf32> to vector<8x64xf32>
    %410 = arith.addf %397, %409 : vector<8x64xf32>
    %411 = vector.extract_strided_slice %139 {offsets = [0, 12], sizes = [8, 4], strides = [1, 1]} : vector<8x16xi32> to vector<8x4xi32>
    %412 = vector.shape_cast %411 : vector<8x4xi32> to vector<8x4x1xi32>
    %413 = vector.broadcast %412 : vector<8x4x1xi32> to vector<8x4x64xi32>
    %414 = vector.broadcast %222 : vector<1x1x64xi32> to vector<8x4x64xi32>
    %415 = arith.cmpi eq, %413, %414 : vector<8x4x64xi32>
    %416 = vector.extract_strided_slice %121 {offsets = [0, 12], sizes = [8, 4], strides = [1, 1]} : vector<8x16xf32> to vector<8x4xf32>
    %417 = vector.shape_cast %416 : vector<8x4xf32> to vector<8x4x1xf32>
    %cst_119 = arith.constant 0.000000e+00 : f32
    %418 = vector.shape_cast %417 : vector<8x4x1xf32> to vector<8x4x1xf32>
    %419 = vector.broadcast %418 : vector<8x4x1xf32> to vector<8x4x64xf32>
    %420 = vector.broadcast %cst_119 : f32 to vector<8x4x64xf32>
    %421 = arith.select %415, %419, %420 : vector<8x4x64xi1>, vector<8x4x64xf32>
    %cst_120 = arith.constant dense<0.000000e+00> : vector<8x64xf32>
    %422 = vector.multi_reduction <add>, %421, %cst_120 [1] : vector<8x4x64xf32> to vector<8x64xf32>
    %423 = arith.addf %410, %422 : vector<8x64xf32>
    %424 = vector.extract_strided_slice %180 {offsets = [0, 12], sizes = [8, 4], strides = [1, 1]} : vector<8x16xi32> to vector<8x4xi32>
    %425 = vector.shape_cast %424 : vector<8x4xi32> to vector<8x4x1xi32>
    %426 = vector.broadcast %425 : vector<8x4x1xi32> to vector<8x4x64xi32>
    %427 = vector.broadcast %222 : vector<1x1x64xi32> to vector<8x4x64xi32>
    %428 = arith.cmpi eq, %426, %427 : vector<8x4x64xi32>
    %429 = vector.extract_strided_slice %162 {offsets = [0, 12], sizes = [8, 4], strides = [1, 1]} : vector<8x16xf32> to vector<8x4xf32>
    %430 = vector.shape_cast %429 : vector<8x4xf32> to vector<8x4x1xf32>
    %cst_121 = arith.constant 0.000000e+00 : f32
    %431 = vector.shape_cast %430 : vector<8x4x1xf32> to vector<8x4x1xf32>
    %432 = vector.broadcast %431 : vector<8x4x1xf32> to vector<8x4x64xf32>
    %433 = vector.broadcast %cst_121 : f32 to vector<8x4x64xf32>
    %434 = arith.select %428, %432, %433 : vector<8x4x64xi1>, vector<8x4x64xf32>
    %cst_122 = arith.constant dense<0.000000e+00> : vector<8x64xf32>
    %435 = vector.multi_reduction <add>, %434, %cst_122 [1] : vector<8x4x64xf32> to vector<8x64xf32>
    %436 = arith.addf %423, %435 : vector<8x64xf32>
    %437 = vector.extract_strided_slice %221 {offsets = [0, 12], sizes = [8, 4], strides = [1, 1]} : vector<8x16xi32> to vector<8x4xi32>
    %438 = vector.shape_cast %437 : vector<8x4xi32> to vector<8x4x1xi32>
    %439 = vector.broadcast %438 : vector<8x4x1xi32> to vector<8x4x64xi32>
    %440 = vector.broadcast %222 : vector<1x1x64xi32> to vector<8x4x64xi32>
    %441 = arith.cmpi eq, %439, %440 : vector<8x4x64xi32>
    %442 = vector.extract_strided_slice %203 {offsets = [0, 12], sizes = [8, 4], strides = [1, 1]} : vector<8x16xf32> to vector<8x4xf32>
    %443 = vector.shape_cast %442 : vector<8x4xf32> to vector<8x4x1xf32>
    %cst_123 = arith.constant 0.000000e+00 : f32
    %444 = vector.shape_cast %443 : vector<8x4x1xf32> to vector<8x4x1xf32>
    %445 = vector.broadcast %444 : vector<8x4x1xf32> to vector<8x4x64xf32>
    %446 = vector.broadcast %cst_123 : f32 to vector<8x4x64xf32>
    %447 = arith.select %441, %445, %446 : vector<8x4x64xi1>, vector<8x4x64xf32>
    %cst_124 = arith.constant dense<0.000000e+00> : vector<8x64xf32>
    %448 = vector.multi_reduction <add>, %447, %cst_124 [1] : vector<8x4x64xf32> to vector<8x64xf32>
    %449 = arith.addf %436, %448 : vector<8x64xf32>
    %450 = arith.truncf %449 : vector<8x64xf32> to vector<8x64xbf16>
    %c0_125 = arith.constant 0 : index
    %c24 = arith.constant 24 : index
    %451 = vector.load %arg13[%c0_125, %c24] : memref<64x32xbf16, #tpu.memory_space<vmem>>, vector<64x8xbf16>
    %cst_126 = arith.constant dense<0.000000e+00> : vector<8x8xf32>
    %452 = tpu.matmul %450, %451, %cst_126 {dimension_numbers = #tpu.dot_dimension_numbers<[1], [0], [0], [1], [0, 0, 1, 1], [], []>} : vector<8x64xbf16>, vector<64x8xbf16>, vector<8x8xf32> -> vector<8x8xf32>
    %453 = arith.truncf %452 : vector<8x8xf32> to vector<8x8xbf16>
    %c0_127 = arith.constant 0 : index
    %c24_128 = arith.constant 24 : index
    %454 = vector.load %arg14[%c0_127, %c24_128] : memref<8x32xbf16, #tpu.memory_space<vmem>>, vector<8x8xbf16>
    tpu.vector_store %arg14[%c0_127, %c24_128], %453 {strides = array<i32>} : memref<8x32xbf16, #tpu.memory_space<vmem>>, vector<8x8xbf16>,
    %c0_129 = arith.constant 0 : index
    %c0_130 = arith.constant 0 : index
    %455 = vector.load %arg14[%c0_129, %c0_130] : memref<8x32xbf16, #tpu.memory_space<vmem>>, vector<8x32xbf16>
    %c64 = arith.constant 64 : index
    %c0_131 = arith.constant 0 : index
    %456 = vector.load %arg10[%c64, %c0_131] : memref<160x32xbf16, #tpu.memory_space<vmem>>, vector<32x32xbf16>
    %cst_132 = arith.constant dense<0.000000e+00> : vector<8x32xf32>
    %457 = tpu.matmul %455, %456, %cst_132 {dimension_numbers = #tpu.dot_dimension_numbers<[1], [0], [0], [1], [0, 0, 1, 1], [], []>} : vector<8x32xbf16>, vector<32x32xbf16>, vector<8x32xf32> -> vector<8x32xf32>
    %458 = vector.extract_strided_slice %6 {offsets = [4, 0], sizes = [1, 32], strides = [1, 1]} : vector<11x32xf32> to vector<1x32xf32>
    %459 = vector.broadcast %458 : vector<1x32xf32> to vector<8x32xf32>
    %460 = arith.addf %457, %459 : vector<8x32xf32>
    %461 = arith.truncf %460 : vector<8x32xf32> to vector<8x32xbf16>
    %c96 = arith.constant 96 : index
    %c0_133 = arith.constant 0 : index
    %462 = vector.load %arg10[%c96, %c0_133] : memref<160x32xbf16, #tpu.memory_space<vmem>>, vector<32x32xbf16>
    %cst_134 = arith.constant dense<0.000000e+00> : vector<8x32xf32>
    %463 = tpu.matmul %461, %462, %cst_134 {dimension_numbers = #tpu.dot_dimension_numbers<[1], [0], [0], [1], [0, 0, 1, 1], [], []>} : vector<8x32xbf16>, vector<32x32xbf16>, vector<8x32xf32> -> vector<8x32xf32>
    %464 = vector.extract_strided_slice %6 {offsets = [5, 0], sizes = [1, 32], strides = [1, 1]} : vector<11x32xf32> to vector<1x32xf32>
    %465 = vector.broadcast %464 : vector<1x32xf32> to vector<8x32xf32>
    %466 = arith.addf %463, %465 : vector<8x32xf32>
    %467 = arith.addf %1, %466 : vector<8x32xf32>
    %cst_135 = arith.constant dense<0.000000e+00> : vector<8xf32>
    %468 = vector.multi_reduction <add>, %467, %cst_135 [1] : vector<8x32xf32> to vector<8xf32>
    %469 = vector.shape_cast %468 : vector<8xf32> to vector<8x1xf32>
    %cst_136 = arith.constant 3.200000e+01 : f32
    %470 = vector.broadcast %cst_136 : f32 to vector<8x1xf32>
    %471 = arith.divf %469, %470 : vector<8x1xf32>
    %472 = vector.broadcast %471 : vector<8x1xf32> to vector<8x32xf32>
    %473 = arith.subf %467, %472 : vector<8x32xf32>
    %474 = arith.mulf %473, %473 : vector<8x32xf32>
    %cst_137 = arith.constant dense<0.000000e+00> : vector<8xf32>
    %475 = vector.multi_reduction <add>, %474, %cst_137 [1] : vector<8x32xf32> to vector<8xf32>
    %476 = vector.shape_cast %475 : vector<8xf32> to vector<8x1xf32>
    %cst_138 = arith.constant 3.200000e+01 : f32
    %477 = vector.broadcast %cst_138 : f32 to vector<8x1xf32>
    %478 = arith.divf %476, %477 : vector<8x1xf32>
    %479 = vector.broadcast %471 : vector<8x1xf32> to vector<8x32xf32>
    %480 = arith.subf %467, %479 : vector<8x32xf32>
    %cst_139 = arith.constant 9.99999974E-6 : f32
    %481 = vector.broadcast %cst_139 : f32 to vector<8x1xf32>
    %482 = arith.addf %478, %481 : vector<8x1xf32>
    %483 = math.rsqrt %482 : vector<8x1xf32>
    %484 = vector.broadcast %483 : vector<8x1xf32> to vector<8x32xf32>
    %485 = arith.mulf %480, %484 : vector<8x32xf32>
    %486 = vector.extract_strided_slice %6 {offsets = [6, 0], sizes = [1, 32], strides = [1, 1]} : vector<11x32xf32> to vector<1x32xf32>
    %487 = vector.broadcast %486 : vector<1x32xf32> to vector<8x32xf32>
    %488 = arith.mulf %485, %487 : vector<8x32xf32>
    %489 = vector.extract_strided_slice %6 {offsets = [7, 0], sizes = [1, 32], strides = [1, 1]} : vector<11x32xf32> to vector<1x32xf32>
    %490 = vector.broadcast %489 : vector<1x32xf32> to vector<8x32xf32>
    %491 = arith.addf %488, %490 : vector<8x32xf32>
    %492 = arith.truncf %491 : vector<8x32xf32> to vector<8x32xbf16>
    %c128 = arith.constant 128 : index
    %c0_140 = arith.constant 0 : index
    %493 = vector.load %arg10[%c128, %c0_140] : memref<160x32xbf16, #tpu.memory_space<vmem>>, vector<32x32xbf16>
    %cst_141 = arith.constant dense<0.000000e+00> : vector<8x32xf32>
    %494 = tpu.matmul %492, %493, %cst_141 {dimension_numbers = #tpu.dot_dimension_numbers<[1], [0], [0], [1], [0, 0, 1, 1], [], []>} : vector<8x32xbf16>, vector<32x32xbf16>, vector<8x32xf32> -> vector<8x32xf32>
    %495 = vector.extract_strided_slice %6 {offsets = [8, 0], sizes = [1, 32], strides = [1, 1]} : vector<11x32xf32> to vector<1x32xf32>
    %496 = vector.broadcast %495 : vector<1x32xf32> to vector<8x32xf32>
    %497 = arith.addf %494, %496 : vector<8x32xf32>
    %cst_142 = arith.constant 0.000000e+00 : f32
    %498 = vector.broadcast %cst_142 : f32 to vector<8x32xf32>
    %499 = arith.maximumf %497, %498 : vector<8x32xf32>
    %500 = arith.addf %491, %499 : vector<8x32xf32>
    %cst_143 = arith.constant dense<0.000000e+00> : vector<8xf32>
    %501 = vector.multi_reduction <add>, %500, %cst_143 [1] : vector<8x32xf32> to vector<8xf32>
    %502 = vector.shape_cast %501 : vector<8xf32> to vector<8x1xf32>
    %cst_144 = arith.constant 3.200000e+01 : f32
    %503 = vector.broadcast %cst_144 : f32 to vector<8x1xf32>
    %504 = arith.divf %502, %503 : vector<8x1xf32>
    %505 = vector.broadcast %504 : vector<8x1xf32> to vector<8x32xf32>
    %506 = arith.subf %500, %505 : vector<8x32xf32>
    %507 = arith.mulf %506, %506 : vector<8x32xf32>
    %cst_145 = arith.constant dense<0.000000e+00> : vector<8xf32>
    %508 = vector.multi_reduction <add>, %507, %cst_145 [1] : vector<8x32xf32> to vector<8xf32>
    %509 = vector.shape_cast %508 : vector<8xf32> to vector<8x1xf32>
    %cst_146 = arith.constant 3.200000e+01 : f32
    %510 = vector.broadcast %cst_146 : f32 to vector<8x1xf32>
    %511 = arith.divf %509, %510 : vector<8x1xf32>
    %512 = vector.broadcast %504 : vector<8x1xf32> to vector<8x32xf32>
    %513 = arith.subf %500, %512 : vector<8x32xf32>
    %cst_147 = arith.constant 9.99999974E-6 : f32
    %514 = vector.broadcast %cst_147 : f32 to vector<8x1xf32>
    %515 = arith.addf %511, %514 : vector<8x1xf32>
    %516 = math.rsqrt %515 : vector<8x1xf32>
    %517 = vector.broadcast %516 : vector<8x1xf32> to vector<8x32xf32>
    %518 = arith.mulf %513, %517 : vector<8x32xf32>
    %519 = vector.extract_strided_slice %6 {offsets = [9, 0], sizes = [1, 32], strides = [1, 1]} : vector<11x32xf32> to vector<1x32xf32>
    %520 = vector.broadcast %519 : vector<1x32xf32> to vector<8x32xf32>
    %521 = arith.mulf %518, %520 : vector<8x32xf32>
    %522 = vector.extract_strided_slice %6 {offsets = [10, 0], sizes = [1, 32], strides = [1, 1]} : vector<11x32xf32> to vector<1x32xf32>
    %523 = vector.broadcast %522 : vector<1x32xf32> to vector<8x32xf32>
    %524 = arith.addf %521, %523 : vector<8x32xf32>
    %c0_148 = arith.constant 0 : index
    %c0_149 = arith.constant 0 : index
    %c0_150 = arith.constant 0 : index
    %525 = vector.load %arg12[%c0_148, %c0_149, %c0_150] : memref<1x8x32xf32, #tpu.memory_space<vmem>>, vector<1x8x32xf32>
    %526 = vector.shape_cast %525 : vector<1x8x32xf32> to vector<8x32xf32>
    %527 = vector.shape_cast %524 : vector<8x32xf32> to vector<1x8x32xf32>
    tpu.vector_store %arg12[%c0_148, %c0_149, %c0_150], %527 {strides = array<i32>} : memref<1x8x32xf32, #tpu.memory_space<vmem>>, vector<1x8x32xf32>,
    return
  }
  func.func @transform_0(%arg0: i32, %arg1: i32) -> (i32, i32, i32) {
    %c0_i32 = arith.constant 0 : i32
    %c0_i32_0 = arith.constant 0 : i32
    return %arg0, %arg1, %c0_i32 : i32, i32, i32
  }
  func.func @transform_1(%arg0: i32, %arg1: i32) -> (i32, i32, i32) {
    %c0_i32 = arith.constant 0 : i32
    %c0_i32_0 = arith.constant 0 : i32
    return %arg0, %arg1, %c0_i32 : i32, i32, i32
  }
  func.func @transform_2(%arg0: i32, %arg1: i32) -> (i32, i32, i32) {
    %c0_i32 = arith.constant 0 : i32
    %c0_i32_0 = arith.constant 0 : i32
    return %arg0, %arg1, %c0_i32 : i32, i32, i32
  }
  func.func @transform_3(%arg0: i32, %arg1: i32) -> (i32, i32, i32) {
    %c0_i32 = arith.constant 0 : i32
    %c0_i32_0 = arith.constant 0 : i32
    %c0_i32_1 = arith.constant 0 : i32
    return %arg0, %c0_i32, %c0_i32_0 : i32, i32, i32
  }
  func.func @transform_4(%arg0: i32, %arg1: i32) -> (i32, i32) {
    %c0_i32 = arith.constant 0 : i32
    %c0_i32_0 = arith.constant 0 : i32
    %c0_i32_1 = arith.constant 0 : i32
    return %c0_i32, %c0_i32_0 : i32, i32
  }
  func.func @transform_5(%arg0: i32, %arg1: i32) -> (i32, i32) {
    %c0_i32 = arith.constant 0 : i32
    %c0_i32_0 = arith.constant 0 : i32
    %c0_i32_1 = arith.constant 0 : i32
    return %c0_i32, %c0_i32_0 : i32, i32
  }
  func.func @transform_6(%arg0: i32, %arg1: i32) -> (i32, i32) {
    %c0_i32 = arith.constant 0 : i32
    %c0_i32_0 = arith.constant 0 : i32
    %c0_i32_1 = arith.constant 0 : i32
    return %c0_i32, %c0_i32_0 : i32, i32
  }
  func.func @transform_7(%arg0: i32, %arg1: i32) -> (i32, i32) {
    %c0_i32 = arith.constant 0 : i32
    %c0_i32_0 = arith.constant 0 : i32
    %c0_i32_1 = arith.constant 0 : i32
    return %c0_i32, %c0_i32_0 : i32, i32
  }
  func.func @transform_8(%arg0: i32, %arg1: i32) -> (i32, i32) {
    %c0_i32 = arith.constant 0 : i32
    %c0_i32_0 = arith.constant 0 : i32
    %c0_i32_1 = arith.constant 0 : i32
    return %c0_i32, %c0_i32_0 : i32, i32
  }
  func.func @transform_9(%arg0: i32, %arg1: i32) -> (i32, i32) {
    %c0_i32 = arith.constant 0 : i32
    %c0_i32_0 = arith.constant 0 : i32
    %c0_i32_1 = arith.constant 0 : i32
    return %c0_i32, %c0_i32_0 : i32, i32
  }
  func.func @transform_10(%arg0: i32, %arg1: i32) -> (i32, i32, i32) {
    %c0_i32 = arith.constant 0 : i32
    %c0_i32_0 = arith.constant 0 : i32
    return %arg0, %arg1, %c0_i32 : i32, i32, i32
  }
}

</mosaic_0001>

<bundles_post_ra>
// kernel: tpu_custom_call.1
= control target key start
LH: loop header
LB: loop body
LE: loop exit
PB: predicated region body
PF: predicated region fallthrough
CT: control target
= control target key end

     0   :  { %15 = vsyncpa [#allocation5], 0  ;;  %s7441_s0 = inlined_call_operand.vmem [shape: f32[2,8,32], index: 0, kind: input, shape index: {}]   ;;  %s7442_s1 = inlined_call_operand.vmem [shape: f32[2,8,32], index: 1, kind: input, shape index: {}]   ;;  %s7443_s2 = inlined_call_operand.vmem [shape: f32[2,8,8], index: 2, kind: input, shape index: {}]   ;;  %s7444_s3 = inlined_call_operand.vmem [shape: f32[2,64,32], index: 3, kind: input, shape index: {}]   ;;  %s7445_s4 = inlined_call_operand.vmem [shape: bf16[32,48], index: 4, kind: input, shape index: {}]   ;;  %s7446_s5 = inlined_call_operand.vmem [shape: f32[1,48], index: 5, kind: input, shape index: {}]   ;;  %s7447_s6 = inlined_call_operand.vmem [shape: f32[8,32], index: 6, kind: input, shape index: {}]   ;;  %s7448_s7 = inlined_call_operand.vmem [shape: f32[19,16], index: 7, kind: input, shape index: {}]   ;;  %s7449_s8 = inlined_call_operand.vmem [shape: bf16[160,32], index: 8, kind: input, shape index: {}]   ;;  %s7450_s9 = inlined_call_operand.vmem [shape: f32[11,32], index: 9, kind: input, shape index: {}]   ;;  %s7451_s10 = inlined_call_operand.hbm [shape: f32[2,8,32], index: 10, kind: output, shape index: {}]  }
   0x1   :  { %17 = vsyncpa [#allocation5 + $0x1], 0  ;;  %s4961_s13 = smov 0   ;;  %s4963_s14 = smov 0  }
   0x2   :  { %s4965_s15 = smov 0   ;;  %s4967_s16 = smov 0  }
   0x3   :  { %s4969_s17 = smov 0   ;;  %s4971_s18 = smov 0  }
   0x4 LB: > { %s4474_s19 = sadd.s32 4294967295, %s4891_s18   ;;  %s4475_s20 = sadd.s32 4294967294, %s4891_s18   ;;  %s4891_s18 = sphi %s4971_s18, %s23_s18   ;;  %s4887_s17 = sphi %s4969_s17, %s7892_s17   ;;  %s4883_s16 = sphi %s4967_s16, %s7891_s16   ;;  %s4879_s15 = sphi %s4965_s15, %s7890_s15   ;;  %s4875_s14 = sphi %s4963_s14, %s7889_s14   ;;  %s4871_s13 = sphi %s4961_s13, %s7888_s13  }
   0x5   : > { %s35_s21 = sadd.s32 1, %s4887_s17  ;;  %s280_s22 = sadd.s32 1, %s4879_s15 }
   0x6   : > { %p37_p0 = scmp.ge.s32.totalorder %s35_s21, 2  ;;  %p290_p1 = scmp.ne.s32.totalorder %s4879_s15, %s4875_s14 }
   0x7   : > { %p291_p2 = scmp.eq.s32.totalorder %s4474_s19, 1  ;;  %p296_p3 = scmp.ne.s32.totalorder %s4875_s14, %s4871_s13 }
   0x8   : > { %s7894_s21 = smov (%p37_p0, %s35_s21), 0  ;;  %p297_p5 = scmp.eq.s32.totalorder %s4475_s20, 1 }
   0x9   : > { %7567 = sst [smem:[#allocation7_spill]] %s7894_s21  ;;  %p5001_p4 = por %p291_p2, %p290_p1 }
   0xa   : > { %s275_s24 = ssub.s32 %s4887_s17, %s7894_s21  ;;  %p4478_p6 = scmp.ge.s32.totalorder %s4891_s18, 1 }
   0xb   : > { %p278_p7 = scmp.eq.s32.totalorder %s275_s24, 0  ;;  %p5008_p8 = por %p297_p5, %p296_p3 }
   0xc   : > { %p371_p9 = scmp.lt.s32.totalorder %s4891_s18, 3 }
   0xd   : > { %s5014_s26 = scalar_select %p278_p7, %s4879_s15, %s280_s22  }
   0xe   : > { %p372_p10 = pnand %p4478_p6, %p371_p9 }
  0x10   : > { %375 = sbr.rel (%p372_p10) target bundleno = 3297 (0xce1), region = 60 }
  0x17   : > { %v4775_v0 = vld [vmem:[%s7449_s8] sm:$0xff]   ;;  %p430_p11 = scmp.lt.s32.totalorder %s4883_s16, 1  ;;  %v7455_v1 = vlaneseq  ;;  %v4776_v2 = vld [vmem:[%s7449_s8 + $0x8] sm:$0xff]   ;;  %v975_v4 = vld [vmem:[%s7448_s7 + $0x11] sm:$0x1]  ;;  %vm7566_vm0 = vcmask 261120  }
  0x18   : > { %4581 = vmatprep.subr.bf16.mxu0 %v4775_v0  ;;  %v4777_v5 = vld [vmem:[%s7445_s4] sm:$0xff]   ;;  %v4506_v6 = vadd.f32 -1.0, %v975_v4  ;;  %v7453_v17 = vmov 0.0   ;;  %v4778_v22 = vld [vmem:[%s7445_s4 + $0x8] sm:$0xff]   ;;  %vm4895_vm1 = vmmov 0   ;;  %vm883_vm2 = vcmask 392448  }
  0x19   : > { %s431_s11 = scalar_select %p430_p11, %s4883_s16, 1  ;;  %4582 = vmatpush3.bf16.msra.mxu0 %v4775_v0  ;;  %v5025_v3 = vshrl.u32 %v7455_v1, 7  ;;  %v5077_v28 = vld [vmem:[%s7450_s9] sm:$0xff]  ;;  %vm895_vm3 = vcmask 130048   ;;  %vm978_vm4 = vcmask 64512  }
  0x1a   : > { %4583 = vmatprep.subr.bf16.mxu0 %v4776_v2  ;;  %v4497_v52 = vld [vmem:[%s7446_s5] ss:$0 sm:$0xff]  ;;  %s4896_s20 = smov 96   ;;  %s4899_s24 = smov 32  }
  0x1b   : > { %s4528_s12 = sshll.u32 %s431_s11, 6  ;;  %v5037_v10 = vsub.s32 0, %v5025_v3  ;;  %s5048_s30 = sshll.u32 %s431_s11, 3 }
  0x1c   : > { %s455_s27 = scalar_lea.vmem %s7444_s3, %s4528_s12  ;;  %s4894_s12 = smov 16  }
  0x1d   : > { %v466_v7 = vld [vmem:[%s455_s27] sm:$0xff]  ;;  %v467_v8 = vld [vmem:[%s455_s27 + $0x8] sm:$0xff]  ;;  %v468_v9 = vld [vmem:[%s455_s27 + $0x10] sm:$0xff]  ;;  %7570 = vst [vmem:[#allocation8_spill] sm:$0xff] %v5037_v10  ;;  %4584 = vmatpush3.bf16.msra.mxu0 %v4776_v2  ;;  %v5041_v18 = vrot.slane %v4506_v6, %v5037_v10  ;;  %v1062_v19 = vrot.slane %v975_v4, %v5037_v10  ;;  %s5059_s22 = scalar_lea.vmem %s7441_s0, %s5048_s30  ;;  %v485_v29 = vrot.slane %v5077_v28, %v5037_v10  ;;  %s450_s29 = scalar_lea.vmem %s7443_s2, %s5048_s30 }
  0x1e   : > { %v474_v11 = vpack.c.bf16 %v467_v8, %v466_v7  ;;  %v469_v12 = vld [vmem:[%s455_s27 + $0x18] sm:$0xff]  ;;  %v470_v13 = vld [vmem:[%s455_s27 + $0x20] sm:$0xff]  ;;  %v471_v14 = vld [vmem:[%s455_s27 + $0x28] sm:$0xff]  ;;  %4605 = vmatprep.subr.bf16.mxu0 %v7453_v17  ;;  %s4898_s11 = smov 120   ;;  %s4904_s21 = smov 24  }
  0x1f   : > { %v475_v15 = vpack.c.bf16 %v469_v12, %v468_v9  ;;  %v476_v16 = vpack.c.bf16 %v471_v14, %v470_v13  ;;  %v472_v20 = vld [vmem:[%s455_s27 + $0x30] sm:$0xff]  ;;  %v473_v21 = vld [vmem:[%s455_s27 + $0x38] sm:$0xff]  ;;  %1098 = vrot.lane.b32.xlu1 %v5041_v18, %s4894_s12  ;;  %s443_s27 = scalar_lea.vmem %s7442_s1, %s5048_s30  ;;  %1064 = vrot.lane.b32.xlu0 %v1062_v19, %s4894_s12 }
  0x20   : > { %4585 = vmatprep.mubr.msk.bf16.mxu0 %vm7566_vm0, %v474_v11  ;;  %v477_v23 = vpack.c.bf16 %v473_v21, %v472_v20  ;;  %v457_v24 = vld [vmem:[%s5059_s22] sm:$0xff] }
  0x21   : > { %4586 = vmatmul.mubr.msk.bf16.vlgmr.msra.gmra.mrb[0].mxu0 %vm7566_vm0, %v475_v15  ;;  %v458_v25 = vld [vmem:[%s443_s27] sm:$0xff]  ;;  %s4900_s27 = smov 112  }
  0x22   : > { %4589 = vmatprep.mubr.msk.bf16.mxu0 %vm7566_vm0, %v476_v16  ;;  %4606 = vmatpush3.bf16.msra.mxu0 %v4777_v5  ;;  %v814_v26 = vadd.f32 %v458_v25, %v457_v24 }
  0x23   : > { %4607 = vmatprep.subr.bf16.mxu0 %v7453_v17 }
  0x24   : > { %v815_v27 = vpack.c.bf16 %v814_v26, %v814_v26 }
  0x26   : > { %4608 = vmatpush3.bf16.msra.mxu0 %v4778_v22 }
  0x27   : > { %4625 = vmatprep.subr.bf16.mxu0 %v7453_v17 }
  0x29   : > { %4590 = vmatmul.mubr.msk.bf16.gmra.mrb[4].mxu0 %vm7566_vm0, %v477_v23 }
  0x2a   : > { %4609 = vmatprep.mubr.msk.bf16.mxu0 %vm4895_vm1, %v7453_v17 }
  0x31   : > { %4610 = vmatmul.mubr.msk.bf16.vlgmr.msra.gmra.mrb[8].mxu0 %vm7566_vm0, %v815_v27 }
  0x32   : > { %4633 = vmatprep.mubr.msk.bf16.mxu0 %vm4895_vm1, %v7453_v17 }
  0x91   : > { %v5095_v61 = vpop.permute.xlu1 %1098  ;;  %v5097_v62 = vpop.permute.xlu0 %1064 }
  0xf4   : > { %v4587_v30 = vpop.f32.mrb[0].mxu0 }
  0xf5   : > { %v554_v31 = vadd.f32 %v4587_v30, %v485_v29  ;;  %v545_v32 = vpop.f32.mrb[1].mxu0 }
  0xf6   : > { %v546_v33 = vadd.f32 %v545_v32, %v485_v29  ;;  %v4588_v34 = vpop.f32.mrb[2].mxu0 }
  0xf7   : > { %v557_v35 = vadd.f32 %v4588_v34, %v485_v29  ;;  %v548_v36 = vpop.f32.mrb[3].mxu0  ;;  %v582_v37 = vsel %vm7566_vm0, %v554_v31, 0.0 }
  0xf8   : > { %v549_v38 = vadd.f32 %v548_v36, %v485_v29  ;;  %583 = vadd.xlane.f32.xlu1 %v582_v37  ;;  %v576_v39 = vsel %vm7566_vm0, %v546_v33, 0.0 }
  0xf9   : > { %577 = vadd.xlane.f32.xlu0 %v576_v39  ;;  %v585_v40 = vsel %vm7566_vm0, %v557_v35, 0.0 }
  0xfa   : > { %v579_v42 = vsel %vm7566_vm0, %v549_v38, 0.0 }
  0xfc   : > { %586 = vadd.xlane.f32.xlu1 %v585_v40  ;;  %v4591_v41 = vpop.f32.mrb[4].mxu0 }
  0xfd   : > { %v570_v43 = vadd.f32 %v4591_v41, %v485_v29  ;;  %v561_v44 = vpop.f32.mrb[5].mxu0  ;;  %580 = vadd.xlane.f32.xlu0 %v579_v42 }
  0xfe   : > { %v4592_v45 = vpop.f32.mrb[6].mxu0  ;;  %v562_v49 = vadd.f32 %v561_v44, %v485_v29 }
  0xff   : > { %v573_v46 = vadd.f32 %v4592_v45, %v485_v29  ;;  %v564_v47 = vpop.f32.mrb[7].mxu0  ;;  %v594_v48 = vsel %vm7566_vm0, %v570_v43, 0.0 }
 0x100   : > { %v565_v50 = vadd.f32 %v564_v47, %v485_v29  ;;  %v588_v53 = vsel %vm7566_vm0, %v562_v49, 0.0 }
 0x101   : > { %595 = vadd.xlane.f32.xlu0 %v594_v48  ;;  %v597_v51 = vsel %vm7566_vm0, %v573_v46, 0.0 }
 0x102   : > { %598 = vadd.xlane.f32.xlu1 %v597_v51  ;;  %v591_v56 = vsel %vm7566_vm0, %v565_v50, 0.0  ;;  %v4897_v51 = vmov 0.0|0.0  }
 0x104   : > { %v877_v54 = vpop.f32.mrb[8].mxu0 }
 0x105   : > { %589 = vadd.xlane.f32.xlu0 %v588_v53  ;;  %v5091_v55 = vadd.f32 %v4497_v52, %v877_v54  ;;  %v4611_v57 = vpop.f32.mrb[9].mxu0 }
 0x106   : > { %592 = vadd.xlane.f32.xlu1 %v591_v56  ;;  %v880_v58 = vpop.f32.mrb[10].mxu0 }
 0x107   : > { %v884_v59 = vsel %vm883_vm2, %v5091_v55, -inf  ;;  %v4612_v60 = vpop.f32.mrb[11].mxu0 }
 0x109   : > { %885 = vmax.xlane.f32.xlu0 %v884_v59 }
 0x185   : > { %v584_v63 = vpop.xlane.xlu1 %583 }
 0x186   : > { %v603_v0 = vmul.f32 0.03125, %v584_v63  ;;  %v578_v2 = vpop.xlane.xlu0 %577 }
 0x187   : > { %v601_v4 = vmul.f32 0.03125, %v578_v2 }
 0x188   : > { %v5099_v5 = vsub.f32 %v554_v31, %v603_v0 }
 0x189   : > { %v5101_v6 = vsub.f32 %v546_v33, %v601_v4  ;;  %v587_v7 = vpop.xlane.xlu1 %586 }
 0x18a   : > { %v604_v8 = vmul.f32 0.03125, %v587_v7  ;;  %v581_v9 = vpop.xlane.xlu0 %580  ;;  %v619_v11 = vmul.f32 %v5099_v5, %v5099_v5 }
 0x18b   : > { %v602_v12 = vmul.f32 0.03125, %v581_v9  ;;  %v617_v15 = vmul.f32 %v5101_v6, %v5101_v6 }
 0x18c   : > { %v5105_v13 = vsub.f32 %v557_v35, %v604_v8  ;;  %v631_v14 = vsel %vm7566_vm0, %v619_v11, 0.0 }
 0x18d   : > { %v5110_v16 = vsub.f32 %v549_v38, %v602_v12  ;;  %632 = vadd.xlane.f32.xlu1 %v631_v14  ;;  %v625_v24 = vsel %vm7566_vm0, %v617_v15, 0.0 }
 0x18e   : > { %v596_v19 = vpop.xlane.xlu0 %595  ;;  %v620_v20 = vmul.f32 %v5105_v13, %v5105_v13 }
 0x18f   : > { %v607_v21 = vmul.f32 0.03125, %v596_v19  ;;  %v599_v22 = vpop.xlane.xlu1 %598  ;;  %v618_v26 = vmul.f32 %v5110_v16, %v5110_v16 }
 0x190   : > { %v608_v23 = vmul.f32 0.03125, %v599_v22  ;;  %v634_v25 = vsel %vm7566_vm0, %v620_v20, 0.0  ;;  %v5151_v22 = vsub.s32 1, %v5025_v3 }
 0x191   : > { %v5118_v27 = vsub.f32 %v570_v43, %v607_v21  ;;  %626 = vadd.xlane.f32.xlu1 %v625_v24  ;;  %635 = vadd.xlane.f32.xlu0 %v634_v25  ;;  %v628_v35 = vsel %vm7566_vm0, %v618_v26, 0.0 }
 0x192   : > { %v5120_v29 = vsub.f32 %v573_v46, %v608_v23  ;;  %v590_v30 = vpop.xlane.xlu0 %589  ;;  %7571 = vst [vmem:[#allocation9_spill] sm:$0xff] %v5151_v22 }
 0x193   : > { %v605_v31 = vmul.f32 0.03125, %v590_v30  ;;  %v593_v32 = vpop.xlane.xlu1 %592  ;;  %v623_v33 = vmul.f32 %v5118_v27, %v5118_v27 }
 0x194   : > { %v606_v34 = vmul.f32 0.03125, %v593_v32  ;;  %v624_v36 = vmul.f32 %v5120_v29, %v5120_v29  ;;  %v684_v32 = vrot.slane %v5077_v28, %v5151_v22 }
 0x195   : > { %v5127_v37 = vsub.f32 %v562_v49, %v605_v31  ;;  %629 = vadd.xlane.f32.xlu0 %v628_v35  ;;  %v643_v38 = vsel %vm7566_vm0, %v623_v33, 0.0  ;;  %v4779_v49 = vld [vmem:[%s7449_s8 + $0x10] sm:$0xff]   ;;  %v5157_v33 = vsub.s32 2, %v5025_v3 }
 0x196   : > { %v5130_v39 = vsub.f32 %v565_v50, %v606_v34  ;;  %644 = vadd.xlane.f32.xlu1 %v643_v38  ;;  %v886_v40 = vpop.xlane.xlu0 %885  ;;  %v646_v43 = vsel %vm7566_vm0, %v624_v36, 0.0  ;;  %v4780_v50 = vld [vmem:[%s7449_s8 + $0x18] sm:$0xff]   ;;  %4593 = vmatprep.subr.bf16.mxu1 %v4779_v49 }
 0x197   : > { %v621_v41 = vmul.f32 %v5127_v37, %v5127_v37  ;;  %v887_v42 = vsub.f32 %v5091_v55, %v886_v40  ;;  %4594 = vmatpush3.bf16.msra.mxu1 %v4779_v49  ;;  %7572 = vst [vmem:[#allocation10_spill] sm:$0xff] %v5157_v33 }
 0x198   : > { %v622_v44 = vmul.f32 %v5130_v39, %v5130_v39  ;;  %4595 = vmatprep.subr.bf16.mxu1 %v4780_v50 }
 0x199   : > { %647 = vadd.xlane.f32.xlu0 %v646_v43  ;;  %v637_v45 = vsel %vm7566_vm0, %v621_v41, 0.0  ;;  %v888_v46 = vmul.f32 1.442695, %v887_v42  ;;  %v696_v42 = vrot.slane %v5077_v28, %v5157_v33 }
 0x19a   : > { %638 = vadd.xlane.f32.xlu1 %v637_v45  ;;  %v640_v47 = vsel %vm7566_vm0, %v622_v44, 0.0 }
 0x19b   : > { %4787 = vpow2.f32 %v888_v46  ;;  %4596 = vmatpush3.bf16.msra.mxu1 %v4780_v50 }
 0x19c   : > { %4697 = vmatprep.subr.bf16.mxu1 %v4897_v51 }
 0x19d   : > { %641 = vadd.xlane.f32.xlu0 %v640_v47  ;;  %v890_v47 = vld [vmem:[%s7448_s7] sm:$0xff] }
 0x1a5   : > { %v5140_v48 = vpop.eup %4787 }
 0x1ab   : > { %893 = vrot.lane.b32.xlu1 %v5140_v48, %s4896_s20 }
 0x21a   : > { %v633_v52 = vpop.xlane.xlu1 %632 }
 0x21b   : > { %v651_v53 = vmul.f32 0.03125, %v633_v52 }
 0x21d   : > { %v659_v54 = vadd.f32 1e-05, %v651_v53 }
 0x21e   : > { %v627_v56 = vpop.xlane.xlu1 %626  ;;  %v636_v57 = vpop.xlane.xlu0 %635 }
 0x21f   : > { %v649_v58 = vmul.f32 0.03125, %v627_v56  ;;  %v652_v59 = vmul.f32 0.03125, %v636_v57  ;;  %4789 = vrsqrt.f32 %v659_v54 }
 0x221   : > { %v657_v60 = vadd.f32 1e-05, %v649_v58  ;;  %v660_v63 = vadd.f32 1e-05, %v652_v59 }
 0x222   : > { %v630_v0 = vpop.xlane.xlu0 %629 }
 0x223   : > { %4791 = vrsqrt.f32 %v657_v60  ;;  %v650_v2 = vmul.f32 0.03125, %v630_v0  ;;  %v645_v4 = vpop.xlane.xlu1 %644 }
 0x224   : > { %4793 = vrsqrt.f32 %v660_v63  ;;  %v655_v7 = vmul.f32 0.03125, %v645_v4 }
 0x225   : > { %v658_v8 = vadd.f32 1e-05, %v650_v2 }
 0x226   : > { %v663_v9 = vadd.f32 1e-05, %v655_v7  ;;  %v648_v11 = vpop.xlane.xlu0 %647 }
 0x227   : > { %4795 = vrsqrt.f32 %v658_v8  ;;  %v656_v12 = vmul.f32 0.03125, %v648_v11  ;;  %v639_v14 = vpop.xlane.xlu1 %638  ;;  %v459_v11 = vld [vmem:[%s450_s29] sm:$0xff]  ;;  %s4903_s29 = smov 8  }
 0x228   : > { %v653_v15 = vmul.f32 0.03125, %v639_v14  ;;  %4797 = vrsqrt.f32 %v663_v9 }
 0x229   : > { %v664_v19 = vadd.f32 1e-05, %v656_v12  ;;  %v4790_v24 = vpop.eup %4789  ;;  %v5194_v12 = vsub.s32 3, %v5025_v3 }
 0x22a   : > { %v661_v20 = vadd.f32 1e-05, %v653_v15  ;;  %v642_v21 = vpop.xlane.xlu0 %641  ;;  %v675_v34 = vmul.f32 %v4790_v24, %v5099_v5  ;;  %v891_v5 = vld [vmem:[%s7448_s7 + $0x8] sm:$0xff] }
 0x22b   : > { %4799 = vrsqrt.f32 %v664_v19  ;;  %v654_v23 = vmul.f32 0.03125, %v642_v21  ;;  %v4698_v56 = vpack.c.bf16 %v891_v5, %v890_v47  ;;  %v894_v9 = vpop.permute.xlu1 %893  ;;  %v716_v14 = vrot.slane %v5077_v28, %v5194_v12 }
 0x22c   : > { %4801 = vrsqrt.f32 %v661_v20 }
 0x22d   : > { %v4792_v25 = vpop.eup %4791  ;;  %v662_v26 = vadd.f32 1e-05, %v654_v23 }
 0x22e   : > { %v4794_v30 = vpop.eup %4793  ;;  %v673_v31 = vmul.f32 %v4792_v25, %v5101_v6  ;;  %v687_v6 = vmul.f32 %v684_v32, %v675_v34 }
 0x22f   : > { %4803 = vrsqrt.f32 %v662_v26  ;;  %v676_v35 = vmul.f32 %v4794_v30, %v5105_v13 }
 0x230   : > { %v685_v41 = vmul.f32 %v684_v32, %v673_v31  ;;  %v699_v51 = vadd.f32 %v696_v42, %v687_v6 }
 0x231   : > { %v4796_v36 = vpop.eup %4795  ;;  %v688_v38 = vmul.f32 %v684_v32, %v676_v35 }
 0x232   : > { %v674_v40 = vmul.f32 %v4796_v36, %v5110_v16  ;;  %v4798_v43 = vpop.eup %4797  ;;  %v697_v49 = vadd.f32 %v696_v42, %v685_v41 }
 0x233   : > { %v700_v46 = vadd.f32 %v696_v42, %v688_v38  ;;  %v679_v53 = vmul.f32 %v4798_v43, %v5118_v27 }
 0x234   : > { %v686_v44 = vmul.f32 %v684_v32, %v674_v40 }
 0x235   : > { %v4800_v45 = vpop.eup %4799  ;;  %v706_v58 = vpack.c.bf16 %v700_v46, %v699_v51  ;;  %v691_v0 = vmul.f32 %v684_v32, %v679_v53 }
 0x236   : > { %v4802_v13 = vpop.eup %4801  ;;  %v698_v16 = vadd.f32 %v696_v42, %v686_v44  ;;  %v680_v50 = vmul.f32 %v4800_v45, %v5120_v29  ;;  %v974_v44 = vld [vmem:[%s7448_s7 + $0x10] sm:$0x1] }
 0x237   : > { %v677_v52 = vmul.f32 %v4802_v13, %v5127_v37  ;;  %v703_v4 = vadd.f32 %v696_v42, %v691_v0  ;;  %v5208_v5 = vrot.slane %v974_v44, %v5037_v10 }
 0x238   : > { %v705_v54 = vpack.c.bf16 %v698_v16, %v697_v49  ;;  %v692_v59 = vmul.f32 %v684_v32, %v680_v50 }
 0x239   : > { %v4804_v57 = vpop.eup %4803  ;;  %v689_v63 = vmul.f32 %v684_v32, %v677_v52 }
 0x23a   : > { %4597 = vmatprep.mubr.msk.bf16.mxu1 %vm7566_vm0, %v705_v54  ;;  %v678_v60 = vmul.f32 %v4804_v57, %v5130_v39  ;;  %v704_v2 = vadd.f32 %v696_v42, %v692_v59  ;;  %v977_v39 = vld [vmem:[%s7447_s6] sm:$0xff]  ;;  %v4505_v57 = vadd.f32 -1.0, %v974_v44 }
 0x23b   : > { %4598 = vmatmul.mubr.msk.bf16.vlgmr.msra.gmra.mrb[0].mxu1 %vm7566_vm0, %v706_v58  ;;  %v701_v27 = vadd.f32 %v696_v42, %v689_v63 }
 0x23c   : > { %4699 = vmatpush3.bf16.msra.mxu1 %v4698_v56  ;;  %v690_v29 = vmul.f32 %v684_v32, %v678_v60  ;;  %v708_v8 = vpack.c.bf16 %v704_v2, %v703_v4 }
 0x23d   : > { %4620 = vmatprep.subr.mxu1 %v7453_v17 }
 0x23e   : > { %v702_v37 = vadd.f32 %v696_v42, %v690_v29 }
 0x240   : > { %v707_v7 = vpack.c.bf16 %v702_v37, %v701_v27 }
 0x242   : > { %4601 = vmatprep.mubr.msk.bf16.mxu1 %vm7566_vm0, %v707_v7  ;;  %v4901_v7 = vmov 0  }
 0x243   : > { %4602 = vmatmul.mubr.msk.bf16.gmra.mrb[4].mxu1 %vm7566_vm0, %v708_v8 }
 0x244   : > { %4617 = vmatprep.mubr.msk.f32.mxu1 %vm4895_vm1, %v7453_v17 }
 0x24b   : > { %4618 = vmatmul.mubr.msk.f32.vlgmr.msra.gmra.mrb[8].mxu1 %vm895_vm3, %v894_v9 }
 0x24c   : > { %4621 = vmatpush3.msra.mxu1 %v977_v39  ;;  %4622 = vmatprep.mubr.msk.f32.mxu1 %vm4895_vm1, %v7453_v17 }
 0x24d   : > { %4637 = vmatprep.subr.bf16.mxu1 %v7453_v17 }
 0x24f   : > { %4623 = vmatmul.mubr.msk.f32.vlgmr.msra.gmra.mrb[10].mxu1 %vm978_vm4, %v459_v11 }
 0x250   : > { %4645 = vmatprep.mubr.msk.bf16.mxu1 %vm4895_vm1, %v7453_v17 }
 0x30e   : > { %v4599_v15 = vpop.f32.mrb[0].mxu1 }
 0x30f   : > { %v775_v19 = vpop.f32.mrb[1].mxu1  ;;  %v784_v21 = vadd.f32 %v4599_v15, %v716_v14 }
 0x310   : > { %v4600_v20 = vpop.f32.mrb[2].mxu1  ;;  %v776_v25 = vadd.f32 %v775_v19, %v716_v14 }
 0x311   : > { %v787_v23 = vadd.f32 %v4600_v20, %v716_v14  ;;  %v778_v24 = vpop.f32.mrb[3].mxu1 }
 0x312   : > { %v779_v26 = vadd.f32 %v778_v24, %v716_v14 }
 0x313   : > { %v807_v30 = vpack.c.bf16 %v787_v23, %v784_v21 }
 0x314   : > { %v806_v31 = vpack.c.bf16 %v779_v26, %v776_v25 }
 0x315   : > { %811 = vst.msk [vmem:[#allocation2 + $0x8] sm:$0xff] %vm7566_vm0, %v807_v30 }
 0x316   : > { %810 = vst.msk [vmem:[#allocation2] sm:$0xff] %vm7566_vm0, %v806_v31  ;;  %v4603_v32 = vpop.f32.mrb[4].mxu1 }
 0x317   : > { %v791_v34 = vpop.f32.mrb[5].mxu1  ;;  %v800_v36 = vadd.f32 %v4603_v32, %v716_v14 }
 0x318   : > { %v4604_v35 = vpop.f32.mrb[6].mxu1  ;;  %v792_v40 = vadd.f32 %v791_v34, %v716_v14 }
 0x319   : > { %v803_v38 = vadd.f32 %v4604_v35, %v716_v14  ;;  %v794_v28 = vpop.f32.mrb[7].mxu1 }
 0x31a   : > { %v795_v41 = vadd.f32 %v794_v28, %v716_v14 }
 0x31b   : > { %v809_v42 = vpack.c.bf16 %v803_v38, %v800_v36  ;;  %v4507_v36 = vld [vmem:[%s7448_s7 + $0x12] ss:$0 sm:$0xff] }
 0x31c   : > { %v808_v6 = vpack.c.bf16 %v795_v41, %v792_v40  ;;  %v2648_v43 = vld [vmem:[#allocation2 + $0x8] sm:$0xff] }
 0x31d   : > { %813 = vst.msk [vmem:[#allocation2 + $0x18] sm:$0xff] %vm7566_vm0, %v809_v42  ;;  %2681 = vrot.lane.b32.xlu0 %v2648_v43, %s4898_s11  ;;  %v1981_v45 = vld [vmem:[#allocation2] sm:$0xff] }
 0x31e   : > { %812 = vst.msk [vmem:[#allocation2 + $0x10] sm:$0xff] %vm7566_vm0, %v808_v6  ;;  %v964_v46 = vpop.f32.mrb[8].mxu1  ;;  %4626 = vmatpush3.bf16.msra.mxu0 %v1981_v45 }
 0x31f   : > { %4805 = vrcp.f32 %v964_v46  ;;  %v4619_v47 = vpop.f32.mrb[9].mxu1  ;;  %4627 = vmatprep.subr.bf16.mxu0 %v7453_v17 }
 0x321   : > { %2679 = vrot.lane.b32.xlu0 %v1981_v45, %s4898_s11 }
 0x322   : > { %v1048_v13 = vpop.f32.mrb[10].mxu1  ;;  %4628 = vmatpush3.bf16.msra.mxu0 %v2648_v43 }
 0x323   : > { %v1056_v49 = vmul.f32 %v5208_v5, %v1048_v13  ;;  %v1067_v16 = vmul.f32 %v5097_v62, %v1048_v13  ;;  %v4624_v50 = vpop.f32.mrb[11].mxu1  ;;  %4629 = vmatprep.subr.bf16.mxu0 %v7453_v17 }
 0x324   : > { %v1984_v63 = vld [vmem:[#allocation2 + $0x18] sm:$0xff] }
 0x325   : > { %v1057_v51 = vadd.f32 %v1056_v49, %v5091_v55  ;;  %v1068_v52 = vadd.f32 %v1067_v16, %v5091_v55  ;;  %v1983_v53 = vld [vmem:[#allocation2 + $0x10] sm:$0xff]  ;;  %v1083_v55 = vrot.slane %v4505_v57, %v5037_v10 }
 0x326   : > { %4630 = vmatpush3.bf16.msra.mxu0 %v1983_v53 }
 0x327   : > { %v4503_v54 = vadd.f32 -0.5, %v1057_v51  ;;  %v4504_v56 = vadd.f32 -0.5, %v1068_v52  ;;  %4631 = vmatprep.subr.bf16.mxu0 %v7453_v17 }
 0x329   : > { %v4806_v58 = vpop.eup %4805  ;;  %v1070_v59 = vfloor.f32 %v4503_v54  ;;  %v1071_v60 = vfloor.f32 %v4504_v56 }
 0x32a   : > { %970 = vrot.lane.b32.xlu1 %v4806_v58, %s4899_s24  ;;  %4632 = vmatpush3.bf16.msra.mxu0 %v1984_v63 }
 0x32b   : > { %v1072_v62 = vsub.f32 %v4503_v54, %v1070_v59  ;;  %v1124_v0 = vmax.f32 %v1071_v60, 0.0  ;;  %4649 = vmatprep.subr.bf16.mxu0 %v7453_v17  ;;  %v1122_v29 = vmax.f32 %v1070_v59, 0.0  ;;  %v1138_v2 = vadd.f32 1.0, %v1070_v59 }
 0x32c   : > { %vm1086_vm5 = vcmp.ge.f32.partialorder %v1071_v60, 0.0  ;;  %v1073_v37 = vsub.f32 %v4504_v56, %v1071_v60  ;;  %vm1078_vm6 = vcmp.ge.f32.partialorder %v1070_v59, 0.0  ;;  %vm1084_vm7 = vcmp.le.f32.partialorder %v1070_v59, %v1083_v55 }
 0x32d   : > { %1145 = vrot.lane.b32.xlu0 %v1072_v62, %s4899_s24  ;;  %v5222_v27 = vmin.f32 %v1083_v55, %v1122_v29  ;;  %v1155_v4 = vmax.f32 %v1138_v2, 0.0  ;;  %vm1139_vm8 = vcmp.ge.f32.partialorder %v1138_v2, 0.0  ;;  %vm1140_vm9 = vcmp.le.f32.partialorder %v1138_v2, %v1083_v55  ;;  %vm5228_vm11 = vmand %vm1078_vm6, %vm1084_vm7 }
 0x32e   : > { %1126 = vrot.lane.b32.xlu1 %v1124_v0, %s4900_s27  ;;  %v1087_v8 = vsel %vm1086_vm5, 1, %v4901_v7  ;;  %vm1101_vm10 = vcmp.le.f32.partialorder %v1071_v60, %v5095_v61  ;;  %vm5233_vm12 = vmand %vm1139_vm8, %vm1140_vm9  ;;  %v1159_v14 = vadd.f32 1.0, %v1071_v60  ;;  %v1074_v19 = vsub.f32 1.0, %v1072_v62 }
 0x32f   : > { %v5226_v39 = vmin.f32 %v1083_v55, %v1155_v4  ;;  %v1102_v15 = vsel %vm1101_vm10, 1, %v4901_v7  ;;  %v1075_v21 = vsub.f32 1.0, %v1073_v37 }
 0x330   : > { %v1182_v20 = vmax.f32 %v1159_v14, 0.0  ;;  %vm1166_vm13 = vcmp.le.f32.partialorder %v1159_v14, %v5095_v61  ;;  %vm1160_vm14 = vcmp.ge.f32.partialorder %v1159_v14, 0.0 }
 0x331   : > { %1173 = vrot.lane.b32.xlu0 %v1073_v37, %s4894_s12  ;;  %v1167_v23 = vsel %vm1166_vm13, 1, %v4901_v7  ;;  %v1161_v24 = vsel %vm1160_vm14, 1, %v4901_v7  ;;  %v5311_v7 = vsub.s32 5, %v5025_v3 }
 0x332   : > { %1088 = vrot.lane.b32.xlu1 %v1087_v8, %s4900_s27 }
 0x333   : > { %7581 = vst [vmem:[#allocation11_spill] sm:$0xff] %v5311_v7 }
 0x335   : > { %1103 = vrot.lane.b32.xlu0 %v1102_v15, %s4900_s27 }
 0x336   : > { %1108 = vrot.lane.b32.xlu1 %v1074_v19, %s4899_s24  ;;  %v5321_v19 = vsub.s32 6, %v5025_v3 }
 0x338   : > { %7583 = vst [vmem:[#allocation13_spill] sm:$0xff] %v5321_v19 }
 0x339   : > { %1184 = vrot.lane.b32.xlu0 %v1182_v20, %s4900_s27 }
 0x33a   : > { %1113 = vrot.lane.b32.xlu1 %v1075_v21, %s4894_s12 }
 0x33d   : > { %1168 = vrot.lane.b32.xlu0 %v1167_v23, %s4900_s27  ;;  %v5331_v23 = vsub.s32 7, %v5025_v3 }
 0x33e   : > { %1162 = vrot.lane.b32.xlu1 %v1161_v24, %s4900_s27 }
 0x33f   : > { %7584 = vst [vmem:[#allocation14_spill] sm:$0xff] %v5331_v23 }
 0x38f   : > { %v2682_v25 = vpop.permute.xlu0 %2681 }
 0x393   : > { %v2680_v26 = vpop.permute.xlu0 %2679 }
 0x394   : > { %4638 = vmatpush3.bf16.msra.mxu1 %v2680_v26 }
 0x395   : > { %4639 = vmatprep.subr.bf16.mxu1 %v7453_v17 }
 0x398   : > { %4640 = vmatpush3.bf16.msra.mxu1 %v2682_v25 }
 0x399   : > { %4641 = vmatprep.subr.bf16.mxu1 %v7453_v17 }
 0x39c   : > { %v971_v30 = vpop.permute.xlu1 %970 }
 0x39d   : > { %v973_v61 = vmul.f32 %v5140_v48, %v971_v30 }
 0x39f   : > { %v1146_v31 = vpop.permute.xlu0 %1145 }
 0x3a0   : > { %v1127_v32 = vpop.permute.xlu1 %1126  ;;  %v1148_v35 = vmul.f32 %v1146_v31, %v973_v61 }
 0x3a1   : > { %v1129_v34 = vmin.f32 %v5041_v18, %v1127_v32 }
 0x3a3   : > { %v1130_v38 = vmul.f32 %v1129_v34, %v5208_v5  ;;  %v1174_v28 = vpop.permute.xlu0 %1173 }
 0x3a4   : > { %v1194_v40 = vmul.f32 %v1174_v28, %v1148_v35  ;;  %v5252_v41 = vpop.permute.xlu1 %1088 }
 0x3a5   : > { %v1135_v42 = vadd.f32 %v4507_v36, %v1130_v38  ;;  %vm1090_vm15 = vcmp.ne.s32.totalorder %v5252_v41, 0 }
 0x3a6   : > { %vm1091_vm2 = vmand %vm5228_vm11, %vm1090_vm15  ;;  %1196 = vrot.lane.b32.xlu0 %v1194_v40, %s4896_s20 }
 0x3a7   : > { %v1136_v48 = vadd.f32 %v1135_v42, %v5222_v27  ;;  %v5261_v6 = vpop.permute.xlu0 %1103  ;;  %v1157_v45 = vadd.f32 %v5226_v39, %v1135_v42  ;;  %vm1142_vm9 = vmand %vm5233_vm12, %vm1090_vm15 }
 0x3a8   : > { %vm1105_vm3 = vcmp.ne.s32.totalorder %v5261_v6, 0  ;;  %v1109_v43 = vpop.permute.xlu1 %1108 }
 0x3a9   : > { %v4700_v44 = vtrunc.f32 %v1136_v48  ;;  %vm5267_vm4 = vmand %vm1091_vm2, %vm1105_vm3  ;;  %v1111_v47 = vmul.f32 %v1109_v43, %v973_v61  ;;  %v4702_v51 = vtrunc.f32 %v1157_v45  ;;  %vm1332_vm2 = vcmask 519168  }
 0x3aa   : > { %vm1143_vm10 = vmand %vm1142_vm9, %vm1105_vm3 }
 0x3ab   : > { %v1185_v13 = vpop.permute.xlu0 %1184  ;;  %v4701_v50 = vcvt.f32.s32 %v4700_v44  ;;  %v4703_v58 = vcvt.f32.s32 %v4702_v51  ;;  %v1176_v59 = vmul.f32 %v1174_v28, %v1111_v47 }
 0x3ac   : > { %v1187_v49 = vmin.f32 %v5041_v18, %v1185_v13  ;;  %v1114_v16 = vpop.permute.xlu1 %1113 }
 0x3ad   : > { %v1116_v52 = vmul.f32 %v1114_v16, %v1111_v47  ;;  %v1149_v53 = vmul.f32 %v1148_v35, %v1114_v16  ;;  %v5281_v18 = vrot.slane %v4701_v50, %v5151_v22  ;;  %v1407_v62 = vrot.slane %v4703_v58, %v5151_v22 }
 0x3ae   : > { %v1188_v54 = vmul.f32 %v1187_v49, %v5208_v5  ;;  %v1207_v0 = vrot.slane %v4701_v50, %v5037_v10  ;;  %v1414_v29 = vrot.slane %v4703_v58, %v5157_v33  ;;  %v1400_v2 = vrot.slane %v4703_v58, %v5037_v10 }
 0x3af   : > { %1151 = vrot.lane.b32.xlu1 %v1149_v53, %s4896_s20  ;;  %1118 = vrot.lane.b32.xlu0 %v1116_v52, %s4896_s20  ;;  %v5277_v60 = vpop.permute.xlu0 %1168  ;;  %v1228_v37 = vrot.slane %v4701_v50, %v5194_v12  ;;  %v1421_v4 = vrot.slane %v4703_v58, %v5194_v12  ;;  %v1242_v8 = vrot.slane %v4701_v50, %v5311_v7 }
 0x3b0   : > { %v1189_v56 = vadd.f32 %v4507_v36, %v1188_v54  ;;  %v5275_v57 = vpop.permute.xlu1 %1162  ;;  %vm1170_vm7 = vcmp.ne.s32.totalorder %v5277_v60, 0  ;;  %v1435_v9 = vrot.slane %v4703_v58, %v5311_v7  ;;  %v5324_v20 = vrot.slane %v4701_v50, %v5321_v19 }
 0x3b1   : > { %vm1164_vm5 = vcmp.ne.s32.totalorder %v5275_v57, 0  ;;  %v5328_v21 = vrot.slane %v4703_v58, %v5321_v19  ;;  %v1256_v24 = vrot.slane %v4701_v50, %v5331_v23  ;;  %v1449_v25 = vrot.slane %v4703_v58, %v5331_v23 }
 0x3b2   : > { %v5284_v63 = vadd.f32 %v1189_v56, %v5222_v27  ;;  %v5287_v5 = vadd.f32 %v1189_v56, %v5226_v39  ;;  %vm1165_vm6 = vmand %vm5228_vm11, %vm1164_vm5  ;;  %v1221_v27 = vrot.slane %v4701_v50, %v5157_v33  ;;  %v5315_v39 = vsub.s32 4, %v5025_v3 }
 0x3b3   : > { %1216 = vbcast.lane.b32.xlu0 %v5281_v18, 256  ;;  %1178 = vrot.lane.b32.xlu1 %v1176_v59, %s4896_s20  ;;  %vm5300_vm8 = vmand %vm1165_vm6, %vm1170_vm7  ;;  %s4902_s20 = smov 104  }
 0x3b4   : > { %7582 = vst [vmem:[#allocation12_spill] sm:$0xff] %v5315_v39  ;;  %v1235_v14 = vrot.slane %v4701_v50, %v5315_v39  ;;  %v1428_v15 = vrot.slane %v4703_v58, %v5315_v39  ;;  %v4704_v26 = vtrunc.f32 %v5284_v63  ;;  %v4706_v28 = vtrunc.f32 %v5287_v5  ;;  %vm1192_vm11 = vmand %vm5233_vm12, %vm1164_vm5 }
 0x3b5   : > { %vm1193_vm13 = vmand %vm1192_vm11, %vm1170_vm7 }
 0x3b6   : > { %v5349_v31 = vcvt.f32.s32 %v4704_v26  ;;  %v5374_v43 = vcvt.f32.s32 %v4706_v28 }
 0x3b7   : > { %1409 = vbcast.lane.b32.xlu0 %v1407_v62, 256  ;;  %1209 = vbcast.lane.b32.xlu1 %v1207_v0, 256 }
 0x3b8   : > { %v5361_v38 = vrot.slane %v5349_v31, %v5151_v22  ;;  %v5371_v48 = vrot.slane %v5349_v31, %v5037_v10  ;;  %v5382_v47 = vrot.slane %v5349_v31, %v5194_v12  ;;  %v5391_v16 = vrot.slane %v5374_v43, %v5037_v10 }
 0x3b9   : > { %v5401_v52 = vrot.slane %v5349_v31, %v5157_v33  ;;  %v5423_v63 = vrot.slane %v5349_v31, %v5311_v7  ;;  %v5477_v26 = vrot.slane %v5349_v31, %v5321_v19  ;;  %v5487_v1 = vrot.slane %v5374_v43, %v5311_v7 }
 0x3bb   : > { %1416 = vbcast.lane.b32.xlu0 %v1414_v29, 256  ;;  %1402 = vbcast.lane.b32.xlu1 %v1400_v2, 256 }
 0x3bf   : > { %2069 = vbcast.lane.b32.xlu0 %v5281_v18, 260  ;;  %1223 = vbcast.lane.b32.xlu1 %v1221_v27, 256 }
 0x3c3   : > { %2213 = vbcast.lane.b32.xlu0 %v1407_v62, 260  ;;  %2065 = vbcast.lane.b32.xlu1 %v1207_v0, 260 }
 0x3c7   : > { %2217 = vbcast.lane.b32.xlu0 %v1414_v29, 260  ;;  %2209 = vbcast.lane.b32.xlu1 %v1400_v2, 260 }
 0x3cb   : > { %2077 = vbcast.lane.b32.xlu0 %v1228_v37, 260  ;;  %1230 = vbcast.lane.b32.xlu1 %v1228_v37, 256 }
 0x3cf   : > { %2221 = vbcast.lane.b32.xlu0 %v1421_v4, 260  ;;  %1423 = vbcast.lane.b32.xlu1 %v1421_v4, 256 }
 0x3d3   : > { %1244 = vbcast.lane.b32.xlu0 %v1242_v8, 256  ;;  %2073 = vbcast.lane.b32.xlu1 %v1221_v27, 260 }
 0x3d7   : > { %1437 = vbcast.lane.b32.xlu0 %v1435_v9, 256  ;;  %1237 = vbcast.lane.b32.xlu1 %v1235_v14, 256 }
 0x3db   : > { %2081 = vbcast.lane.b32.xlu0 %v1235_v14, 260  ;;  %1430 = vbcast.lane.b32.xlu1 %v1428_v15, 256 }
 0x3df   : > { %2225 = vbcast.lane.b32.xlu0 %v1428_v15, 260  ;;  %1251 = vbcast.lane.b32.xlu1 %v5324_v20, 256 }
 0x3e3   : > { %2085 = vbcast.lane.b32.xlu0 %v1242_v8, 260  ;;  %1444 = vbcast.lane.b32.xlu1 %v5328_v21, 256 }
 0x3e7   : > { %2229 = vbcast.lane.b32.xlu0 %v1435_v9, 260  ;;  %2093 = vbcast.lane.b32.xlu1 %v1256_v24, 260 }
 0x3eb   : > { %1258 = vbcast.lane.b32.xlu0 %v1256_v24, 256  ;;  %2237 = vbcast.lane.b32.xlu1 %v1449_v25, 260 }
 0x3ef   : > { %1451 = vbcast.lane.b32.xlu0 %v1449_v25, 256  ;;  %2745 = vbcast.lane.b32.xlu1 %v1207_v0, 264 }
 0x3f3   : > { %2089 = vbcast.lane.b32.xlu0 %v5324_v20, 260  ;;  %2889 = vbcast.lane.b32.xlu1 %v1400_v2, 264 }
 0x3f7   : > { %2233 = vbcast.lane.b32.xlu0 %v5328_v21, 260  ;;  %2753 = vbcast.lane.b32.xlu1 %v1221_v27, 264 }
 0x3fb   : > { %2749 = vbcast.lane.b32.xlu0 %v5281_v18, 264  ;;  %3425 = vbcast.lane.b32.xlu1 %v1207_v0, 268  ;;  %v5433_v0 = vrot.slane %v5374_v43, %v5194_v12 }
 0x3ff   : > { %2893 = vbcast.lane.b32.xlu0 %v1407_v62, 264  ;;  %3569 = vbcast.lane.b32.xlu1 %v1400_v2, 268 }
 0x403   : > { %2897 = vbcast.lane.b32.xlu0 %v1414_v29, 264  ;;  %2757 = vbcast.lane.b32.xlu1 %v1228_v37, 264 }
 0x407   : > { %3429 = vbcast.lane.b32.xlu0 %v5281_v18, 268  ;;  %2901 = vbcast.lane.b32.xlu1 %v1421_v4, 264 }
 0x40b   : > { %3573 = vbcast.lane.b32.xlu0 %v1407_v62, 268  ;;  %3433 = vbcast.lane.b32.xlu1 %v1221_v27, 268 }
 0x40f   : > { %3577 = vbcast.lane.b32.xlu0 %v1414_v29, 268  ;;  %2761 = vbcast.lane.b32.xlu1 %v1235_v14, 264  ;;  %v1791_v29 = vrot.slane %v5374_v43, %v5151_v22 }
 0x413   : > { %3437 = vbcast.lane.b32.xlu0 %v1228_v37, 268  ;;  %2905 = vbcast.lane.b32.xlu1 %v1428_v15, 264  ;;  %v5444_v37 = vrot.slane %v5349_v31, %v5315_v39 }
 0x417   : > { %3581 = vbcast.lane.b32.xlu0 %v1421_v4, 268  ;;  %2765 = vbcast.lane.b32.xlu1 %v1242_v8, 264 }
 0x418   : > { %v5341_v3 = vpop.permute.xlu0 %1196 }
 0x41b   : > { %2769 = vbcast.lane.b32.xlu0 %v5324_v20, 264  ;;  %2909 = vbcast.lane.b32.xlu1 %v1435_v9, 264 }
 0x41f   : > { %2913 = vbcast.lane.b32.xlu0 %v5328_v21, 264  ;;  %3441 = vbcast.lane.b32.xlu1 %v1235_v14, 268 }
 0x421   : > { %v5345_v30 = vpop.permute.xlu1 %1151  ;;  %v5347_v61 = vpop.permute.xlu0 %1118 }
 0x423   : > { %3453 = vbcast.lane.b32.xlu0 %v1256_v24, 268  ;;  %3585 = vbcast.lane.b32.xlu1 %v1428_v15, 268 }
 0x425   : > { %v5351_v32 = vpop.permute.xlu1 %1178  ;;  %v5353_v34 = vpop.permute.xlu0 %1216 }
 0x426   : > { %7585 = vst [vmem:[#allocation15_spill] sm:$0xff] %v5353_v34 }
 0x427   : > { %3597 = vbcast.lane.b32.xlu0 %v1449_v25, 268  ;;  %3445 = vbcast.lane.b32.xlu1 %v1242_v8, 268 }
 0x429   : > { %v5355_v35 = vpop.permute.xlu1 %1209  ;;  %v5357_v36 = vpop.permute.xlu0 %1409 }
 0x42a   : > { %7586 = vst [vmem:[#allocation16_spill] sm:$0xff] %v5355_v35 }
 0x42b   : > { %3589 = vbcast.lane.b32.xlu1 %v1435_v9, 268  ;;  %1601 = vbcast.lane.b32.xlu0 %v5361_v38, 256  ;;  %v5454_v9 = vrot.slane %v5374_v43, %v5157_v33 }
 0x42d   : > { %v5365_v40 = vpop.permute.xlu1 %1402  ;;  %v5367_v42 = vpop.permute.xlu0 %1416 }
 0x42f   : > { %2773 = vbcast.lane.b32.xlu1 %v1256_v24, 264  ;;  %2353 = vbcast.lane.b32.xlu0 %v5371_v48, 260 }
 0x431   : > { %v5376_v44 = vpop.permute.xlu1 %1223  ;;  %v5378_v45 = vpop.permute.xlu0 %2069 }
 0x432   : > { %7587 = vst [vmem:[#allocation17_spill] sm:$0xff] %v5376_v44  ;;  %7588 = vst [vmem:[#allocation18_spill] sm:$0xff] %v5378_v45 }
 0x433   : > { %2917 = vbcast.lane.b32.xlu1 %v1449_v25, 264  ;;  %1615 = vbcast.lane.b32.xlu0 %v5382_v47, 256  ;;  %v5473_v25 = vrot.slane %v5349_v31, %v5331_v23 }
 0x435   : > { %v5385_v13 = vpop.permute.xlu1 %2065  ;;  %v5387_v49 = vpop.permute.xlu0 %2213 }
 0x436   : > { %7589 = vst [vmem:[#allocation19_spill] sm:$0xff] %v5385_v13 }
 0x437   : > { %3449 = vbcast.lane.b32.xlu1 %v5324_v20, 268  ;;  %1786 = vbcast.lane.b32.xlu0 %v5391_v16, 256  ;;  %v5464_v20 = vrot.slane %v5374_v43, %v5321_v19 }
 0x439   : > { %v5395_v50 = vpop.permute.xlu1 %2209  ;;  %v5397_v51 = vpop.permute.xlu0 %2217 }
 0x43b   : > { %3593 = vbcast.lane.b32.xlu1 %v5328_v21, 268  ;;  %2361 = vbcast.lane.b32.xlu0 %v5401_v52, 260 }
 0x43d   : > { %v5405_v53 = vpop.permute.xlu1 %1230  ;;  %v5407_v54 = vpop.permute.xlu0 %2077 }
 0x43e   : > { %7590 = vst [vmem:[#allocation20_spill] sm:$0xff] %v5405_v53  ;;  %7591 = vst [vmem:[#allocation21_spill] sm:$0xff] %v5407_v54 }
 0x43f   : > { %2365 = vbcast.lane.b32.xlu0 %v5382_v47, 260  ;;  %1594 = vbcast.lane.b32.xlu1 %v5371_v48, 256 }
 0x441   : > { %v5411_v56 = vpop.permute.xlu1 %1423  ;;  %v5413_v58 = vpop.permute.xlu0 %2221 }
 0x443   : > { %2497 = vbcast.lane.b32.xlu0 %v5391_v16, 260  ;;  %1608 = vbcast.lane.b32.xlu1 %v5401_v52, 256 }
 0x445   : > { %v5417_v59 = vpop.permute.xlu1 %2073  ;;  %v5419_v18 = vpop.permute.xlu0 %1244 }
 0x446   : > { %7592 = vst [vmem:[#allocation22_spill] sm:$0xff] %v5417_v59  ;;  %7593 = vst [vmem:[#allocation23_spill] sm:$0xff] %v5419_v18 }
 0x447   : > { %1629 = vbcast.lane.b32.xlu0 %v5423_v63, 256  ;;  %2357 = vbcast.lane.b32.xlu1 %v5361_v38, 260 }
 0x449   : > { %v5427_v5 = vpop.permute.xlu1 %1237  ;;  %v5429_v62 = vpop.permute.xlu0 %1437 }
 0x44a   : > { %7594 = vst [vmem:[#allocation24_spill] sm:$0xff] %v5427_v5 }
 0x44b   : > { %1807 = vbcast.lane.b32.xlu0 %v5433_v0, 256  ;;  %1793 = vbcast.lane.b32.xlu1 %v1791_v29, 256 }
 0x44d   : > { %v5438_v2 = vpop.permute.xlu1 %1430  ;;  %v5440_v27 = vpop.permute.xlu0 %2081 }
 0x44e   : > { %7595 = vst [vmem:[#allocation25_spill] sm:$0xff] %v5440_v27 }
 0x44f   : > { %2369 = vbcast.lane.b32.xlu0 %v5444_v37, 260  ;;  %1622 = vbcast.lane.b32.xlu1 %v5444_v37, 256 }
 0x451   : > { %v5448_v4 = vpop.permute.xlu1 %1251  ;;  %v5450_v8 = vpop.permute.xlu0 %2225 }
 0x452   : > { %7596 = vst [vmem:[#allocation26_spill] sm:$0xff] %v5448_v4  ;;  %v5501_v4 = vrot.slane %v5374_v43, %v5331_v23 }
 0x453   : > { %2505 = vbcast.lane.b32.xlu0 %v5454_v9, 260  ;;  %1800 = vbcast.lane.b32.xlu1 %v5454_v9, 256 }
 0x455   : > { %v5458_v14 = vpop.permute.xlu1 %1444  ;;  %v5460_v15 = vpop.permute.xlu0 %2085 }
 0x456   : > { %7597 = vst [vmem:[#allocation27_spill] sm:$0xff] %v5460_v15 }
 0x457   : > { %1828 = vbcast.lane.b32.xlu0 %v5464_v20, 256  ;;  %2501 = vbcast.lane.b32.xlu1 %v1791_v29, 260 }
 0x459   : > { %v5467_v21 = vpop.permute.xlu1 %2093  ;;  %v5469_v24 = vpop.permute.xlu0 %2229 }
 0x45a   : > { %7598 = vst [vmem:[#allocation28_spill] sm:$0xff] %v5467_v21  ;;  %v5491_v21 = vrot.slane %v5374_v43, %v5315_v39 }
 0x45b   : > { %2381 = vbcast.lane.b32.xlu0 %v5473_v25, 260  ;;  %1636 = vbcast.lane.b32.xlu1 %v5477_v26, 256 }
 0x45d   : > { %v5481_v28 = vpop.permute.xlu1 %2237  ;;  %v5483_v17 = vpop.permute.xlu0 %1258 }
 0x45e   : > { %7599 = vst [vmem:[#allocation29_spill] sm:$0xff] %v5483_v17 }
 0x45f   : > { %2517 = vbcast.lane.b32.xlu0 %v5487_v1, 260  ;;  %1814 = vbcast.lane.b32.xlu1 %v5491_v21, 256 }
 0x461   : > { %v5495_v31 = vpop.permute.xlu1 %2745  ;;  %v5497_v15 = vpop.permute.xlu0 %1451 }
 0x462   : > { %7600 = vst [vmem:[#allocation30_spill] sm:$0xff] %v5495_v31 }
 0x463   : > { %1835 = vbcast.lane.b32.xlu0 %v5501_v4, 256  ;;  %2373 = vbcast.lane.b32.xlu1 %v5423_v63, 260 }
 0x465   : > { %v5505_v17 = vpop.permute.xlu1 %2889  ;;  %v5507_v27 = vpop.permute.xlu0 %2089 }
 0x466   : > { %7601 = vst [vmem:[#allocation31_spill] sm:$0xff] %v5505_v17  ;;  %7602 = vst [vmem:[#allocation32_spill] sm:$0xff] %v5507_v27 }
 0x467   : > { %2525 = vbcast.lane.b32.xlu0 %v5501_v4, 260  ;;  %2509 = vbcast.lane.b32.xlu1 %v5433_v0, 260 }
 0x469   : > { %v5511_v54 = vpop.permute.xlu1 %2753  ;;  %v5513_v31 = vpop.permute.xlu0 %2233 }
 0x46a   : > { %7603 = vst [vmem:[#allocation33_spill] sm:$0xff] %v5511_v54 }
 0x46b   : > { %1643 = vbcast.lane.b32.xlu1 %v5473_v25, 256  ;;  %3037 = vbcast.lane.b32.xlu0 %v5361_v38, 264 }
 0x46d   : > { %v5517_v43 = vpop.permute.xlu1 %3425  ;;  %v5519_v5 = vpop.permute.xlu0 %2749 }
 0x46e   : > { %7604 = vst [vmem:[#allocation34_spill] sm:$0xff] %v5517_v43  ;;  %7605 = vst [vmem:[#allocation35_spill] sm:$0xff] %v5519_v5 }
 0x46f   : > { %1821 = vbcast.lane.b32.xlu1 %v5487_v1, 256  ;;  %3713 = vbcast.lane.b32.xlu0 %v5371_v48, 268 }
 0x471   : > { %v5523_v27 = vpop.permute.xlu1 %3569  ;;  %v5525_v59 = vpop.permute.xlu0 %2893 }
 0x472   : > { %7606 = vst [vmem:[#allocation36_spill] sm:$0xff] %v5523_v27 }
 0x473   : > { %2377 = vbcast.lane.b32.xlu1 %v5477_v26, 260  ;;  %3181 = vbcast.lane.b32.xlu0 %v1791_v29, 264 }
 0x475   : > { %v5528_v54 = vpop.permute.xlu1 %2757  ;;  %v5530_v45 = vpop.permute.xlu0 %2897 }
 0x476   : > { %7607 = vst [vmem:[#allocation37_spill] sm:$0xff] %v5528_v54 }
 0x477   : > { %2513 = vbcast.lane.b32.xlu1 %v5491_v21, 260  ;;  %3049 = vbcast.lane.b32.xlu0 %v5444_v37, 264 }
 0x479   : > { %v5534_v5 = vpop.permute.xlu1 %2901  ;;  %v5536_v43 = vpop.permute.xlu0 %3429 }
 0x47a   : > { %7608 = vst [vmem:[#allocation38_spill] sm:$0xff] %v5534_v5  ;;  %7609 = vst [vmem:[#allocation39_spill] sm:$0xff] %v5536_v43 }
 0x47b   : > { %2521 = vbcast.lane.b32.xlu1 %v5464_v20, 260  ;;  %3185 = vbcast.lane.b32.xlu0 %v5454_v9, 264 }
 0x47d   : > { %v5540_v18 = vpop.permute.xlu1 %3433  ;;  %v5542_v34 = vpop.permute.xlu0 %3573 }
 0x47e   : > { %7610 = vst [vmem:[#allocation40_spill] sm:$0xff] %v5540_v18  ;;  %7611 = vst [vmem:[#allocation41_spill] sm:$0xff] %v5542_v34 }
 0x47f   : > { %3033 = vbcast.lane.b32.xlu1 %v5371_v48, 264  ;;  %3861 = vbcast.lane.b32.xlu0 %v1791_v29, 268 }
 0x481   : > { %v5545_v54 = vpop.permute.xlu1 %2761  ;;  %v5547_v53 = vpop.permute.xlu0 %3577 }
 0x482   : > { %7612 = vst [vmem:[#allocation42_spill] sm:$0xff] %v5545_v54  ;;  %7613 = vst [vmem:[#allocation43_spill] sm:$0xff] %v5547_v53 }
 0x483   : > { %3041 = vbcast.lane.b32.xlu1 %v5401_v52, 264  ;;  %3057 = vbcast.lane.b32.xlu0 %v5477_v26, 264 }
 0x485   : > { %v5551_v43 = vpop.permute.xlu1 %2905  ;;  %v5553_v13 = vpop.permute.xlu0 %3437 }
 0x486   : > { %7614 = vst [vmem:[#allocation44_spill] sm:$0xff] %v5551_v43  ;;  %7615 = vst [vmem:[#allocation45_spill] sm:$0xff] %v5553_v13 }
 0x487   : > { %3717 = vbcast.lane.b32.xlu1 %v5361_v38, 268  ;;  %3193 = vbcast.lane.b32.xlu0 %v5491_v21, 264 }
 0x489   : > { %v5557_v18 = vpop.permute.xlu1 %2765  ;;  %v5559_v48 = vpop.permute.xlu0 %3581 }
 0x48a   : > { %7616 = vst [vmem:[#allocation46_spill] sm:$0xff] %v5557_v18  ;;  %7617 = vst [vmem:[#allocation47_spill] sm:$0xff] %v5559_v48 }
 0x48b   : > { %3045 = vbcast.lane.b32.xlu1 %v5382_v47, 264  ;;  %3733 = vbcast.lane.b32.xlu0 %v5423_v63, 268 }
 0x48d   : > { %v5563_v29 = vpop.permute.xlu1 %2909  ;;  %v5565_v54 = vpop.permute.xlu0 %2769 }
 0x48e   : > { %7618 = vst [vmem:[#allocation48_spill] sm:$0xff] %v5563_v29  ;;  %7619 = vst [vmem:[#allocation49_spill] sm:$0xff] %v5565_v54 }
 0x48f   : > { %3177 = vbcast.lane.b32.xlu1 %v5391_v16, 264  ;;  %3869 = vbcast.lane.b32.xlu0 %v5433_v0, 268 }
 0x491   : > { %v5569_v13 = vpop.permute.xlu1 %3441  ;;  %v5571_v38 = vpop.permute.xlu0 %2913 }
 0x492   : > { %7620 = vst [vmem:[#allocation50_spill] sm:$0xff] %v5569_v13  ;;  %7621 = vst [vmem:[#allocation51_spill] sm:$0xff] %v5571_v38 }
 0x493   : > { %3721 = vbcast.lane.b32.xlu1 %v5401_v52, 268  ;;  %3201 = vbcast.lane.b32.xlu0 %v5464_v20, 264 }
 0x495   : > { %v5575_v18 = vpop.permute.xlu1 %3585  ;;  %v5577_v44 = vpop.permute.xlu0 %3453 }
 0x496   : > { %7622 = vst [vmem:[#allocation52_spill] sm:$0xff] %v5575_v18  ;;  %7623 = vst [vmem:[#allocation53_spill] sm:$0xff] %v5577_v44  ;;  %v1154_v44 = vsel %vm1143_vm10, %v5345_v30, 0.0 }
 0x497   : > { %3725 = vbcast.lane.b32.xlu1 %v5382_v47, 268  ;;  %3741 = vbcast.lane.b32.xlu0 %v5473_v25, 268  ;;  %v5611_v41 = vrot.slane %v1154_v44, %v5151_v22  ;;  %v5620_v30 = vrot.slane %v1154_v44, %v5157_v33 }
 0x499   : > { %v5581_v54 = vpop.permute.xlu1 %3445  ;;  %v5583_v35 = vpop.permute.xlu0 %3597 }
 0x49a   : > { %7624 = vst [vmem:[#allocation54_spill] sm:$0xff] %v5581_v54  ;;  %7625 = vst [vmem:[#allocation55_spill] sm:$0xff] %v5583_v35 }
 0x49b   : > { %3857 = vbcast.lane.b32.xlu1 %v5391_v16, 268  ;;  %3877 = vbcast.lane.b32.xlu0 %v5487_v1, 268 }
 0x49d   : > { %v5587_v13 = vpop.permute.xlu1 %3589  ;;  %v5589_v52 = vpop.permute.xlu0 %1601 }
 0x49e   : > { %7626 = vst [vmem:[#allocation56_spill] sm:$0xff] %v5587_v13  ;;  %7627 = vst [vmem:[#allocation57_spill] sm:$0xff] %v5589_v52  ;;  %v5685_v52 = vrot.slane %v1154_v44, %v5331_v23 }
 0x49f   : > { %3053 = vbcast.lane.b32.xlu1 %v5423_v63, 264  ;;  %3205 = vbcast.lane.b32.xlu0 %v5501_v4, 264 }
 0x4a1   : > { %v5599_v47 = vpop.permute.xlu1 %2773  ;;  %v5601_v16 = vpop.permute.xlu0 %2353 }
 0x4a2   : > { %7628 = vst [vmem:[#allocation58_spill] sm:$0xff] %v5599_v47  ;;  %7629 = vst [vmem:[#allocation59_spill] sm:$0xff] %v5601_v16  ;;  %v5635_v16 = vrot.slane %v1154_v44, %v5194_v12 }
 0x4a3   : > { %3189 = vbcast.lane.b32.xlu1 %v5433_v0, 264  ;;  %3885 = vbcast.lane.b32.xlu0 %v5501_v4, 268 }
 0x4a5   : > { %v5606_v63 = vpop.permute.xlu1 %2917  ;;  %v5608_v54 = vpop.permute.xlu0 %1615 }
 0x4a6   : > { %7630 = vst [vmem:[#allocation60_spill] sm:$0xff] %v5606_v63  ;;  %7631 = vst [vmem:[#allocation61_spill] sm:$0xff] %v5608_v54  ;;  %v1492_v63 = vrot.slane %v1154_v44, %v5315_v39 }
 0x4a7   : > { %3729 = vbcast.lane.b32.xlu1 %v5444_v37, 268  ;;  %1473 = vbcast.lane.b32.xlu0 %v5611_v41, 256 }
 0x4a9   : > { %v5615_v6 = vpop.permute.xlu1 %3449  ;;  %v5617_v47 = vpop.permute.xlu0 %1786 }
 0x4aa   : > { %7632 = vst [vmem:[#allocation62_spill] sm:$0xff] %v5615_v6 }
 0x4ab   : > { %3865 = vbcast.lane.b32.xlu1 %v5454_v9, 268  ;;  %1480 = vbcast.lane.b32.xlu0 %v5620_v30, 256 }
 0x4ad   : > { %v5624_v0 = vpop.permute.xlu1 %3593  ;;  %v5626_v4 = vpop.permute.xlu0 %2361 }
 0x4ae   : > { %7633 = vst [vmem:[#allocation63_spill] sm:$0xff] %v5624_v0  ;;  %7634 = vst [vmem:[#allocation64_spill] sm:$0xff] %v5626_v4  ;;  %v5653_v4 = vsel %vm1193_vm13, %v5341_v3, 0.0 }
 0x4af   : > { %3061 = vbcast.lane.b32.xlu1 %v5473_v25, 264  ;;  %2253 = vbcast.lane.b32.xlu0 %v5611_v41, 260  ;;  %v5663_v57 = vrot.slane %v5653_v4, %v5037_v10  ;;  %v5715_v13 = vrot.slane %v5653_v4, %v5157_v33  ;;  %v5724_v53 = vrot.slane %v5653_v4, %v5315_v39 }
 0x4b0   : > { %v5755_v43 = vrot.slane %v5653_v4, %v5331_v23 }
 0x4b1   : > { %v5630_v37 = vpop.permute.xlu1 %1594  ;;  %v5632_v6 = vpop.permute.xlu0 %2365 }
 0x4b2   : > { %7635 = vst [vmem:[#allocation65_spill] sm:$0xff] %v5630_v37  ;;  %7636 = vst [vmem:[#allocation66_spill] sm:$0xff] %v5632_v6  ;;  %v5650_v6 = vrot.slane %v1154_v44, %v5311_v7  ;;  %v5704_v37 = vrot.slane %v1154_v44, %v5321_v19 }
 0x4b3   : > { %3197 = vbcast.lane.b32.xlu1 %v5487_v1, 264  ;;  %1487 = vbcast.lane.b32.xlu0 %v5635_v16, 256  ;;  %7650 = vst [vmem:[#allocation80_spill] sm:$0xff] %v5755_v43 }
 0x4b5   : > { %v5645_v9 = vpop.permute.xlu1 %1608  ;;  %v5647_v25 = vpop.permute.xlu0 %2497 }
 0x4b6   : > { %7637 = vst [vmem:[#allocation67_spill] sm:$0xff] %v5645_v9 }
 0x4b7   : > { %3737 = vbcast.lane.b32.xlu1 %v5477_v26, 268  ;;  %1501 = vbcast.lane.b32.xlu0 %v5650_v6, 256  ;;  %v5673_v26 = vrot.slane %v5653_v4, %v5151_v22 }
 0x4b9   : > { %v5657_v1 = vpop.permute.xlu1 %2357  ;;  %v5659_v11 = vpop.permute.xlu0 %1629 }
 0x4ba   : > { %7638 = vst [vmem:[#allocation68_spill] sm:$0xff] %v5657_v1  ;;  %7639 = vst [vmem:[#allocation69_spill] sm:$0xff] %v5659_v11 }
 0x4bb   : > { %3873 = vbcast.lane.b32.xlu1 %v5491_v21, 268  ;;  %1850 = vbcast.lane.b32.xlu0 %v5663_v57, 256  ;;  %v5682_v21 = vrot.slane %v1154_v44, %v5037_v10 }
 0x4bd   : > { %v5667_v60 = vpop.permute.xlu1 %1793  ;;  %v5669_v3 = vpop.permute.xlu0 %1807 }
 0x4bf   : > { %3881 = vbcast.lane.b32.xlu1 %v5464_v20, 268  ;;  %2541 = vbcast.lane.b32.xlu0 %v5673_v26, 260  ;;  %v5695_v20 = vrot.slane %v5653_v4, %v5194_v12 }
 0x4c1   : > { %v5677_v9 = vpop.permute.xlu1 %1622  ;;  %v5679_v11 = vpop.permute.xlu0 %2369 }
 0x4c2   : > { %7640 = vst [vmem:[#allocation70_spill] sm:$0xff] %v5677_v9  ;;  %7641 = vst [vmem:[#allocation71_spill] sm:$0xff] %v5679_v11 }
 0x4c3   : > { %1466 = vbcast.lane.b32.xlu1 %v5682_v21, 256  ;;  %1515 = vbcast.lane.b32.xlu0 %v5685_v52, 256 }
 0x4c5   : > { %v5689_v54 = vpop.permute.xlu1 %1800  ;;  %v5691_v1 = vpop.permute.xlu0 %2505 }
 0x4c7   : > { %2249 = vbcast.lane.b32.xlu1 %v5682_v21, 260  ;;  %1871 = vbcast.lane.b32.xlu0 %v5695_v20, 256 }
 0x4c9   : > { %v5699_v9 = vpop.permute.xlu1 %2501  ;;  %v5701_v11 = vpop.permute.xlu0 %1828 }
 0x4ca   : > { %7642 = vst [vmem:[#allocation72_spill] sm:$0xff] %v5701_v11 }
 0x4cb   : > { %2257 = vbcast.lane.b32.xlu1 %v5620_v30, 260  ;;  %2273 = vbcast.lane.b32.xlu0 %v5704_v37, 260 }
 0x4cd   : > { %v5708_v0 = vpop.permute.xlu1 %1636  ;;  %v5710_v35 = vpop.permute.xlu0 %2381 }
 0x4ce   : > { %7643 = vst [vmem:[#allocation73_spill] sm:$0xff] %v5708_v0  ;;  %7644 = vst [vmem:[#allocation74_spill] sm:$0xff] %v5710_v35 }
 0x4cf   : > { %1494 = vbcast.lane.b32.xlu1 %v1492_v63, 256  ;;  %2545 = vbcast.lane.b32.xlu0 %v5715_v13, 260 }
 0x4d1   : > { %v5718_v29 = vpop.permute.xlu1 %1814  ;;  %v5720_v38 = vpop.permute.xlu0 %2517 }
 0x4d3   : > { %2261 = vbcast.lane.b32.xlu1 %v5635_v16, 260  ;;  %1878 = vbcast.lane.b32.xlu0 %v5724_v53, 256 }
 0x4d5   : > { %v5728_v44 = vpop.permute.xlu1 %2373  ;;  %v5730_v35 = vpop.permute.xlu0 %1835 }
 0x4d6   : > { %7645 = vst [vmem:[#allocation75_spill] sm:$0xff] %v5728_v44  ;;  %7646 = vst [vmem:[#allocation76_spill] sm:$0xff] %v5730_v35  ;;  %v5745_v44 = vrot.slane %v5653_v4, %v5311_v7 }
 0x4d7   : > { %1857 = vbcast.lane.b32.xlu1 %v5673_v26, 256  ;;  %2277 = vbcast.lane.b32.xlu0 %v5685_v52, 260 }
 0x4d9   : > { %v5734_v0 = vpop.permute.xlu1 %2509  ;;  %v5736_v27 = vpop.permute.xlu0 %2525 }
 0x4db   : > { %2265 = vbcast.lane.b32.xlu1 %v1492_v63, 260  ;;  %2549 = vbcast.lane.b32.xlu0 %v5695_v20, 260 }
 0x4dd   : > { %v5739_v18 = vpop.permute.xlu1 %1643  ;;  %v5741_v17 = vpop.permute.xlu0 %3037 }
 0x4de   : > { %7647 = vst [vmem:[#allocation77_spill] sm:$0xff] %v5739_v18  ;;  %7648 = vst [vmem:[#allocation78_spill] sm:$0xff] %v5741_v17 }
 0x4df   : > { %1508 = vbcast.lane.b32.xlu1 %v5704_v37, 256  ;;  %2557 = vbcast.lane.b32.xlu0 %v5745_v44, 260 }
 0x4e1   : > { %v5749_v35 = vpop.permute.xlu1 %1821  ;;  %v5751_v48 = vpop.permute.xlu0 %3713 }
 0x4e2   : > { %7649 = vst [vmem:[#allocation79_spill] sm:$0xff] %v5751_v48 }
 0x4e3   : > { %1864 = vbcast.lane.b32.xlu1 %v5715_v13, 256  ;;  %2565 = vbcast.lane.b32.xlu0 %v5755_v43, 260 }
 0x4e5   : > { %v5759_v17 = vpop.permute.xlu1 %2377  ;;  %v5761_v18 = vpop.permute.xlu0 %3181 }
 0x4e6   : > { %7651 = vst [vmem:[#allocation81_spill] sm:$0xff] %v5759_v17  ;;  %7652 = vst [vmem:[#allocation82_spill] sm:$0xff] %v5761_v18 }
 0x4e7   : > { %2269 = vbcast.lane.b32.xlu1 %v5650_v6, 260  ;;  %2933 = vbcast.lane.b32.xlu0 %v5611_v41, 264 }
 0x4e9   : > { %v5765_v11 = vpop.permute.xlu1 %2513  ;;  %v5767_v5 = vpop.permute.xlu0 %3049 }
 0x4ea   : > { %7653 = vst [vmem:[#allocation83_spill] sm:$0xff] %v5765_v11  ;;  %7654 = vst [vmem:[#allocation84_spill] sm:$0xff] %v5767_v5 }
 0x4eb   : > { %2537 = vbcast.lane.b32.xlu1 %v5663_v57, 260  ;;  %2937 = vbcast.lane.b32.xlu0 %v5620_v30, 264 }
 0x4ed   : > { %v5771_v48 = vpop.permute.xlu1 %2521  ;;  %v5773_v34 = vpop.permute.xlu0 %3185 }
 0x4ee   : > { %7655 = vst [vmem:[#allocation85_spill] sm:$0xff] %v5771_v48  ;;  %7656 = vst [vmem:[#allocation86_spill] sm:$0xff] %v5773_v34  ;;  %v5789_v48 = vrot.slane %v5653_v4, %v5321_v19 }
 0x4ef   : > { %1885 = vbcast.lane.b32.xlu1 %v5745_v44, 256  ;;  %3613 = vbcast.lane.b32.xlu0 %v5611_v41, 268 }
 0x4f1   : > { %v5777_v17 = vpop.permute.xlu1 %3033  ;;  %v5779_v18 = vpop.permute.xlu0 %3861 }
 0x4f2   : > { %7657 = vst [vmem:[#allocation87_spill] sm:$0xff] %v5777_v17  ;;  %7658 = vst [vmem:[#allocation88_spill] sm:$0xff] %v5779_v18 }
 0x4f3   : > { %2553 = vbcast.lane.b32.xlu1 %v5724_v53, 260  ;;  %2941 = vbcast.lane.b32.xlu0 %v5635_v16, 264 }
 0x4f5   : > { %v5783_v5 = vpop.permute.xlu1 %3041  ;;  %v5785_v11 = vpop.permute.xlu0 %3057 }
 0x4f6   : > { %7659 = vst [vmem:[#allocation89_spill] sm:$0xff] %v5783_v5  ;;  %7660 = vst [vmem:[#allocation90_spill] sm:$0xff] %v5785_v11 }
 0x4f7   : > { %1892 = vbcast.lane.b32.xlu1 %v5789_v48, 256  ;;  %2945 = vbcast.lane.b32.xlu0 %v1492_v63, 264 }
 0x4f9   : > { %v5792_v41 = vpop.permute.xlu1 %3717  ;;  %v5794_v17 = vpop.permute.xlu0 %3193 }
 0x4fa   : > { %7661 = vst [vmem:[#allocation91_spill] sm:$0xff] %v5792_v41  ;;  %7662 = vst [vmem:[#allocation92_spill] sm:$0xff] %v5794_v17 }
 0x4fb   : > { %1899 = vbcast.lane.b32.xlu1 %v5755_v43, 256  ;;  %3621 = vbcast.lane.b32.xlu0 %v5635_v16, 268 }
 0x4fd   : > { %v5798_v18 = vpop.permute.xlu1 %3045  ;;  %v5800_v5 = vpop.permute.xlu0 %3733 }
 0x4fe   : > { %7663 = vst [vmem:[#allocation93_spill] sm:$0xff] %v5798_v18  ;;  %7664 = vst [vmem:[#allocation94_spill] sm:$0xff] %v5800_v5 }
 0x4ff   : > { %2561 = vbcast.lane.b32.xlu1 %v5789_v48, 260  ;;  %3221 = vbcast.lane.b32.xlu0 %v5673_v26, 264 }
 0x501   : > { %v5804_v4 = vpop.permute.xlu1 %3177  ;;  %v5806_v11 = vpop.permute.xlu0 %3869 }
 0x502   : > { %7665 = vst [vmem:[#allocation95_spill] sm:$0xff] %v5804_v4  ;;  %7666 = vst [vmem:[#allocation96_spill] sm:$0xff] %v5806_v11 }
 0x503   : > { %2929 = vbcast.lane.b32.xlu1 %v5682_v21, 264  ;;  %3625 = vbcast.lane.b32.xlu0 %v1492_v63, 268 }
 0x505   : > { %v5809_v41 = vpop.permute.xlu1 %3721  ;;  %v5811_v17 = vpop.permute.xlu0 %3201 }
 0x506   : > { %7667 = vst [vmem:[#allocation97_spill] sm:$0xff] %v5809_v41  ;;  %7668 = vst [vmem:[#allocation98_spill] sm:$0xff] %v5811_v17 }
 0x507   : > { %3609 = vbcast.lane.b32.xlu1 %v5682_v21, 268  ;;  %2953 = vbcast.lane.b32.xlu0 %v5704_v37, 264 }
 0x509   : > { %v5815_v16 = vpop.permute.xlu1 %3725  ;;  %v5817_v5 = vpop.permute.xlu0 %3741 }
 0x50a   : > { %7669 = vst [vmem:[#allocation99_spill] sm:$0xff] %v5815_v16  ;;  %7670 = vst [vmem:[#allocation100_spill] sm:$0xff] %v5817_v5 }
 0x50b   : > { %3617 = vbcast.lane.b32.xlu1 %v5620_v30, 268  ;;  %3225 = vbcast.lane.b32.xlu0 %v5715_v13, 264 }
 0x50d   : > { %v5821_v18 = vpop.permute.xlu1 %3857  ;;  %v5823_v11 = vpop.permute.xlu0 %3877 }
 0x50e   : > { %7671 = vst [vmem:[#allocation101_spill] sm:$0xff] %v5821_v18  ;;  %7672 = vst [vmem:[#allocation102_spill] sm:$0xff] %v5823_v11 }
 0x50f   : > { %2949 = vbcast.lane.b32.xlu1 %v5650_v6, 264  ;;  %3629 = vbcast.lane.b32.xlu0 %v5650_v6, 268 }
 0x511   : > { %v5827_v63 = vpop.permute.xlu1 %3053  ;;  %v5829_v21 = vpop.permute.xlu0 %3205 }
 0x512   : > { %7673 = vst [vmem:[#allocation103_spill] sm:$0xff] %v5827_v63  ;;  %7674 = vst [vmem:[#allocation104_spill] sm:$0xff] %v5829_v21 }
 0x513   : > { %3217 = vbcast.lane.b32.xlu1 %v5663_v57, 264  ;;  %3897 = vbcast.lane.b32.xlu0 %v5663_v57, 268 }
 0x515   : > { %v5833_v5 = vpop.permute.xlu1 %3189  ;;  %v5835_v30 = vpop.permute.xlu0 %3885 }
 0x516   : > { %7675 = vst [vmem:[#allocation105_spill] sm:$0xff] %v5833_v5  ;;  %7676 = vst [vmem:[#allocation106_spill] sm:$0xff] %v5835_v30 }
 0x517   : > { %3901 = vbcast.lane.b32.xlu1 %v5673_v26, 268  ;;  %3233 = vbcast.lane.b32.xlu0 %v5724_v53, 264  ;;  %v5852_v26 = vsel %vm5267_vm4, %v5347_v61, 0.0 }
 0x518   : > { %v5903_v55 = vrot.slane %v5852_v26, %v5151_v22 }
 0x519   : > { %v5839_v16 = vpop.permute.xlu1 %3729  ;;  %v1474_v41 = vpop.permute.xlu0 %1473 }
 0x51a   : > { %7677 = vst [vmem:[#allocation107_spill] sm:$0xff] %v5839_v16  ;;  %v7680_v16 = vlaneseq }
 0x51b   : > { %2957 = vbcast.lane.b32.xlu1 %v5685_v52, 264  ;;  %3637 = vbcast.lane.b32.xlu0 %v5685_v52, 268 }
 0x51c   : > { %v5855_v21 = vand.u32 127, %v7680_v16 }
 0x51d   : > { %v5843_v6 = vpop.permute.xlu1 %3865  ;;  %v1481_v63 = vpop.permute.xlu0 %1480 }
 0x51e   : > { %7678 = vst [vmem:[#allocation108_spill] sm:$0xff] %v5843_v6  ;;  %vm1454_vm12 = vcmp.eq.s32.totalorder %v5357_v36, %v5855_v21  ;;  %vm1455_vm14 = vcmp.eq.s32.totalorder %v5367_v42, %v5855_v21  ;;  %vm2240_vm15 = vcmp.eq.s32.totalorder %v5387_v49, %v5855_v21  ;;  %vm1456_vm3 = vcmp.eq.s32.totalorder %v5411_v56, %v5855_v21 }
 0x51f   : > { %3229 = vbcast.lane.b32.xlu1 %v5695_v20, 264  ;;  %3909 = vbcast.lane.b32.xlu0 %v5695_v20, 268  ;;  %v1518_v46 = vsel %vm1454_vm12, %v1474_v41, 0.0  ;;  %v1519_v61 = vsel %vm1455_vm14, %v1481_v63, 0.0  ;;  %v5880_v49 = vrot.slane %v5852_v26, %v5157_v33  ;;  %vm1458_vm4 = vcmp.eq.s32.totalorder %v5429_v62, %v5855_v21 }
 0x520   : > { %v1532_v16 = vsel %vm1332_vm2, %v1518_v46, 0.0  ;;  %v1539_v56 = vsel %vm1332_vm2, %v1519_v61, 0.0  ;;  %vm1837_vm5 = vcmp.eq.s32.totalorder %v5617_v47, %v5855_v21  ;;  %v5912_v47 = vrot.slane %v5852_v26, %v5311_v7 }
 0x521   : > { %v5847_v57 = vpop.permute.xlu1 %3061  ;;  %v2254_v30 = vpop.permute.xlu0 %2253  ;;  %v1540_v62 = vrot.slane %v1539_v56, 4  ;;  %vm2528_vm6 = vcmp.eq.s32.totalorder %v5699_v9, %v5855_v21  ;;  %v5934_v9 = vrot.slane %v5852_v26, %v5315_v39  ;;  %vm1453_vm7 = vcmp.eq.s32.totalorder %v5365_v40, %v5855_v21 }
 0x522   : > { %7679 = vst [vmem:[#allocation109_spill] sm:$0xff] %v5847_v57  ;;  %v5865_v57 = vrot.slane %v5852_v26, %v5037_v10  ;;  %v2280_v36 = vsel %vm2240_vm15, %v2254_v30, 0.0  ;;  %v1181_v30 = vsel %vm5300_vm8, %v5351_v32, 0.0  ;;  %vm1460_vm8 = vcmp.eq.s32.totalorder %v5497_v15, %v5855_v21 }
 0x523   : > { %3633 = vbcast.lane.b32.xlu1 %v5704_v37, 268  ;;  %3917 = vbcast.lane.b32.xlu0 %v5745_v44, 268  ;;  %v2294_v41 = vsel %vm1332_vm2, %v2280_v36, 0.0  ;;  %v5908_v32 = vrot.slane %v1181_v30, %v5037_v10  ;;  %v1541_v10 = vadd.f32 %v1540_v62, %v1539_v56  ;;  %vm2239_vm9 = vcmp.eq.s32.totalorder %v5395_v50, %v5855_v21 }
 0x524   : > { %7682 = vst [vmem:[#allocation111_spill] sm:$0xff] %v5865_v57  ;;  %v2295_v46 = vrot.slane %v2294_v41, 4  ;;  %vm2241_vm10 = vcmp.eq.s32.totalorder %v5397_v51, %v5855_v21  ;;  %vm1840_vm11 = vcmp.eq.s32.totalorder %v5669_v3, %v5855_v21  ;;  %vm1457_vm13 = vcmp.eq.s32.totalorder %v5438_v2, %v5855_v21 }
 0x525   : > { %v5861_v52 = vpop.permute.xlu1 %3197  ;;  %v1488_v20 = vpop.permute.xlu0 %1487  ;;  %vm2245_vm12 = vcmp.eq.s32.totalorder %v5513_v31, %v5855_v21  ;;  %vm2529_vm14 = vcmp.eq.s32.totalorder %v5691_v1, %v5855_v21  ;;  %vm2242_vm15 = vcmp.eq.s32.totalorder %v5413_v58, %v5855_v21 }
 0x526   : > { %7681 = vst [vmem:[#allocation110_spill] sm:$0xff] %v5861_v52  ;;  %v1520_v37 = vsel %vm1456_vm3, %v1488_v20, 0.0  ;;  %v1533_v20 = vrot.slane %v1532_v16, 4  ;;  %v2296_v52 = vadd.f32 %v2295_v46, %v2294_v41  ;;  %vm1841_vm3 = vcmp.eq.s32.totalorder %v5718_v29, %v5855_v21 }
 0x527   : > { %3905 = vbcast.lane.b32.xlu1 %v5715_v13, 268  ;;  %1273 = vbcast.lane.b32.xlu0 %v5865_v57, 256  ;;  %v1546_v13 = vsel %vm1332_vm2, %v1520_v37, 0.0  ;;  %v5898_v37 = vrot.slane %v5852_v26, %v5194_v12 }
 0x528   : > { %v2297_v62 = vrot.slane %v2296_v52, 2 }
 0x529   : > { %v5876_v17 = vpop.permute.xlu1 %3737  ;;  %v1502_v42 = vpop.permute.xlu0 %1501 }
 0x52a   : > { %7683 = vst [vmem:[#allocation112_spill] sm:$0xff] %v5876_v17  ;;  %v1522_v63 = vsel %vm1458_vm4, %v1502_v42, 0.0  ;;  %vm2246_vm4 = vcmp.eq.s32.totalorder %v5481_v28, %v5855_v21 }
 0x52b   : > { %3237 = vbcast.lane.b32.xlu1 %v5745_v44, 264  ;;  %1287 = vbcast.lane.b32.xlu0 %v5880_v49, 256  ;;  %v1547_v44 = vrot.slane %v1546_v13, 4  ;;  %v1560_v42 = vsel %vm1332_vm2, %v1522_v63, 0.0  ;;  %v1534_v63 = vadd.f32 %v1533_v20, %v1532_v16  ;;  %v5943_v16 = vrot.slane %v1181_v30, %v5157_v33 }
 0x52c   : > { %v1561_v6 = vrot.slane %v1560_v42, 4  ;;  %v1542_v20 = vrot.slane %v1541_v10, 2 }
 0x52d   : > { %v5894_v61 = vpop.permute.xlu1 %3873  ;;  %v1851_v36 = vpop.permute.xlu0 %1850  ;;  %v1548_v4 = vadd.f32 %v1547_v44, %v1546_v13  ;;  %v1535_v56 = vrot.slane %v1534_v63, 2  ;;  %v5949_v13 = vrot.slane %v1181_v30, %v5331_v23 }
 0x52e   : > { %7684 = vst [vmem:[#allocation113_spill] sm:$0xff] %v5894_v61  ;;  %v1901_v17 = vsel %vm1837_vm5, %v1851_v36, 0.0  ;;  %v5916_v61 = vrot.slane %v5852_v26, %v5321_v19  ;;  %v5921_v36 = vrot.slane %v1181_v30, %v5151_v22  ;;  %v1562_v46 = vadd.f32 %v1561_v6, %v1560_v42 }
 0x52f   : > { %3913 = vbcast.lane.b32.xlu1 %v5724_v53, 268  ;;  %2105 = vbcast.lane.b32.xlu0 %v5865_v57, 260  ;;  %v5924_v53 = vrot.slane %v1181_v30, %v5194_v12  ;;  %v1909_v11 = vsel %vm1332_vm2, %v1901_v17, 0.0  ;;  %v5930_v57 = vrot.slane %v1181_v30, %v5311_v7  ;;  %v5940_v17 = vrot.slane %v1181_v30, %v5315_v39 }
 0x530   : > { %v1910_v41 = vrot.slane %v1909_v11, 4  ;;  %7686 = vst [vmem:[#allocation115_spill] sm:$0xff] %v5949_v13  ;;  %v1549_v22 = vrot.slane %v1548_v4, 2  ;;  %v1536_v15 = vadd.f32 %v1535_v56, %v1534_v63  ;;  %v1543_v42 = vadd.f32 %v1542_v20, %v1541_v10 }
 0x531   : > { %v5927_v5 = vpop.permute.xlu1 %3881  ;;  %v2542_v18 = vpop.permute.xlu0 %2541  ;;  %vm1838_vm5 = vcmp.eq.s32.totalorder %v5667_v60, %v5855_v21 }
 0x532   : > { %7685 = vst [vmem:[#allocation114_spill] sm:$0xff] %v5927_v5  ;;  %v2568_v34 = vsel %vm2528_vm6, %v2542_v18, 0.0  ;;  %v5946_v18 = vrot.slane %v1181_v30, %v5321_v19  ;;  %v1911_v6 = vadd.f32 %v1910_v41, %v1909_v11  ;;  %v1550_v13 = vadd.f32 %v1549_v22, %v1548_v4 }
 0x533   : > { %v2582_v12 = vsel %vm1332_vm2, %v2568_v34, 0.0  ;;  %3241 = vbcast.lane.b32.xlu1 %v5789_v48, 264  ;;  %1294 = vbcast.lane.b32.xlu0 %v5898_v37, 256  ;;  %v5953_v34 = vrot.slane %v5852_v26, %v5331_v23  ;;  %v1563_v23 = vrot.slane %v1562_v46, 2  ;;  %v1537_v22 = vrot.slane %v1536_v15, 1 }
 0x534   : > { %v2583_v19 = vrot.slane %v2582_v12, 4  ;;  %v1544_v11 = vrot.slane %v1543_v42, 1  ;;  %vm2243_vm6 = vcmp.eq.s32.totalorder %v5450_v8, %v5855_v21 }
 0x535   : > { %7687 = vst [vmem:[#allocation116_spill] sm:$0xff] %v5953_v34  ;;  %v1467_v44 = vpop.permute.xlu1 %1466  ;;  %v1516_v33 = vpop.permute.xlu0 %1515 }
 0x536   : > { %v1517_v7 = vsel %vm1453_vm7, %v1467_v44, 0.0  ;;  %v1524_v40 = vsel %vm1460_vm8, %v1516_v33, 0.0  ;;  %v2298_v44 = vadd.f32 %v2297_v62, %v2296_v52  ;;  %v1564_v52 = vadd.f32 %v1563_v23, %v1562_v46 }
 0x537   : > { %v1525_v26 = vsel %vm1332_vm2, %v1517_v7, 0.0  ;;  %3245 = vbcast.lane.b32.xlu1 %v5755_v43, 264  ;;  %1658 = vbcast.lane.b32.xlu0 %v5908_v32, 256  ;;  %v1574_v30 = vsel %vm1332_vm2, %v1524_v40, 0.0  ;;  %v2584_v7 = vadd.f32 %v2583_v19, %v2582_v12  ;;  %v1912_v19 = vrot.slane %v1911_v6, 2 }
 0x538   : > { %v1526_v39 = vrot.slane %v1525_v26, 4  ;;  %v1575_v33 = vrot.slane %v1574_v30, 4  ;;  %v2299_v4 = vrot.slane %v2298_v44, 1  ;;  %v5998_v62 = vadd.f32 %v1537_v22, %v1536_v15 }
 0x539   : > { %v2250_v5 = vpop.permute.xlu1 %2249  ;;  %v1872_v34 = vpop.permute.xlu0 %1871  ;;  %v2585_v3 = vrot.slane %v2584_v7, 2  ;;  %v1913_v46 = vadd.f32 %v1912_v19, %v1911_v6  ;;  %v6001_v51 = vadd.f32 %v1544_v11, %v1543_v42  ;;  %vm2530_vm7 = vcmp.eq.s32.totalorder %v5734_v0, %v5855_v21 }
 0x53a   : > { %v2279_v43 = vsel %vm2239_vm9, %v2250_v5, 0.0  ;;  %v1904_v10 = vsel %vm1840_vm11, %v1872_v34, 0.0  ;;  %v1527_v63 = vadd.f32 %v1526_v39, %v1525_v26  ;;  %v1576_v41 = vadd.f32 %v1575_v33, %v1574_v30  ;;  %7688 = vst [vmem:[#allocation117_spill] sm:$0xff] %v5998_v62 }
 0x53b   : > { %3921 = vbcast.lane.b32.xlu1 %v5789_v48, 268  ;;  %2397 = vbcast.lane.b32.xlu0 %v5921_v36, 260  ;;  %v2287_v50 = vsel %vm1332_vm2, %v2279_v43, 0.0  ;;  %v1930_v5 = vsel %vm1332_vm2, %v1904_v10, 0.0  ;;  %v1551_v48 = vrot.slane %v1550_v13, 1  ;;  %v1565_v30 = vrot.slane %v1564_v52, 1 }
 0x53c   : > { %v2288_v34 = vrot.slane %v2287_v50, 4  ;;  %v1931_v20 = vrot.slane %v1930_v5, 4  ;;  %v1528_v33 = vrot.slane %v1527_v63, 2  ;;  %v6007_v31 = vadd.f32 %v2299_v4, %v2298_v44 }
 0x53d   : > { %v2258_v12 = vpop.permute.xlu1 %2257  ;;  %v2274_v56 = vpop.permute.xlu0 %2273  ;;  %v2586_v15 = vadd.f32 %v2585_v3, %v2584_v7  ;;  %v1577_v6 = vrot.slane %v1576_v41, 2  ;;  %v6012_v22 = vadd.f32 %v1551_v48, %v1550_v13  ;;  %v6020_v4 = vadd.f32 %v1565_v30, %v1564_v52 }
 0x53e   : > { %v2281_v43 = vsel %vm2241_vm10, %v2258_v12, 0.0  ;;  %v2285_v39 = vsel %vm2245_vm12, %v2274_v56, 0.0  ;;  %v2289_v19 = vadd.f32 %v2288_v34, %v2287_v50  ;;  %v1932_v11 = vadd.f32 %v1931_v20, %v1930_v5 }
 0x53f   : > { %v2301_v23 = vsel %vm1332_vm2, %v2281_v43, 0.0  ;;  %1280 = vbcast.lane.b32.xlu1 %v5903_v55, 256  ;;  %1308 = vbcast.lane.b32.xlu0 %v5912_v47, 256  ;;  %v2329_v40 = vsel %vm1332_vm2, %v2285_v39, 0.0  ;;  %v1914_v39 = vrot.slane %v1913_v46, 1  ;;  %v1529_v2 = vadd.f32 %v1528_v33, %v1527_v63 }
 0x540   : > { %v2302_v26 = vrot.slane %v2301_v23, 4  ;;  %v2330_v10 = vrot.slane %v2329_v40, 4  ;;  %v2587_v3 = vrot.slane %v2586_v15, 1  ;;  %v1578_v34 = vadd.f32 %v1577_v6, %v1576_v41 }
 0x541   : > { %v1495_v12 = vpop.permute.xlu1 %1494  ;;  %v2546_v43 = vpop.permute.xlu0 %2545  ;;  %v2290_v1 = vrot.slane %v2289_v19, 2  ;;  %vm1459_vm8 = vcmp.eq.s32.totalorder %v5458_v14, %v5855_v21  ;;  %vm2532_vm9 = vcmp.eq.s32.totalorder %v5720_v38, %v5855_v21  ;;  %vm1839_vm10 = vcmp.eq.s32.totalorder %v5689_v54, %v5855_v21 }
 0x542   : > { %v1521_v42 = vsel %vm1457_vm13, %v1495_v12, 0.0  ;;  %v2303_v62 = vadd.f32 %v2302_v26, %v2301_v23  ;;  %v2569_v7 = vsel %vm2529_vm14, %v2546_v43, 0.0  ;;  %v2331_v13 = vadd.f32 %v2330_v10, %v2329_v40 }
 0x543   : > { %v1553_v56 = vsel %vm1332_vm2, %v1521_v42, 0.0  ;;  %2109 = vbcast.lane.b32.xlu1 %v5903_v55, 260  ;;  %1679 = vbcast.lane.b32.xlu0 %v5924_v53, 256  ;;  %v2589_v50 = vsel %vm1332_vm2, %v2569_v7, 0.0  ;;  %v1933_v26 = vrot.slane %v1932_v11, 2  ;;  %v6035_v40 = vadd.f32 %v1914_v39, %v1913_v46 }
 0x544   : > { %v1554_v44 = vrot.slane %v1553_v56, 4  ;;  %v2590_v23 = vrot.slane %v2589_v50, 4  ;;  %v2304_v30 = vrot.slane %v2303_v62, 2  ;;  %v1530_v10 = vrot.slane %v1529_v2, 1 }
 0x545   : > { %v2262_v5 = vpop.permute.xlu1 %2261  ;;  %v1879_v48 = vpop.permute.xlu0 %1878  ;;  %v2332_v58 = vrot.slane %v2331_v13, 2  ;;  %v6041_v42 = vadd.f32 %v2587_v3, %v2586_v15  ;;  %v2291_v39 = vadd.f32 %v2290_v1, %v2289_v19  ;;  %v1934_v7 = vadd.f32 %v1933_v26, %v1932_v11 }
 0x546   : > { %v1555_v20 = vadd.f32 %v1554_v44, %v1553_v56  ;;  %v2282_v52 = vsel %vm2242_vm15, %v2262_v5, 0.0  ;;  %v1905_v63 = vsel %vm1841_vm3, %v1879_v48, 0.0  ;;  %v2591_v41 = vadd.f32 %v2590_v23, %v2589_v50 }
 0x547   : > { %1665 = vbcast.lane.b32.xlu1 %v5921_v36, 256  ;;  %1693 = vbcast.lane.b32.xlu0 %v5930_v57, 256  ;;  %v2308_v33 = vsel %vm1332_vm2, %v2282_v52, 0.0  ;;  %v1937_v43 = vsel %vm1332_vm2, %v1905_v63, 0.0  ;;  %v1579_v56 = vrot.slane %v1578_v34, 1  ;;  %v2305_v15 = vadd.f32 %v2304_v30, %v2303_v62 }
 0x548   : > { %v2309_v12 = vrot.slane %v2308_v33, 4  ;;  %v1556_v44 = vrot.slane %v1555_v20, 2  ;;  %v1938_v46 = vrot.slane %v1937_v43, 4  ;;  %v2592_v48 = vrot.slane %v2591_v41, 2 }
 0x549   : > { %v1858_v29 = vpop.permute.xlu1 %1857  ;;  %v2278_v6 = vpop.permute.xlu0 %2277  ;;  %v6054_v11 = vadd.f32 %v1530_v10, %v1529_v2  ;;  %v2333_v60 = vadd.f32 %v2332_v58, %v2331_v13  ;;  %v6059_v52 = vadd.f32 %v1579_v56, %v1578_v34  ;;  %v2292_v30 = vrot.slane %v2291_v39, 1 }
 0x54a   : > { %v1902_v50 = vsel %vm1838_vm5, %v1858_v29, 0.0  ;;  %v2286_v5 = vsel %vm2246_vm4, %v2278_v6, 0.0  ;;  %v2310_v3 = vadd.f32 %v2309_v12, %v2308_v33  ;;  %v1939_v23 = vadd.f32 %v1938_v46, %v1937_v43 }
 0x54b   : > { %2113 = vbcast.lane.b32.xlu1 %v5880_v49, 260  ;;  %2129 = vbcast.lane.b32.xlu0 %v5916_v61, 260  ;;  %v1916_v19 = vsel %vm1332_vm2, %v1902_v50, 0.0  ;;  %v2336_v1 = vsel %vm1332_vm2, %v2286_v5, 0.0  ;;  %7689 = vst [vmem:[#allocation118_spill] sm:$0xff] %v6059_v52  ;;  %v1557_v63 = vadd.f32 %v1556_v44, %v1555_v20  ;;  %v1935_v33 = vrot.slane %v1934_v7, 1 }
 0x54c   : > { %v1917_v29 = vrot.slane %v1916_v19, 4  ;;  %v2337_v62 = vrot.slane %v2336_v1, 4  ;;  %vm2534_vm11 = vcmp.eq.s32.totalorder %v5736_v27, %v5855_v21  ;;  %v2306_v34 = vrot.slane %v2305_v15, 1  ;;  %v7695_v27 = vld [vmem:[#allocation41_spill] sm:$0xff] }
 0x54d   : > { %v2266_v28 = vpop.permute.xlu1 %2265  ;;  %v2550_v26 = vpop.permute.xlu0 %2549  ;;  %v2593_v20 = vadd.f32 %v2592_v48, %v2591_v41  ;;  %v2311_v10 = vrot.slane %v2310_v3, 2  ;;  %vm2244_vm13 = vcmp.eq.s32.totalorder %v5469_v24, %v5855_v21  ;;  %v2334_v8 = vrot.slane %v2333_v60, 1 }
 0x54e   : > { %v2283_v2 = vsel %vm2243_vm6, %v2266_v28, 0.0  ;;  %v2570_v13 = vsel %vm2530_vm7, %v2550_v26, 0.0  ;;  %v1940_v12 = vrot.slane %v1939_v23, 2  ;;  %v1558_v44 = vrot.slane %v1557_v63, 1 }
 0x54f   : > { %1301 = vbcast.lane.b32.xlu1 %v5934_v9, 256  ;;  %2409 = vbcast.lane.b32.xlu0 %v5940_v17, 260  ;;  %v2315_v58 = vsel %vm1332_vm2, %v2283_v2, 0.0  ;;  %v2596_v0 = vsel %vm1332_vm2, %v2570_v13, 0.0  ;;  %v1918_v46 = vadd.f32 %v1917_v29, %v1916_v19  ;;  %v2338_v50 = vadd.f32 %v2337_v62, %v2336_v1 }
 0x550   : > { %v2316_v43 = vrot.slane %v2315_v58, 4  ;;  %vm2920_vm12 = vcmp.eq.s32.totalorder %v5525_v59, %v5855_v21  ;;  %v6080_v5 = vadd.f32 %v2292_v30, %v2291_v39  ;;  %v6082_v48 = vadd.f32 %v1935_v33, %v1934_v7 }
 0x551   : > { %v1509_v6 = vpop.permute.xlu1 %1508  ;;  %v2558_v56 = vpop.permute.xlu0 %2557  ;;  %v2597_v28 = vrot.slane %v2596_v0, 4  ;;  %v2594_v19 = vrot.slane %v2593_v20, 1  ;;  %v2312_v1 = vadd.f32 %v2311_v10, %v2310_v3  ;;  %vm2921_vm14 = vcmp.eq.s32.totalorder %v5530_v45, %v5855_v21 }
 0x552   : > { %v1523_v41 = vsel %vm1459_vm8, %v1509_v6, 0.0  ;;  %v2317_v29 = vadd.f32 %v2316_v43, %v2315_v58  ;;  %vm2527_vm15 = vcmp.eq.s32.totalorder %v5647_v25, %v5855_v21  ;;  %v6091_v14 = vadd.f32 %v2306_v34, %v2305_v15 }
 0x553   : > { %v1567_v26 = vsel %vm1332_vm2, %v1523_v41, 0.0  ;;  %1672 = vbcast.lane.b32.xlu1 %v5943_v16, 256  ;;  %1700 = vbcast.lane.b32.xlu0 %v5946_v18, 256  ;;  %v6093_v39 = vadd.f32 %v2334_v8, %v2333_v60  ;;  %v6095_v7 = vadd.f32 %v1940_v12, %v1939_v23  ;;  %v2572_v30 = vsel %vm2532_vm9, %v2558_v56, 0.0 }
 0x554   : > { %v1568_v62 = vrot.slane %v1567_v26, 4  ;;  %7690 = vst [vmem:[#allocation119_spill] sm:$0xff] %v6091_v14  ;;  %v6100_v2 = vadd.f32 %v1558_v44, %v1557_v63  ;;  %v1919_v13 = vrot.slane %v1918_v46, 2  ;;  %v2339_v10 = vrot.slane %v2338_v50, 2 }
 0x555   : > { %7691 = vst [vmem:[#allocation120_spill] sm:$0xff] %v6093_v39  ;;  %v1865_v33 = vpop.permute.xlu1 %1864  ;;  %v2566_v3 = vpop.permute.xlu0 %2565  ;;  %v2610_v58 = vsel %vm1332_vm2, %v2572_v30, 0.0  ;;  %v2598_v43 = vadd.f32 %v2597_v28, %v2596_v0  ;;  %v6108_v38 = vadd.f32 %v2594_v19, %v2593_v20  ;;  %v2313_v23 = vrot.slane %v2312_v1, 1 }
 0x556   : > { %7692 = vst [vmem:[#allocation121_spill] sm:$0xff] %v6100_v2  ;;  %v1569_v6 = vadd.f32 %v1568_v62, %v1567_v26  ;;  %v2611_v15 = vrot.slane %v2610_v58, 4  ;;  %v1903_v60 = vsel %vm1839_vm10, %v1865_v33, 0.0  ;;  %v2318_v63 = vrot.slane %v2317_v29, 2 }
 0x557   : > { %2117 = vbcast.lane.b32.xlu1 %v5898_v37, 260  ;;  %2413 = vbcast.lane.b32.xlu0 %v5930_v57, 260  ;;  %7693 = vst [vmem:[#allocation122_spill] sm:$0xff] %v6108_v38  ;;  %v1923_v34 = vsel %vm1332_vm2, %v1903_v60, 0.0  ;;  %vm1842_vm3 = vcmp.eq.s32.totalorder %v5749_v35, %v5855_v21  ;;  %v1942_v8 = vrot.slane %v6095_v7, 1  ;;  %v2574_v54 = vsel %vm2534_vm11, %v2566_v3, 0.0 }
 0x558   : > { %v2612_v12 = vadd.f32 %v2611_v15, %v2610_v58  ;;  %v1924_v0 = vrot.slane %v1923_v34, 4  ;;  %v1920_v41 = vadd.f32 %v1919_v13, %v1918_v46  ;;  %v2340_v20 = vadd.f32 %v2339_v10, %v2338_v50  ;;  %v7694_v58 = vld [vmem:[#allocation115_spill] sm:$0xff] }
 0x559   : > { %v2270_v56 = vpop.permute.xlu1 %2269  ;;  %v2934_v44 = vpop.permute.xlu0 %2933  ;;  %v2624_v28 = vsel %vm1332_vm2, %v2574_v54, 0.0  ;;  %v2599_v19 = vrot.slane %v2598_v43, 2  ;;  %v1570_v62 = vrot.slane %v1569_v6, 2  ;;  %vm3600_vm4 = vcmp.eq.s32.totalorder %v7695_v27, %v5855_v21  ;;  %v7697_v54 = vld [vmem:[#allocation38_spill] sm:$0xff]  ;;  %v7704_v35 = vld [vmem:[#allocation47_spill] sm:$0xff] }
 0x55a   : > { %v2284_v26 = vsel %vm2244_vm13, %v2270_v56, 0.0  ;;  %v1925_v30 = vadd.f32 %v1924_v0, %v1923_v34  ;;  %v2625_v33 = vrot.slane %v2624_v28, 4  ;;  %v6125_v3 = vadd.f32 %v2313_v23, %v2312_v1  ;;  %v7698_v56 = vld [vmem:[#allocation83_spill] sm:$0xff] }
 0x55b   : > { %2393 = vbcast.lane.b32.xlu1 %v5908_v32, 260  ;;  %2421 = vbcast.lane.b32.xlu0 %v7694_v58, 260  ;;  %v2319_v46 = vadd.f32 %v2318_v63, %v2317_v29  ;;  %v2322_v50 = vsel %vm1332_vm2, %v2284_v26, 0.0  ;;  %v2960_v24 = vsel %vm2920_vm12, %v2934_v44, 0.0  ;;  %v2613_v13 = vrot.slane %v2612_v12, 2 }
 0x55c   : > { %7696 = vst [vmem:[#allocation115_spill] sm:$0xff] %v6125_v3  ;;  %v1926_v10 = vrot.slane %v1925_v30, 2  ;;  %v2626_v15 = vadd.f32 %v2625_v33, %v2624_v28  ;;  %v2323_v60 = vrot.slane %v2322_v50, 4  ;;  %vm2922_vm5 = vcmp.eq.s32.totalorder %v7697_v54, %v5855_v21  ;;  %v7699_v33 = vld [vmem:[#allocation111_spill] sm:$0xff] }
 0x55d   : > { %v2538_v34 = vpop.permute.xlu1 %2537  ;;  %v2938_v0 = vpop.permute.xlu0 %2937  ;;  %vm2531_vm6 = vcmp.eq.s32.totalorder %v7698_v56, %v5855_v21  ;;  %v1921_v1 = vrot.slane %v1920_v41, 1  ;;  %v2974_v29 = vsel %vm1332_vm2, %v2960_v24, 0.0  ;;  %v2341_v63 = vrot.slane %v2340_v20, 1 }
 0x55e   : > { %v2567_v59 = vsel %vm2527_vm15, %v2538_v34, 0.0  ;;  %v2961_v23 = vsel %vm2921_vm14, %v2938_v0, 0.0  ;;  %v2600_v44 = vadd.f32 %v2599_v19, %v2598_v43  ;;  %v1571_v28 = vadd.f32 %v1570_v62, %v1569_v6  ;;  %v7700_v43 = vld [vmem:[#allocation72_spill] sm:$0xff] }
 0x55f   : > { %v2627_v26 = vrot.slane %v2626_v15, 2  ;;  %2121 = vbcast.lane.b32.xlu1 %v5934_v9, 260  ;;  %2785 = vbcast.lane.b32.xlu0 %v7699_v33, 264  ;;  %v2324_v52 = vadd.f32 %v2323_v60, %v2322_v50  ;;  %v2975_v38 = vrot.slane %v2974_v29, 4  ;;  %v2575_v24 = vsel %vm1332_vm2, %v2567_v59, 0.0 }
 0x560   : > { %v2981_v3 = vsel %vm1332_vm2, %v2961_v23, 0.0  ;;  %v2320_v25 = vrot.slane %v2319_v46, 1  ;;  %v2614_v34 = vadd.f32 %v2613_v13, %v2612_v12  ;;  %v1927_v2 = vadd.f32 %v1926_v10, %v1925_v30 }
 0x561   : > { %v2628_v39 = vadd.f32 %v2627_v26, %v2626_v15  ;;  %v1886_v45 = vpop.permute.xlu1 %1885  ;;  %v3614_v0 = vpop.permute.xlu0 %3613  ;;  %vm1843_vm7 = vcmp.eq.s32.totalorder %v7700_v43, %v5855_v21  ;;  %v2976_v6 = vadd.f32 %v2975_v38, %v2974_v29  ;;  %v2576_v19 = vrot.slane %v2575_v24, 4  ;;  %v7703_v29 = vld [vmem:[#allocation44_spill] sm:$0xff]  ;;  %v7715_v43 = vld [vmem:[#allocation31_spill] sm:$0xff] }
 0x562   : > { %v2982_v62 = vrot.slane %v2981_v3, 4  ;;  %v1906_v50 = vsel %vm1842_vm3, %v1886_v45, 0.0  ;;  %v6152_v60 = vadd.f32 %v1942_v8, %v6095_v7  ;;  %v6154_v59 = vadd.f32 %v1921_v1, %v1920_v41  ;;  %v7705_v7 = vld [vmem:[#allocation76_spill] sm:$0xff] }
 0x563   : > { %v2601_v12 = vrot.slane %v2600_v44, 1  ;;  %v1944_v30 = vsel %vm1332_vm2, %v1906_v50, 0.0  ;;  %2401 = vbcast.lane.b32.xlu1 %v5943_v16, 260  ;;  %2793 = vbcast.lane.b32.xlu0 %v5880_v49, 264  ;;  %v1572_v13 = vrot.slane %v1571_v28, 1  ;;  %v2325_v38 = vrot.slane %v2324_v52, 2 }
 0x564   : > { %7701 = vst [vmem:[#allocation41_spill] sm:$0xff] %v6152_v60  ;;  %7702 = vst [vmem:[#allocation38_spill] sm:$0xff] %v6154_v59  ;;  %v2577_v10 = vadd.f32 %v2576_v19, %v2575_v24  ;;  %v1945_v15 = vrot.slane %v1944_v30, 4  ;;  %vm2923_vm8 = vcmp.eq.s32.totalorder %v7703_v29, %v5855_v21  ;;  %vm3602_vm9 = vcmp.eq.s32.totalorder %v7704_v35, %v5855_v21 }
 0x565   : > { %vm1844_vm10 = vcmp.eq.s32.totalorder %v7705_v7, %v5855_v21  ;;  %v6165_v8 = vadd.f32 %v2341_v63, %v2340_v20  ;;  %v6167_v41 = vadd.f32 %v2320_v25, %v2319_v46  ;;  %v2615_v1 = vrot.slane %v2614_v34, 1  ;;  %v2554_v26 = vpop.permute.xlu1 %2553  ;;  %v2942_v24 = vpop.permute.xlu0 %2941  ;;  %v7710_v25 = vld [vmem:[#allocation85_spill] sm:$0xff] }
 0x566   : > { %v3640_v23 = vsel %vm3600_vm4, %v3614_v0, 0.0  ;;  %v1928_v45 = vrot.slane %v1927_v2, 1  ;;  %v2629_v19 = vrot.slane %v2628_v39, 1  ;;  %v2977_v50 = vrot.slane %v2976_v6, 2 }
 0x567   : > { %7706 = vst [vmem:[#allocation83_spill] sm:$0xff] %v6165_v8  ;;  %7707 = vst [vmem:[#allocation111_spill] sm:$0xff] %v6167_v41  ;;  %v2983_v60 = vadd.f32 %v2982_v62, %v2981_v3  ;;  %v6172_v14 = vadd.f32 %v2601_v12, %v2600_v44  ;;  %v3654_v59 = vsel %vm1332_vm2, %v3640_v23, 0.0  ;;  %v2571_v20 = vsel %vm2531_vm6, %v2554_v26, 0.0  ;;  %1315 = vbcast.lane.b32.xlu1 %v5916_v61, 256 }
 0x568   : > { %v2962_v46 = vsel %vm2922_vm5, %v2942_v24, 0.0  ;;  %3465 = vbcast.lane.b32.xlu0 %v7699_v33, 268  ;;  %v6183_v27 = vadd.f32 %v1572_v13, %v1571_v28  ;;  %v2326_v63 = vadd.f32 %v2325_v38, %v2324_v52  ;;  %v2578_v3 = vrot.slane %v2577_v10, 2 }
 0x569   : > { %7708 = vst [vmem:[#allocation72_spill] sm:$0xff] %v6172_v14  ;;  %v1946_v44 = vadd.f32 %v1945_v15, %v1944_v30  ;;  %vm2533_vm11 = vcmp.eq.s32.totalorder %v7710_v25, %v5855_v21  ;;  %v6187_v0 = vadd.f32 %v2615_v1, %v2614_v34  ;;  %v3655_v56 = vrot.slane %v3654_v59, 4  ;;  %v1893_v12 = vpop.permute.xlu1 %1892  ;;  %v2946_v23 = vpop.permute.xlu0 %2945  ;;  %v7721_v25 = vld [vmem:[#allocation51_spill] sm:$0xff] }
 0x56a   : > { %7709 = vst [vmem:[#allocation44_spill] sm:$0xff] %v6183_v27  ;;  %v2603_v62 = vsel %vm1332_vm2, %v2571_v20, 0.0  ;;  %v2988_v54 = vsel %vm1332_vm2, %v2962_v46, 0.0  ;;  %v6191_v26 = vadd.f32 %v1928_v45, %v1927_v2  ;;  %v6193_v33 = vadd.f32 %v2629_v19, %v2628_v39  ;;  %v7714_v39 = vld [vmem:[#allocation82_spill] sm:$0xff] }
 0x56b   : > { %7711 = vst [vmem:[#allocation47_spill] sm:$0xff] %v6187_v0  ;;  %v2978_v28 = vadd.f32 %v2977_v50, %v2976_v6  ;;  %v2984_v52 = vrot.slane %v2983_v60, 2  ;;  %v3656_v13 = vadd.f32 %v3655_v56, %v3654_v59  ;;  %v2604_v30 = vrot.slane %v2603_v62, 4  ;;  %1686 = vbcast.lane.b32.xlu1 %v5940_v17, 256 }
 0x56c   : > { %7712 = vst [vmem:[#allocation76_spill] sm:$0xff] %v6191_v26  ;;  %7713 = vst [vmem:[#allocation85_spill] sm:$0xff] %v6193_v33  ;;  %v2989_v38 = vrot.slane %v2988_v54, 4  ;;  %v1907_v34 = vsel %vm1843_vm7, %v1893_v12, 0.0  ;;  %2797 = vbcast.lane.b32.xlu0 %v5898_v37, 264  ;;  %v2327_v15 = vrot.slane %v2326_v63, 1  ;;  %v2579_v1 = vadd.f32 %v2578_v3, %v2577_v10 }
 0x56d   : > { %v1947_v24 = vrot.slane %v1946_v44, 2  ;;  %v1951_v2 = vsel %vm1332_vm2, %v1907_v34, 0.0  ;;  %vm3208_vm13 = vcmp.eq.s32.totalorder %v7714_v39, %v5855_v21  ;;  %v3657_v6 = vrot.slane %v3656_v13, 2  ;;  %v1900_v50 = vpop.permute.xlu1 %1899  ;;  %v3622_v20 = vpop.permute.xlu0 %3621 }
 0x56e   : > { %v2605_v59 = vadd.f32 %v2604_v30, %v2603_v62  ;;  %v2990_v45 = vadd.f32 %v2989_v38, %v2988_v54  ;;  %v1952_v19 = vrot.slane %v1951_v2, 4  ;;  %vm2919_vm12 = vcmp.eq.s32.totalorder %v7715_v43, %v5855_v21  ;;  %v7716_v38 = vld [vmem:[#allocation52_spill] sm:$0xff] }
 0x56f   : > { %v2979_v46 = vrot.slane %v2978_v28, 1  ;;  %v2963_v10 = vsel %vm2923_vm8, %v2946_v23, 0.0  ;;  %v1908_v3 = vsel %vm1844_vm10, %v1900_v50, 0.0  ;;  %v3642_v56 = vsel %vm3602_vm9, %v3622_v20, 0.0  ;;  %2125 = vbcast.lane.b32.xlu1 %v5912_v47, 260 }
 0x570   : > { %v2985_v62 = vadd.f32 %v2984_v52, %v2983_v60  ;;  %v2606_v54 = vrot.slane %v2605_v59, 2  ;;  %v2991_v12 = vrot.slane %v2990_v45, 2  ;;  %v1953_v30 = vadd.f32 %v1952_v19, %v1951_v2  ;;  %3073 = vbcast.lane.b32.xlu0 %v5908_v32, 264  ;;  %v7717_v19 = vld [vmem:[#allocation36_spill] sm:$0xff] }
 0x571   : > { %vm3603_vm14 = vcmp.eq.s32.totalorder %v7716_v38, %v5855_v21  ;;  %v2580_v29 = vrot.slane %v2579_v1, 1  ;;  %v2995_v23 = vsel %vm1332_vm2, %v2963_v10, 0.0  ;;  %v1958_v7 = vsel %vm1332_vm2, %v1908_v3, 0.0  ;;  %v2562_v20 = vpop.permute.xlu1 %2561  ;;  %v3222_v2 = vpop.permute.xlu0 %3221 }
 0x572   : > { %v3668_v34 = vsel %vm1332_vm2, %v3642_v56, 0.0  ;;  %v1948_v35 = vadd.f32 %v1947_v24, %v1946_v44  ;;  %v3658_v50 = vadd.f32 %v3657_v6, %v3656_v13  ;;  %v2607_v60 = vadd.f32 %v2606_v54, %v2605_v59  ;;  %v7720_v56 = vld [vmem:[#allocation43_spill] sm:$0xff] }
 0x573   : > { %v1954_v52 = vrot.slane %v1953_v30, 2  ;;  %vm3599_vm15 = vcmp.eq.s32.totalorder %v7717_v19, %v5855_v21  ;;  %v2996_v33 = vrot.slane %v2995_v23, 4  ;;  %v1959_v8 = vrot.slane %v1958_v7, 4  ;;  %2405 = vbcast.lane.b32.xlu1 %v5924_v53, 260 }
 0x574   : > { %v3669_v14 = vrot.slane %v3668_v34, 4  ;;  %v2573_v10 = vsel %vm2533_vm11, %v2562_v20, 0.0  ;;  %v6226_v0 = vadd.f32 %v2327_v15, %v2326_v63  ;;  %v6228_v3 = vadd.f32 %v2979_v46, %v2978_v28  ;;  %2801 = vbcast.lane.b32.xlu0 %v5934_v9, 264 }
 0x575   : > { %v2992_v44 = vadd.f32 %v2991_v12, %v2990_v45  ;;  %v1955_v13 = vadd.f32 %v1954_v52, %v1953_v30  ;;  %v2997_v24 = vadd.f32 %v2996_v33, %v2995_v23  ;;  %v1960_v6 = vadd.f32 %v1959_v8, %v1958_v7  ;;  %v2930_v46 = vpop.permute.xlu1 %2929  ;;  %v3626_v54 = vpop.permute.xlu0 %3625  ;;  %v7724_v52 = vld [vmem:[#allocation86_spill] sm:$0xff] }
 0x576   : > { %7718 = vst [vmem:[#allocation82_spill] sm:$0xff] %v6226_v0  ;;  %7719 = vst [vmem:[#allocation31_spill] sm:$0xff] %v6228_v3  ;;  %v2617_v59 = vsel %vm1332_vm2, %v2573_v10, 0.0  ;;  %vm3601_vm3 = vcmp.eq.s32.totalorder %v7720_v56, %v5855_v21  ;;  %vm2925_vm4 = vcmp.eq.s32.totalorder %v7721_v25, %v5855_v21  ;;  %v6237_v63 = vadd.f32 %v2580_v29, %v2579_v1  ;;  %v7723_v29 = vld [vmem:[#allocation116_spill] sm:$0xff] }
 0x577   : > { %v2986_v28 = vrot.slane %v2985_v62, 1  ;;  %v1949_v15 = vrot.slane %v1948_v35, 1  ;;  %v2618_v45 = vrot.slane %v2617_v59, 4  ;;  %v3659_v12 = vrot.slane %v3658_v50, 1  ;;  %1322 = vbcast.lane.b32.xlu1 %v7723_v29, 256 }
 0x578   : > { %7722 = vst [vmem:[#allocation52_spill] sm:$0xff] %v6237_v63  ;;  %v2608_v20 = vrot.slane %v2607_v60, 1  ;;  %v3670_v30 = vadd.f32 %v3669_v14, %v3668_v34  ;;  %v3248_v8 = vsel %vm3208_vm13, %v3222_v2, 0.0  ;;  %v2993_v33 = vrot.slane %v2992_v44, 1  ;;  %3081 = vbcast.lane.b32.xlu0 %v5943_v16, 264 }
 0x579   : > { %v2998_v23 = vrot.slane %v2997_v24, 2  ;;  %v3262_v7 = vsel %vm1332_vm2, %v3248_v8, 0.0  ;;  %v2959_v1 = vsel %vm2919_vm12, %v2930_v46, 0.0  ;;  %vm3209_vm5 = vcmp.eq.s32.totalorder %v7724_v52, %v5855_v21  ;;  %v3610_v46 = vpop.permute.xlu1 %3609  ;;  %v2954_v0 = vpop.permute.xlu0 %2953 }
 0x57a   : > { %v1956_v14 = vrot.slane %v1955_v13, 1  ;;  %v1961_v34 = vrot.slane %v1960_v6, 2  ;;  %v2619_v10 = vadd.f32 %v2618_v45, %v2617_v59  ;;  %v3263_v39 = vrot.slane %v3262_v7, 4  ;;  %v7726_v59 = vld [vmem:[#allocation48_spill] sm:$0xff] }
 0x57b   : > { %v6250_v2 = vadd.f32 %v2986_v28, %v2985_v62  ;;  %v6252_v3 = vadd.f32 %v1949_v15, %v1948_v35  ;;  %v2967_v8 = vsel %vm1332_vm2, %v2959_v1, 0.0  ;;  %v3643_v43 = vsel %vm3603_vm14, %v3626_v54, 0.0  ;;  %2133 = vbcast.lane.b32.xlu1 %v7723_v29, 260 }
 0x57c   : > { %v6258_v27 = vadd.f32 %v3659_v12, %v3658_v50  ;;  %v6260_v41 = vadd.f32 %v2608_v20, %v2607_v60  ;;  %v3671_v63 = vrot.slane %v3670_v30, 2  ;;  %v3264_v26 = vadd.f32 %v3263_v39, %v3262_v7  ;;  %3477 = vbcast.lane.b32.xlu0 %v5898_v37, 268  ;;  %v7727_v50 = vld [vmem:[#allocation56_spill] sm:$0xff] }
 0x57d   : > { %vm2924_vm6 = vcmp.eq.s32.totalorder %v7726_v59, %v5855_v21  ;;  %v2999_v62 = vadd.f32 %v2998_v23, %v2997_v24  ;;  %v2968_v35 = vrot.slane %v2967_v8, 4  ;;  %v3675_v28 = vsel %vm1332_vm2, %v3643_v43, 0.0  ;;  %v3618_v19 = vpop.permute.xlu1 %3617  ;;  %v3226_v7 = vpop.permute.xlu0 %3225 }
 0x57e   : > { %7725 = vst [vmem:[#allocation36_spill] sm:$0xff] %v6258_v27  ;;  %v3639_v38 = vsel %vm3599_vm15, %v3610_v46, 0.0  ;;  %vm3604_vm7 = vcmp.eq.s32.totalorder %v7727_v50, %v5855_v21  ;;  %v6272_v60 = vadd.f32 %v2993_v33, %v2992_v44  ;;  %v6274_v15 = vadd.f32 %v1956_v14, %v1955_v13  ;;  %v7728_v13 = vld [vmem:[#allocation95_spill] sm:$0xff]  ;;  %v7735_v50 = vld [vmem:[#allocation60_spill] sm:$0xff] }
 0x57f   : > { %v1962_v45 = vadd.f32 %v1961_v34, %v1960_v6  ;;  %v2620_v24 = vrot.slane %v2619_v10, 2  ;;  %v3265_v54 = vrot.slane %v3264_v26, 2  ;;  %v2969_v12 = vadd.f32 %v2968_v35, %v2967_v8  ;;  %1707 = vbcast.lane.b32.xlu1 %v7694_v58, 256 }
 0x580   : > { %v3676_v20 = vrot.slane %v3675_v28, 4  ;;  %v3647_v23 = vsel %vm1332_vm2, %v3639_v38, 0.0  ;;  %v3672_v1 = vadd.f32 %v3671_v63, %v3670_v30  ;;  %v2965_v37 = vsel %vm2925_vm4, %v2954_v0, 0.0  ;;  %3753 = vbcast.lane.b32.xlu0 %v5908_v32, 268  ;;  %v7729_v38 = vld [vmem:[#allocation101_spill] sm:$0xff] }
 0x581   : > { %v3648_v39 = vrot.slane %v3647_v23, 4  ;;  %v3641_v44 = vsel %vm3601_vm3, %v3618_v19, 0.0  ;;  %vm3207_vm8 = vcmp.eq.s32.totalorder %v7728_v13, %v5855_v21  ;;  %v3000_v6 = vrot.slane %v2999_v62, 1  ;;  %v2950_v35 = vpop.permute.xlu1 %2949 }
 0x582   : > { %v2970_v33 = vrot.slane %v2969_v12, 2  ;;  %v3677_v14 = vadd.f32 %v3676_v20, %v3675_v28  ;;  %v3009_v34 = vsel %vm1332_vm2, %v2965_v37, 0.0  ;;  %v2621_v63 = vadd.f32 %v2620_v24, %v2619_v10  ;;  %v3630_v28 = vpop.permute.xlu0 %3629 }
 0x583   : > { %v3649_v30 = vadd.f32 %v3648_v39, %v3647_v23  ;;  %v3010_v25 = vrot.slane %v3009_v34, 4  ;;  %v3661_v0 = vsel %vm1332_vm2, %v3641_v44, 0.0  ;;  %v1963_v8 = vrot.slane %v1962_v45, 1  ;;  %2417 = vbcast.lane.b32.xlu1 %v5946_v18, 260  ;;  %v7732_v44 = vld [vmem:[#allocation92_spill] sm:$0xff] }
 0x584   : > { %v3266_v56 = vadd.f32 %v3265_v54, %v3264_v26  ;;  %v3662_v43 = vrot.slane %v3661_v0, 4  ;;  %v3249_v46 = vsel %vm3209_vm5, %v3226_v7, 0.0  ;;  %vm3887_vm9 = vcmp.eq.s32.totalorder %v7729_v38, %v5855_v21  ;;  %3481 = vbcast.lane.b32.xlu0 %v5934_v9, 268  ;;  %v7730_v26 = vld [vmem:[#allocation88_spill] sm:$0xff] }
 0x585   : > { %v3673_v20 = vrot.slane %v3672_v1, 1  ;;  %v2971_v19 = vadd.f32 %v2970_v33, %v2969_v12  ;;  %v3011_v32 = vadd.f32 %v3010_v25, %v3009_v34  ;;  %v3269_v10 = vsel %vm1332_vm2, %v3249_v46, 0.0 }
 0x586   : > { %v3678_v24 = vrot.slane %v3677_v14, 2  ;;  %v3650_v23 = vrot.slane %v3649_v30, 2  ;;  %v3663_v39 = vadd.f32 %v3662_v43, %v3661_v0  ;;  %v3270_v37 = vrot.slane %v3269_v10, 4  ;;  %v3218_v0 = vpop.permute.xlu1 %3217  ;;  %v3898_v43 = vpop.permute.xlu0 %3897 }
 0x587   : > { %vm3888_vm10 = vcmp.eq.s32.totalorder %v7730_v26, %v5855_v21  ;;  %v6299_v52 = vadd.f32 %v3000_v6, %v2999_v62  ;;  %v2622_v54 = vrot.slane %v2621_v63, 1  ;;  %v2964_v12 = vsel %vm2924_vm6, %v2950_v35, 0.0  ;;  %v7736_v35 = vld [vmem:[#allocation55_spill] sm:$0xff]  ;;  %2789 = vbcast.lane.b32.xlu1 %v5903_v55, 264 }
 0x588   : > { %v3644_v7 = vsel %vm3604_vm7, %v3630_v28, 0.0  ;;  %vm3211_vm11 = vcmp.eq.s32.totalorder %v7732_v44, %v5855_v21  ;;  %v3267_v33 = vrot.slane %v3266_v56, 1  ;;  %v3012_v34 = vrot.slane %v3011_v32, 2  ;;  %3761 = vbcast.lane.b32.xlu0 %v5943_v16, 268 }
 0x589   : > { %7731 = vst [vmem:[#allocation43_spill] sm:$0xff] %v6299_v52  ;;  %v3664_v9 = vrot.slane %v3663_v39, 2  ;;  %v3271_v25 = vadd.f32 %v3270_v37, %v3269_v10  ;;  %v6309_v62 = vadd.f32 %v1963_v8, %v1962_v45  ;;  %v6311_v6 = vadd.f32 %v3673_v20, %v3672_v1 }
 0x58a   : > { %v3002_v59 = vsel %vm1332_vm2, %v2964_v12, 0.0  ;;  %v3682_v46 = vsel %vm1332_vm2, %v3644_v7, 0.0  ;;  %vm2926_vm13 = vcmp.eq.s32.totalorder %v7735_v50, %v5855_v21  ;;  %vm3606_vm12 = vcmp.eq.s32.totalorder %v7736_v35, %v5855_v21 }
 0x58b   : > { %7733 = vst [vmem:[#allocation51_spill] sm:$0xff] %v6309_v62  ;;  %7734 = vst [vmem:[#allocation116_spill] sm:$0xff] %v6311_v6  ;;  %v2972_v28 = vrot.slane %v2971_v19, 1  ;;  %v3679_v27 = vadd.f32 %v3678_v24, %v3677_v14  ;;  %v3651_v52 = vadd.f32 %v3650_v23, %v3649_v30  ;;  %v3003_v10 = vrot.slane %v3002_v59, 4  ;;  %v3902_v30 = vpop.permute.xlu1 %3901  ;;  %v3234_v24 = vpop.permute.xlu0 %3233  ;;  %3469 = vbcast.lane.b32.xlu1 %v5903_v55, 268  ;;  %v7739_v55 = vld [vmem:[#allocation96_spill] sm:$0xff] }
 0x58c   : > { %v6321_v45 = vadd.f32 %v2622_v54, %v2621_v63  ;;  %v3272_v1 = vrot.slane %v3271_v25, 2  ;;  %v3683_v8 = vrot.slane %v3682_v46, 4  ;;  %v3247_v20 = vsel %vm3207_vm8, %v3218_v0, 0.0  ;;  %v7738_v63 = vld [vmem:[#allocation105_spill] sm:$0xff]  ;;  %2809 = vbcast.lane.b32.xlu0 %v5916_v61, 264 }
 0x58d   : > { %v6326_v37 = vadd.f32 %v3267_v33, %v3266_v56  ;;  %v3013_v12 = vadd.f32 %v3012_v34, %v3011_v32  ;;  %v3665_v7 = vadd.f32 %v3664_v9, %v3663_v39  ;;  %v3255_v14 = vsel %vm1332_vm2, %v3247_v20, 0.0 }
 0x58e   : > { %v3004_v23 = vadd.f32 %v3003_v10, %v3002_v59  ;;  %v3684_v62 = vadd.f32 %v3683_v8, %v3682_v46  ;;  %v3256_v6 = vrot.slane %v3255_v14, 4  ;;  %v3927_v16 = vsel %vm3887_vm9, %v3898_v43, 0.0 }
 0x58f   : > { %7737 = vst [vmem:[#allocation86_spill] sm:$0xff] %v6326_v37  ;;  %vm3210_vm14 = vcmp.eq.s32.totalorder %v7738_v63, %v5855_v21  ;;  %v6334_v13 = vadd.f32 %v2972_v28, %v2971_v19  ;;  %v3680_v56 = vrot.slane %v3679_v27, 1  ;;  %v3652_v54 = vrot.slane %v3651_v52, 1  ;;  %v2958_v59 = vpop.permute.xlu1 %2957  ;;  %v3638_v46 = vpop.permute.xlu0 %3637  ;;  %3077 = vbcast.lane.b32.xlu1 %v5921_v36, 264 }
 0x590   : > { %v3935_v32 = vsel %vm1332_vm2, %v3927_v16, 0.0  ;;  %v3273_v39 = vadd.f32 %v3272_v1, %v3271_v25  ;;  %v3257_v33 = vadd.f32 %v3256_v6, %v3255_v14  ;;  %v3928_v38 = vsel %vm3888_vm10, %v3902_v30, 0.0  ;;  %v7740_v25 = vld [vmem:[#allocation63_spill] sm:$0xff]  ;;  %3089 = vbcast.lane.b32.xlu0 %v5940_v17, 264  ;;  %v7742_v14 = vld [vmem:[#allocation102_spill] sm:$0xff] }
 0x591   : > { %v3936_v34 = vrot.slane %v3935_v32, 4  ;;  %v3014_v9 = vrot.slane %v3013_v12, 1  ;;  %v3666_v0 = vrot.slane %v3665_v7, 1  ;;  %v3942_v19 = vsel %vm1332_vm2, %v3928_v38, 0.0 }
 0x592   : > { %v3251_v43 = vsel %vm3211_vm11, %v3234_v24, 0.0  ;;  %vm3890_vm15 = vcmp.eq.s32.totalorder %v7739_v55, %v5855_v21  ;;  %vm3605_vm3 = vcmp.eq.s32.totalorder %v7740_v25, %v5855_v21  ;;  %v3005_v6 = vrot.slane %v3004_v23, 2 }
 0x593   : > { %v3685_v28 = vrot.slane %v3684_v62, 2  ;;  %v3937_v26 = vadd.f32 %v3936_v34, %v3935_v32  ;;  %v3943_v10 = vrot.slane %v3942_v19, 4  ;;  %v6350_v1 = vadd.f32 %v3680_v56, %v3679_v27  ;;  %v3230_v34 = vpop.permute.xlu1 %3229  ;;  %v3910_v38 = vpop.permute.xlu0 %3909  ;;  %3473 = vbcast.lane.b32.xlu1 %v5880_v49, 268 }
 0x594   : > { %v3283_v8 = vsel %vm1332_vm2, %v3251_v43, 0.0  ;;  %v2966_v44 = vsel %vm2926_vm13, %v2958_v59, 0.0  ;;  %v3646_v20 = vsel %vm3606_vm12, %v3638_v46, 0.0  ;;  %vm3892_vm4 = vcmp.eq.s32.totalorder %v7742_v14, %v5855_v21  ;;  %v7744_v43 = vld [vmem:[#allocation108_spill] sm:$0xff]  ;;  %3485 = vbcast.lane.b32.xlu0 %v5912_v47, 268  ;;  %v7749_v14 = vld [vmem:[#allocation113_spill] sm:$0xff] }
 0x595   : > { %7741 = vst [vmem:[#allocation48_spill] sm:$0xff] %v6350_v1  ;;  %v6363_v30 = vadd.f32 %v3652_v54, %v3651_v52  ;;  %v3274_v27 = vrot.slane %v3273_v39, 1  ;;  %v3258_v24 = vrot.slane %v3257_v33, 2  ;;  %v3944_v16 = vadd.f32 %v3943_v10, %v3942_v19 }
 0x596   : > { %v6365_v56 = vadd.f32 %v3014_v9, %v3013_v12  ;;  %v3284_v50 = vrot.slane %v3283_v8, 4  ;;  %v3016_v32 = vsel %vm1332_vm2, %v2966_v44, 0.0  ;;  %v3696_v35 = vsel %vm1332_vm2, %v3646_v20, 0.0  ;;  %v7746_v20 = vld [vmem:[#allocation16_spill] sm:$0xff] }
 0x597   : > { %vm3889_vm5 = vcmp.eq.s32.totalorder %v7744_v43, %v5855_v21  ;;  %v6371_v59 = vadd.f32 %v3666_v0, %v3665_v7  ;;  %v3006_v46 = vadd.f32 %v3005_v6, %v3004_v23  ;;  %v3686_v52 = vadd.f32 %v3685_v28, %v3684_v62  ;;  %v3634_v28 = vpop.permute.xlu1 %3633  ;;  %3757 = vbcast.lane.b32.xlu1 %v5921_v36, 268 }
 0x598   : > { %7743 = vst [vmem:[#allocation56_spill] sm:$0xff] %v6365_v56  ;;  %v3938_v54 = vrot.slane %v3937_v26, 2  ;;  %v3285_v37 = vadd.f32 %v3284_v50, %v3283_v8  ;;  %v3017_v1 = vrot.slane %v3016_v32, 4  ;;  %v3697_v19 = vrot.slane %v3696_v35, 4  ;;  %v3918_v8 = vpop.permute.xlu0 %3917  ;;  %3765 = vbcast.lane.b32.xlu0 %v5924_v53, 268 }
 0x599   : > { %7745 = vst [vmem:[#allocation95_spill] sm:$0xff] %v6371_v59  ;;  %v3250_v12 = vsel %vm3210_vm14, %v3230_v34, 0.0  ;;  %v6378_v9 = vadd.f32 %v3274_v27, %v3273_v39  ;;  %v3259_v10 = vadd.f32 %v3258_v24, %v3257_v33  ;;  %v3945_v44 = vrot.slane %v3944_v16, 2  ;;  %v7747_v33 = vld [vmem:[#allocation110_spill] sm:$0xff] }
 0x59a   : > { %v3276_v7 = vsel %vm1332_vm2, %v3250_v12, 0.0  ;;  %v3286_v23 = vrot.slane %v3285_v37, 2  ;;  %v3018_v62 = vadd.f32 %v3017_v1, %v3016_v32  ;;  %v3698_v0 = vadd.f32 %v3697_v19, %v3696_v35 }
 0x59b   : > { %v3277_v6 = vrot.slane %v3276_v7, 4  ;;  %vm1260_vm6 = vcmp.eq.s32.totalorder %v7746_v20, %v5855_v21  ;;  %v3007_v63 = vrot.slane %v3006_v46, 1  ;;  %v3687_v50 = vrot.slane %v3686_v52, 1  ;;  %2805 = vbcast.lane.b32.xlu1 %v5912_v47, 264 }
 0x59c   : > { %v3930_v49 = vsel %vm3890_vm15, %v3910_v38, 0.0  ;;  %v3645_v39 = vsel %vm3605_vm3, %v3634_v28, 0.0  ;;  %vm3212_vm7 = vcmp.eq.s32.totalorder %v7747_v33, %v5855_v21  ;;  %v3939_v1 = vadd.f32 %v3938_v54, %v3937_v26  ;;  %v7748_v38 = vld [vmem:[#allocation17_spill] sm:$0xff]  ;;  %v1274_v36 = vpop.permute.xlu0 %1273  ;;  %2813 = vbcast.lane.b32.xlu0 %v7723_v29, 264 }
 0x59d   : > { %v3019_v27 = vrot.slane %v3018_v62, 2  ;;  %v3699_v24 = vrot.slane %v3698_v0, 2  ;;  %v3278_v32 = vadd.f32 %v3277_v6, %v3276_v7  ;;  %v3260_v35 = vrot.slane %v3259_v10, 1  ;;  %v3906_v7 = vpop.permute.xlu1 %3905 }
 0x59e   : > { %v3956_v34 = vsel %vm1332_vm2, %v3930_v49, 0.0  ;;  %v3689_v55 = vsel %vm1332_vm2, %v3645_v39, 0.0  ;;  %v3932_v25 = vsel %vm3892_vm4, %v3918_v8, 0.0  ;;  %vm1262_vm8 = vcmp.eq.s32.totalorder %v7748_v38, %v5855_v21 }
 0x59f   : > { %v3946_v26 = vadd.f32 %v3945_v44, %v3944_v16  ;;  %v3287_v54 = vadd.f32 %v3286_v23, %v3285_v37  ;;  %v3020_v19 = vadd.f32 %v3019_v27, %v3018_v62  ;;  %v3279_v12 = vrot.slane %v3278_v32, 2  ;;  %3085 = vbcast.lane.b32.xlu1 %v5924_v53, 264 }
 0x5a0   : > { %v3957_v6 = vrot.slane %v3956_v34, 4  ;;  %v3690_v28 = vrot.slane %v3689_v55, 4  ;;  %v3970_v59 = vsel %vm1332_vm2, %v3932_v25, 0.0  ;;  %v3929_v49 = vsel %vm3889_vm5, %v3906_v7, 0.0  ;;  %3097 = vbcast.lane.b32.xlu0 %v5946_v18, 264 }
 0x5a1   : > { %vm3891_vm9 = vcmp.eq.s32.totalorder %v7749_v14, %v5855_v21  ;;  %v6406_v8 = vadd.f32 %v3007_v63, %v3006_v46  ;;  %v3940_v39 = vrot.slane %v3939_v1, 1  ;;  %v3700_v16 = vadd.f32 %v3699_v24, %v3698_v0  ;;  %v3238_v46 = vpop.permute.xlu1 %3237  ;;  %v1288_v63 = vpop.permute.xlu0 %1287  ;;  %v7752_v0 = vld [vmem:[#allocation19_spill] sm:$0xff] }
 0x5a2   : > { %v3280_v37 = vadd.f32 %v3279_v12, %v3278_v32  ;;  %v3958_v44 = vadd.f32 %v3957_v6, %v3956_v34  ;;  %v3691_v23 = vadd.f32 %v3690_v28, %v3689_v55  ;;  %v3971_v62 = vrot.slane %v3970_v59, 4 }
 0x5a3   : > { %7750 = vst [vmem:[#allocation101_spill] sm:$0xff] %v6406_v8  ;;  %v3949_v27 = vsel %vm1332_vm2, %v3929_v49, 0.0  ;;  %v6411_v25 = vadd.f32 %v3687_v50, %v3686_v52  ;;  %v6413_v43 = vadd.f32 %v3260_v35, %v3259_v10  ;;  %v3947_v7 = vrot.slane %v3946_v26, 1  ;;  %v7753_v35 = vld [vmem:[#allocation98_spill] sm:$0xff]  ;;  %3093 = vbcast.lane.b32.xlu1 %v5930_v57, 264 }
 0x5a4   : > { %v3950_v56 = vrot.slane %v3949_v27, 4  ;;  %vm2095_vm10 = vcmp.eq.s32.totalorder %v7752_v0, %v5855_v21  ;;  %v3288_v24 = vrot.slane %v3287_v54, 1  ;;  %v3021_v47 = vrot.slane %v3020_v19, 1  ;;  %3773 = vbcast.lane.b32.xlu0 %v5930_v57, 268 }
 0x5a5   : > { %7751 = vst [vmem:[#allocation88_spill] sm:$0xff] %v6411_v25  ;;  %v3959_v32 = vrot.slane %v3958_v44, 2  ;;  %v1324_v34 = vsel %vm1260_vm6, %v1274_v36, 0.0  ;;  %v6420_v55 = vadd.f32 %v3940_v39, %v3939_v1  ;;  %v3972_v52 = vadd.f32 %v3971_v62, %v3970_v59  ;;  %v7754_v1 = vld [vmem:[#allocation20_spill] sm:$0xff]  ;;  %v3914_v49 = vpop.permute.xlu1 %3913  ;;  %v2106_v39 = vpop.permute.xlu0 %2105 }
 0x5a6   : > { %v1333_v10 = vsel %vm1332_vm2, %v1324_v34, 0.0  ;;  %v3252_v50 = vsel %vm3212_vm7, %v3238_v46, 0.0  ;;  %vm3213_vm11 = vcmp.eq.s32.totalorder %v7753_v35, %v5855_v21  ;;  %v3701_v12 = vrot.slane %v3700_v16, 1  ;;  %v7757_v25 = vld [vmem:[#allocation104_spill] sm:$0xff]  ;;  %v7763_v35 = vld [vmem:[#allocation15_spill] sm:$0xff] }
 0x5a7   : > { %v3281_v6 = vrot.slane %v3280_v37, 1  ;;  %v3692_v20 = vrot.slane %v3691_v23, 2  ;;  %v1334_v36 = vrot.slane %v1333_v10, 4  ;;  %vm1263_vm13 = vcmp.eq.s32.totalorder %v7754_v1, %v5855_v21  ;;  %3489 = vbcast.lane.b32.xlu1 %v5916_v61, 268 }
 0x5a8   : > { %v6432_v59 = vadd.f32 %v3947_v7, %v3946_v26  ;;  %v3951_v28 = vadd.f32 %v3950_v56, %v3949_v27  ;;  %v3290_v33 = vsel %vm1332_vm2, %v3252_v50, 0.0  ;;  %v1326_v53 = vsel %vm1262_vm8, %v1288_v63, 0.0  ;;  %3781 = vbcast.lane.b32.xlu0 %v7694_v58, 268 }
 0x5a9   : > { %v6438_v62 = vadd.f32 %v3288_v24, %v3287_v54  ;;  %v6440_v46 = vadd.f32 %v3021_v47, %v3020_v19  ;;  %v3960_v34 = vadd.f32 %v3959_v32, %v3958_v44  ;;  %v1335_v8 = vadd.f32 %v1334_v36, %v1333_v10  ;;  %v3242_v10 = vpop.permute.xlu1 %3241  ;;  %v1295_v50 = vpop.permute.xlu0 %1294 }
 0x5aa   : > { %7755 = vst [vmem:[#allocation92_spill] sm:$0xff] %v6432_v59  ;;  %vm3214_vm12 = vcmp.eq.s32.totalorder %v7757_v25, %v5855_v21  ;;  %v3973_v26 = vrot.slane %v3972_v52, 2  ;;  %v3291_v7 = vrot.slane %v3290_v33, 4  ;;  %v1347_v56 = vsel %vm1332_vm2, %v1326_v53, 0.0 }
 0x5ab   : > { %7756 = vst [vmem:[#allocation60_spill] sm:$0xff] %v6440_v46  ;;  %v3931_v38 = vsel %vm3891_vm9, %v3914_v49, 0.0  ;;  %v6450_v54 = vadd.f32 %v3701_v12, %v3700_v16  ;;  %v6452_v19 = vadd.f32 %v3281_v6, %v3280_v37  ;;  %v6454_v44 = vadd.f32 %v3692_v20, %v3691_v23  ;;  %v7760_v16 = vld [vmem:[#allocation65_spill] sm:$0xff]  ;;  %v7761_v37 = vld [vmem:[#allocation114_spill] sm:$0xff]  ;;  %3769 = vbcast.lane.b32.xlu1 %v5940_v17, 268 }
 0x5ac   : > { %v1336_v27 = vrot.slane %v1335_v8, 2  ;;  %v3952_v63 = vrot.slane %v3951_v28, 2  ;;  %v3292_v24 = vadd.f32 %v3291_v7, %v3290_v33  ;;  %v1348_v47 = vrot.slane %v1347_v56, 4  ;;  %v6494_v46 = vld [vmem:[#allocation2 + $0x18] sm:$0xff] }
 0x5ad   : > { %7758 = vst [vmem:[#allocation55_spill] sm:$0xff] %v6450_v54  ;;  %7759 = vst [vmem:[#allocation105_spill] sm:$0xff] %v6452_v19  ;;  %v3963_v32 = vsel %vm1332_vm2, %v3931_v38, 0.0  ;;  %v3961_v14 = vrot.slane %v3960_v34, 1  ;;  %v2135_v57 = vsel %vm2095_vm10, %v2106_v39, 0.0  ;;  %vm1645_vm14 = vcmp.eq.s32.totalorder %v7760_v16, %v5855_v21 }
 0x5ae   : > { %v1337_v36 = vadd.f32 %v1336_v27, %v1335_v8  ;;  %v3964_v53 = vrot.slane %v3963_v32, 4  ;;  %vm3893_vm15 = vcmp.eq.s32.totalorder %v7761_v37, %v5855_v21  ;;  %v3974_v23 = vadd.f32 %v3973_v26, %v3972_v52  ;;  %v3246_v26 = vpop.permute.xlu1 %3245 }
 0x5af   : > { %v3293_v12 = vrot.slane %v3292_v24, 2  ;;  %v1349_v6 = vadd.f32 %v1348_v47, %v1347_v56  ;;  %v2143_v20 = vsel %vm1332_vm2, %v2135_v57, 0.0  ;;  %v3253_v0 = vsel %vm3213_vm11, %v3242_v10, 0.0  ;;  %v1659_v56 = vpop.permute.xlu0 %1658  ;;  %3493 = vbcast.lane.b32.xlu1 %v7723_v29, 268 }
 0x5b0   : > { %v1338_v8 = vrot.slane %v1337_v36, 1  ;;  %v3965_v33 = vadd.f32 %v3964_v53, %v3963_v32  ;;  %v2144_v49 = vrot.slane %v2143_v20, 4  ;;  %v3953_v39 = vadd.f32 %v3952_v63, %v3951_v28  ;;  %v6474_v32 = vld [vmem:[#allocation2 + $0x10] sm:$0xff] }
 0x5b1   : > { %v1350_v7 = vrot.slane %v1349_v6, 2  ;;  %v3297_v38 = vsel %vm1332_vm2, %v3253_v0, 0.0  ;;  %v1327_v52 = vsel %vm1263_vm13, %v1295_v50, 0.0  ;;  %v7762_v53 = vld [vmem:[#allocation68_spill] sm:$0xff]  ;;  %vm1261_vm4 = vcmp.eq.s32.totalorder %v7763_v35, %v5855_v21  ;;  %2683 = vrot.lane.b32.xlu0 %v6474_v32, %s4898_s11 }
 0x5b2   : > { %v1339_v61 = vadd.f32 %v1338_v8, %v1337_v36  ;;  %v3966_v27 = vrot.slane %v3965_v33, 2  ;;  %v2145_v47 = vadd.f32 %v2144_v49, %v2143_v20  ;;  %v3298_v57 = vrot.slane %v3297_v38, 4 }
 0x5b3   : > { %vm2384_vm3 = vcmp.eq.s32.totalorder %v7762_v53, %v5855_v21  ;;  %v3694_v28 = vrot.slane %v6454_v44, 1  ;;  %v1351_v63 = vadd.f32 %v1350_v7, %v1349_v6  ;;  %v1354_v1 = vsel %vm1332_vm2, %v1327_v52, 0.0  ;;  %v3922_v52 = vpop.permute.xlu1 %3921  ;;  %v2398_v54 = vpop.permute.xlu0 %2397  ;;  %3101 = vbcast.lane.b32.xlu1 %v7694_v58, 264 }
 0x5b4   : > { %v3254_v10 = vsel %vm3214_vm12, %v3246_v26, 0.0  ;;  %v6489_v50 = vadd.f32 %v6054_v11, %v1339_v61  ;;  %v3294_v36 = vadd.f32 %v3293_v12, %v3292_v24  ;;  %v2146_v20 = vrot.slane %v2145_v47, 2  ;;  %v7765_v11 = vld [vmem:[#allocation23_spill] sm:$0xff]  ;;  %v7766_v24 = vld [vmem:[#allocation18_spill] sm:$0xff] }
 0x5b5   : > { %v3299_v8 = vadd.f32 %v3298_v57, %v3297_v38  ;;  %v6491_v49 = vadd.f32 %v3961_v14, %v3960_v34  ;;  %v3975_v6 = vrot.slane %v3974_v23, 1  ;;  %v1352_v0 = vrot.slane %v1351_v63, 1  ;;  %2685 = vrot.lane.b32.xlu0 %v6494_v46, %s4898_s11 }
 0x5b6   : > { %v1355_v7 = vrot.slane %v1354_v1, 4  ;;  %v3954_v25 = vrot.slane %v3953_v39, 1  ;;  %v3967_v26 = vadd.f32 %v3966_v27, %v3965_v33  ;;  %v2147_v19 = vadd.f32 %v2146_v20, %v2145_v47 }
 0x5b7   : > { %7764 = vst [vmem:[#allocation96_spill] sm:$0xff] %v6491_v49  ;;  %v3304_v17 = vsel %vm1332_vm2, %v3254_v10, 0.0  ;;  %vm1265_vm5 = vcmp.eq.s32.totalorder %v7765_v11, %v5855_v21  ;;  %vm2096_vm6 = vcmp.eq.s32.totalorder %v7766_v24, %v5855_v21  ;;  %v1353_v34 = vadd.f32 %v1352_v0, %v1351_v63  ;;  %v1281_v37 = vpop.permute.xlu1 %1280  ;;  %3777 = vbcast.lane.b32.xlu1 %v5946_v18, 268 }
 0x5b8   : > { %v1356_v14 = vadd.f32 %v1355_v7, %v1354_v1  ;;  %v1709_v12 = vsel %vm1645_vm14, %v1659_v56, 0.0  ;;  %v3933_v33 = vsel %vm3893_vm15, %v3922_v52, 0.0  ;;  %v6510_v38 = vadd.f32 %v3694_v28, %v6454_v44  ;;  %v1309_v1 = vpop.permute.xlu0 %1308  ;;  %v6518_v7 = vld [vmem:[#allocation2] sm:$0xff] }
 0x5b9   : > { %v3295_v61 = vrot.slane %v3294_v36, 1  ;;  %v2148_v27 = vrot.slane %v2147_v19, 1  ;;  %v3300_v47 = vrot.slane %v3299_v8, 2  ;;  %v6513_v57 = vadd.f32 %v6001_v51, %v1353_v34  ;;  %v7769_v44 = vld [vmem:[#allocation61_spill] sm:$0xff]  ;;  %4039 = vrot.lane.b32.xlu0 %v6518_v7, %s4902_s20 }
 0x5ba   : > { %7767 = vst [vmem:[#allocation63_spill] sm:$0xff] %v6510_v38  ;;  %v1357_v16 = vrot.slane %v1356_v14, 2  ;;  %v3305_v56 = vrot.slane %v3304_v17, 4  ;;  %v1717_v63 = vsel %vm1332_vm2, %v1709_v12, 0.0  ;;  %v6516_v10 = vadd.f32 %v3975_v6, %v3974_v23  ;;  %v7770_v28 = vld [vmem:[#allocation57_spill] sm:$0xff] }
 0x5bb   : > { %v3968_v29 = vrot.slane %v3967_v26, 1  ;;  %v2149_v20 = vadd.f32 %v2148_v27, %v2147_v19  ;;  %v1718_v0 = vrot.slane %v1717_v63, 4  ;;  %vm1648_vm7 = vcmp.eq.s32.totalorder %v7769_v44, %v5855_v21  ;;  %v2110_v12 = vpop.permute.xlu1 %2109 }
 0x5bc   : > { %7768 = vst [vmem:[#allocation102_spill] sm:$0xff] %v6516_v10  ;;  %vm1646_vm8 = vcmp.eq.s32.totalorder %v7770_v28, %v5855_v21  ;;  %v6524_v51 = vadd.f32 %v3954_v25, %v3953_v39  ;;  %v1358_v52 = vadd.f32 %v1357_v16, %v1356_v14  ;;  %v2424_v34 = vsel %vm2384_vm3, %v2398_v54, 0.0  ;;  %v1680_v58 = vpop.permute.xlu0 %1679  ;;  %v7778_v28 = vld [vmem:[#allocation32_spill] sm:$0xff]  ;;  %v7781_v10 = vld [vmem:[#allocation117_spill] sm:$0xff] }
 0x5bd   : > { %v1325_v19 = vsel %vm1261_vm4, %v1281_v37, 0.0  ;;  %v6535_v23 = vadd.f32 %v3295_v61, %v3294_v36  ;;  %v6538_v39 = vadd.f32 %v6080_v5, %v2149_v20  ;;  %v3301_v6 = vadd.f32 %v3300_v47, %v3299_v8  ;;  %v6546_v61 = vld [vmem:[#allocation2 + $0x8] sm:$0xff]  ;;  %v7774_v5 = vld [vmem:[#allocation69_spill] sm:$0xff] }
 0x5be   : > { %7771 = vst [vmem:[#allocation108_spill] sm:$0xff] %v6524_v51  ;;  %v1719_v25 = vadd.f32 %v1718_v0, %v1717_v63  ;;  %v1359_v14 = vrot.slane %v1358_v52, 1  ;;  %v6540_v53 = vadd.f32 %v3305_v56, %v3304_v17  ;;  %v2438_v54 = vsel %vm1332_vm2, %v2424_v34, 0.0  ;;  %4041 = vrot.lane.b32.xlu0 %v6546_v61, %s4902_s20 }
 0x5bf   : > { %7772 = vst [vmem:[#allocation16_spill] sm:$0xff] %v6535_v23  ;;  %v1340_v35 = vsel %vm1332_vm2, %v1325_v19, 0.0  ;;  %v6544_v27 = vadd.f32 %v3968_v29, %v3967_v26  ;;  %v2439_v37 = vrot.slane %v2438_v54, 4  ;;  %vm1650_vm9 = vcmp.eq.s32.totalorder %v7774_v5, %v5855_v21  ;;  %v1666_v24 = vpop.permute.xlu1 %1665 }
 0x5c0   : > { %v1720_v16 = vrot.slane %v1719_v25, 2  ;;  %v1341_v36 = vrot.slane %v1340_v35, 4  ;;  %v1360_v8 = vadd.f32 %v1359_v14, %v1358_v52  ;;  %v3977_v17 = vsel %vm1332_vm2, %v3933_v33, 0.0  ;;  %v1694_v52 = vpop.permute.xlu0 %1693 }
 0x5c1   : > { %7773 = vst [vmem:[#allocation110_spill] sm:$0xff] %v6544_v27  ;;  %v1329_v47 = vsel %vm1265_vm5, %v1309_v1, 0.0  ;;  %v2136_v26 = vsel %vm2096_vm6, %v2110_v12, 0.0  ;;  %v3302_v56 = vrot.slane %v3301_v6, 1  ;;  %v2440_v29 = vadd.f32 %v2439_v37, %v2438_v54  ;;  %v7775_v12 = vld [vmem:[#allocation22_spill] sm:$0xff] }
 0x5c2   : > { %v1721_v63 = vadd.f32 %v1720_v16, %v1719_v25  ;;  %v1342_v20 = vadd.f32 %v1341_v36, %v1340_v35  ;;  %v6561_v0 = vadd.f32 %v6012_v22, %v1360_v8  ;;  %v1368_v11 = vsel %vm1332_vm2, %v1329_v47, 0.0  ;;  %v7776_v16 = vld [vmem:[#allocation80_spill] sm:$0xff]  ;;  %4043 = vrot.lane.b32.xlu0 %v6474_v32, %s4902_s20 }
 0x5c3   : > { %v2150_v1 = vsel %vm1332_vm2, %v2136_v26, 0.0  ;;  %v2441_v18 = vrot.slane %v2440_v29, 2  ;;  %v1369_v14 = vrot.slane %v1368_v11, 4  ;;  %vm2097_vm10 = vcmp.eq.s32.totalorder %v7775_v12, %v5855_v21  ;;  %3925 = vbcast.lane.b32.xlu1 %v7776_v16, 268  ;;  %v7779_v16 = vld [vmem:[#allocation24_spill] sm:$0xff] }
 0x5c4   : > { %v1722_v34 = vrot.slane %v1721_v63, 1  ;;  %v1343_v19 = vrot.slane %v1342_v20, 2  ;;  %v3978_v25 = vrot.slane %v3977_v17, 4  ;;  %v2151_v54 = vrot.slane %v2150_v1, 4 }
 0x5c5   : > { %v1712_v22 = vsel %vm1648_vm7, %v1680_v58, 0.0  ;;  %v1710_v35 = vsel %vm1646_vm8, %v1666_v24, 0.0  ;;  %v2442_v36 = vadd.f32 %v2441_v18, %v2440_v29  ;;  %v1370_v47 = vadd.f32 %v1369_v14, %v1368_v11  ;;  %v2114_v58 = vpop.permute.xlu1 %2113  ;;  %v2130_v24 = vpop.permute.xlu0 %2129  ;;  %v7780_v18 = vld [vmem:[#allocation71_spill] sm:$0xff] }
 0x5c6   : > { %v1723_v37 = vadd.f32 %v1722_v34, %v1721_v63  ;;  %v1344_v8 = vadd.f32 %v1343_v19, %v1342_v20  ;;  %v6577_v26 = vadd.f32 %v3302_v56, %v3301_v6  ;;  %v2152_v33 = vadd.f32 %v2151_v54, %v2150_v1  ;;  %4045 = vrot.lane.b32.xlu0 %v6494_v46, %s4902_s20  ;;  %s4525_s20 = sshll.u32 %s4883_s16, 7  ;;  %s4905_s16 = smov [#allocation4]  }
 0x5c7   : > { %v1738_v27 = vsel %vm1332_vm2, %v1712_v22, 0.0  ;;  %v1724_v44 = vsel %vm1332_vm2, %v1710_v35, 0.0  ;;  %vm2101_vm11 = vcmp.eq.s32.totalorder %v7778_v28, %v5855_v21  ;;  %vm1264_vm13 = vcmp.eq.s32.totalorder %v7779_v16, %v5855_v21  ;;  %3359 = vrot.lane.b32.xlu1 %v6518_v7, %s4900_s27  ;;  %s7393_s24 = scalar_lea.hbm %s7451_s10, %s4525_s20  ;;  %s4817_s28 = sshll.u32 %s4905_s16, 4  ;;  %s4818_s28 = int_to_ptr.vmem [resolvable:$false] %s4817_s28 }
 0x5c8   : > { %7777 = vst [vmem:[#allocation17_spill] sm:$0xff] %v6577_v26  ;;  %v1773_v63 = vadd.f32 %v1723_v37, %v6489_v50  ;;  %v2443_v29 = vrot.slane %v2442_v36, 1  ;;  %v1345_v20 = vrot.slane %v1344_v8, 1  ;;  %v1371_v11 = vrot.slane %v1370_v47, 2 }
 0x5c9   : > { %v2153_v6 = vrot.slane %v2152_v33, 2  ;;  %v1739_v56 = vrot.slane %v1738_v27, 4  ;;  %v1725_v1 = vrot.slane %v1724_v44, 4  ;;  %v1714_v34 = vsel %vm1650_vm9, %v1694_v52, 0.0  ;;  %v1302_v37 = vpop.permute.xlu1 %1301  ;;  %v2410_v7 = vpop.permute.xlu0 %2409 }
 0x5ca   : > { %vm2387_vm12 = vcmp.eq.s32.totalorder %v7780_v18, %v5855_v21  ;;  %v6596_v50 = vadd.f32 %v6035_v40, %v1773_v63  ;;  %v6598_v19 = vadd.f32 %v3978_v25, %v3977_v17  ;;  %v1346_v14 = vadd.f32 %v1345_v20, %v1344_v8  ;;  %v7784_v18 = vld [vmem:[#allocation21_spill] sm:$0xff] }
 0x5cb   : > { %v1372_v54 = vadd.f32 %v1371_v11, %v1370_v47  ;;  %v2154_v22 = vadd.f32 %v2153_v6, %v2152_v33  ;;  %v1740_v35 = vadd.f32 %v1739_v56, %v1738_v27  ;;  %v1726_v5 = vadd.f32 %v1725_v1, %v1724_v44  ;;  %3361 = vrot.lane.b32.xlu1 %v6546_v61, %s4900_s27 }
 0x5cc   : > { %v1752_v52 = vsel %vm1332_vm2, %v1714_v34, 0.0  ;;  %v2444_v38 = vadd.f32 %v2443_v29, %v2442_v36  ;;  %v1582_v23 = vadd.f32 %v7781_v10, %v1346_v14  ;;  %v2137_v17 = vsel %vm2097_vm10, %v2114_v58, 0.0 }
 0x5cd   : > { %v1373_v26 = vrot.slane %v1372_v54, 1  ;;  %v1753_v49 = vrot.slane %v1752_v52, 4  ;;  %v2155_v59 = vrot.slane %v2154_v22, 1  ;;  %v1741_v51 = vrot.slane %v1740_v35, 2  ;;  %v1673_v63 = vpop.permute.xlu1 %1672  ;;  %v6610_v29 = vpop.permute.xlu0 %1700 }
 0x5ce   : > { %v1727_v40 = vrot.slane %v1726_v5, 2  ;;  %v1973_v27 = vpack.c.bf16 %v6596_v50, %v6596_v50  ;;  %v2157_v36 = vsel %vm1332_vm2, %v2137_v17, 0.0  ;;  %v2141_v61 = vsel %vm2101_vm11, %v2130_v24, 0.0  ;;  %v7782_v24 = vld [vmem:[#allocation67_spill] sm:$0xff] }
 0x5cf   : > { %v1374_v33 = vadd.f32 %v1373_v26, %v1372_v54  ;;  %v1754_v25 = vadd.f32 %v1753_v49, %v1752_v52  ;;  %v2156_v10 = vadd.f32 %v2155_v59, %v2154_v22  ;;  %v1742_v8 = vadd.f32 %v1741_v51, %v1740_v35  ;;  %3363 = vrot.lane.b32.xlu1 %v6474_v32, %s4900_s27 }
 0x5d0   : > { %v1728_v47 = vadd.f32 %v1727_v40, %v1726_v5  ;;  %v2158_v44 = vrot.slane %v2157_v36, 4  ;;  %v1328_v49 = vsel %vm1264_vm13, %v1302_v37, 0.0  ;;  %vm2001_vm14 = vcmask 1041409   ;;  %v7783_v5 = vld [vmem:[#allocation73_spill] sm:$0xff] }
 0x5d1   : > { %v1586_v12 = vadd.f32 %v6020_v4, %v1374_v33  ;;  %v1755_v58 = vrot.slane %v1754_v25, 2  ;;  %v2344_v26 = vadd.f32 %v6007_v31, %v2156_v10  ;;  %v1743_v59 = vrot.slane %v1742_v8, 1  ;;  %v2118_v34 = vpop.permute.xlu1 %2117  ;;  %v2414_v14 = vpop.permute.xlu0 %2413 }
 0x5d2   : > { %v1729_v51 = vrot.slane %v1728_v47, 1  ;;  %v2159_v20 = vadd.f32 %v2158_v44, %v2157_v36  ;;  %v2185_v4 = vsel %vm1332_vm2, %v2141_v61, 0.0  ;;  %v1361_v6 = vsel %vm1332_vm2, %v1328_v49, 0.0  ;;  %v7785_v36 = vld [vmem:[#allocation75_spill] sm:$0xff] }
 0x5d3   : > { %v1756_v11 = vadd.f32 %v1755_v58, %v1754_v25  ;;  %v2427_v28 = vsel %vm2387_vm12, %v2410_v7, 0.0  ;;  %vm1647_vm15 = vcmp.eq.s32.totalorder %v7782_v24, %v5855_v21  ;;  %v2488_v31 = vadd.f32 %v2444_v38, %v2344_v26  ;;  %3365 = vrot.lane.b32.xlu1 %v6494_v46, %s4900_s27  ;;  %v7787_v26 = vld [vmem:[#allocation59_spill] sm:$0xff] }
 0x5d4   : > { %v1744_v16 = vadd.f32 %v1743_v59, %v1742_v8  ;;  %v1730_v56 = vadd.f32 %v1729_v51, %v1728_v47  ;;  %v2160_v1 = vrot.slane %v2159_v20, 2  ;;  %v2186_v54 = vrot.slane %v2185_v4, 4  ;;  %v7786_v47 = vld [vmem:[#allocation38_spill] sm:$0xff] }
 0x5d5   : > { %v1757_v32 = vrot.slane %v1756_v11, 1  ;;  %v1362_v22 = vrot.slane %v1361_v6, 4  ;;  %v2459_v35 = vsel %vm1332_vm2, %v2427_v28, 0.0  ;;  %vm1651_vm3 = vcmp.eq.s32.totalorder %v7783_v5, %v5855_v21 }
 0x5d6   : > { %vm2098_vm4 = vcmp.eq.s32.totalorder %v7784_v18, %v5855_v21  ;;  %v2632_v52 = vadd.f32 %v6041_v42, %v2488_v31  ;;  %v1776_v38 = vadd.f32 %v1744_v16, %v6561_v0  ;;  %v1774_v37 = vadd.f32 %v1730_v56, %v1582_v23  ;;  %v2394_v0 = vpop.permute.xlu1 %2393  ;;  %v2422_v23 = vpop.permute.xlu0 %2421 }
 0x5d7   : > { %v2161_v7 = vadd.f32 %v2160_v1, %v2159_v20  ;;  %v1758_v40 = vadd.f32 %v1757_v32, %v1756_v11  ;;  %v2187_v17 = vadd.f32 %v2186_v54, %v2185_v4  ;;  %v1363_v33 = vadd.f32 %v1362_v22, %v1361_v6  ;;  %v7789_v4 = vld [vmem:[#allocation74_spill] sm:$0xff]  ;;  %v7791_v22 = vld [vmem:[#allocation25_spill] sm:$0xff] }
 0x5d8   : > { %v2460_v25 = vrot.slane %v2459_v35, 4  ;;  %vm2388_vm5 = vcmp.eq.s32.totalorder %v7785_v36, %v5855_v21  ;;  %v2640_v10 = vpack.c.bf16 %v2632_v52, %v2632_v52  ;;  %v6641_v8 = vadd.f32 %v6082_v48, %v1776_v38 }
 0x5d9   : > { %v1966_v42 = vadd.f32 %v7786_v47, %v1774_v37  ;;  %v2162_v44 = vrot.slane %v2161_v7, 1  ;;  %v1778_v58 = vadd.f32 %v1758_v40, %v1586_v12  ;;  %v2188_v61 = vrot.slane %v2187_v17, 2 }
 0x5da   : > { %v1364_v49 = vrot.slane %v1363_v33, 2  ;;  %v2461_v46 = vadd.f32 %v2460_v25, %v2459_v35  ;;  %vm2383_vm6 = vcmp.eq.s32.totalorder %v7787_v26, %v5855_v21  ;;  %v7788_v59 = vrot.slane %v6540_v53, 2  ;;  %v2122_v54 = vpop.permute.xlu1 %2121  ;;  %v7792_v25 = vld [vmem:[#allocation30_spill] sm:$0xff] }
 0x5db   : > { %v3980_v48 = vrot.slane %v6598_v19, 2  ;;  %v1974_v20 = vpack.c.bf16 %v1966_v42, %v1966_v42  ;;  %v2163_v11 = vadd.f32 %v2162_v44, %v2161_v7  ;;  %vm2390_vm7 = vcmp.eq.s32.totalorder %v7789_v4, %v5855_v21  ;;  %v7794_v44 = vld [vmem:[#allocation121_spill] sm:$0xff] }
 0x5dc   : > { %v6649_v51 = vadd.f32 %v7788_v59, %v6540_v53  ;;  %v6655_v12 = vadd.f32 %v6252_v3, %v1778_v58  ;;  %v2189_v6 = vadd.f32 %v2188_v61, %v2187_v17  ;;  %v1365_v28 = vadd.f32 %v1364_v49, %v1363_v33  ;;  %v7790_v53 = vld [vmem:[#allocation119_spill] sm:$0xff]  ;;  %v2786_v3 = vpop.permute.xlu0 %2785 }
 0x5dd   : > { %v2462_v31 = vrot.slane %v2461_v46, 2  ;;  %v1993_v16 = vunpack.c.l.b16 %v1973_v27  ;;  %v1994_v56 = vunpack.c.l.b16 %v1974_v20  ;;  %v6661_v1 = vadd.f32 %v7790_v53, %v2163_v11  ;;  %v7795_v53 = vld [vmem:[#allocation64_spill] sm:$0xff] }
 0x5de   : > { %v1711_v32 = vsel %vm1647_vm15, %v1673_v63, 0.0  ;;  %vm2099_vm8 = vcmp.eq.s32.totalorder %v7791_v22, %v5855_v21  ;;  %v6668_v35 = vunpack.c.l.b16 %v2640_v10  ;;  %v2190_v52 = vrot.slane %v2189_v6, 1  ;;  %v6694_v5 = vpop.permute.xlu1 %2401 }
 0x5df   : > { %v1366_v38 = vrot.slane %v1365_v28, 1  ;;  %v6670_v37 = vadd.f32 %v2462_v31, %v2461_v46  ;;  %v6673_v50 = vsel %vm2001_vm14, %v1994_v56, %v1993_v16  ;;  %v1731_v27 = vsel %vm1332_vm2, %v1711_v32, 0.0 }
 0x5e0   : > { %v1715_v63 = vsel %vm1651_vm3, %v6610_v29, 0.0  ;;  %v2138_v24 = vsel %vm2098_vm4, %v2118_v34, 0.0  ;;  %v1976_v7 = vpack.c.bf16 %v6641_v8, %v6641_v8  ;;  %v1978_v40 = vpack.c.bf16 %v6655_v12, %v6655_v12  ;;  %v6696_v18 = vpop.permute.xlu0 %2793  ;;  %v7793_v8 = vld [vmem:[#allocation120_spill] sm:$0xff] }
 0x5e1   : > { %v2191_v17 = vadd.f32 %v2190_v52, %v2189_v6  ;;  %v1367_v33 = vadd.f32 %v1366_v38, %v1365_v28  ;;  %vm2775_vm9 = vcmp.eq.s32.totalorder %v7792_v25, %v5855_v21  ;;  %v1732_v10 = vrot.slane %v1731_v27, 4 }
 0x5e2   : > { %v1759_v47 = vsel %vm1332_vm2, %v1715_v63, 0.0  ;;  %v2164_v29 = vsel %vm1332_vm2, %v2138_v24, 0.0  ;;  %v2428_v34 = vsel %vm2388_vm5, %v2414_v14, 0.0  ;;  %v2464_v61 = vrot.slane %v6670_v37, 1  ;;  %v6716_v32 = vpop.permute.xlu1 %1315 }
 0x5e3   : > { %v6699_v42 = vadd.f32 %v7793_v8, %v2191_v17  ;;  %v6702_v58 = vadd.f32 %v7794_v44, %v1367_v33  ;;  %v1760_v49 = vrot.slane %v1759_v47, 4  ;;  %v1733_v46 = vadd.f32 %v1732_v10, %v1731_v27  ;;  %v7796_v17 = vld [vmem:[#allocation33_spill] sm:$0xff] }
 0x5e4   : > { %v2165_v59 = vrot.slane %v2164_v29, 4  ;;  %v2466_v20 = vsel %vm1332_vm2, %v2428_v34, 0.0  ;;  %v2423_v14 = vsel %vm2383_vm6, %v2394_v0, 0.0  ;;  %v2430_v6 = vsel %vm2390_vm7, %v2422_v23, 0.0  ;;  %v6718_v26 = vpop.permute.xlu0 %3465 }
 0x5e5   : > { %v1761_v36 = vadd.f32 %v1760_v49, %v1759_v47  ;;  %v2467_v11 = vrot.slane %v2466_v20, 4  ;;  %v2431_v12 = vsel %vm1332_vm2, %v2423_v14, 0.0  ;;  %v1734_v28 = vrot.slane %v1733_v46, 2  ;;  %v7798_v49 = vld [vmem:[#allocation34_spill] sm:$0xff] }
 0x5e6   : > { %v2166_v31 = vadd.f32 %v2165_v59, %v2164_v29  ;;  %v2432_v16 = vrot.slane %v2431_v12, 4  ;;  %v2480_v56 = vsel %vm1332_vm2, %v2430_v6, 0.0  ;;  %vm2385_vm10 = vcmp.eq.s32.totalorder %v7795_v53, %v5855_v21 }
 0x5e7   : > { %v1762_v0 = vrot.slane %v1761_v36, 2  ;;  %v2468_v52 = vadd.f32 %v2467_v11, %v2466_v20  ;;  %v2481_v38 = vrot.slane %v2480_v56, 4  ;;  %v2139_v4 = vsel %vm2099_vm8, %v2122_v54, 0.0  ;;  %v7797_v54 = vld [vmem:[#allocation26_spill] sm:$0xff] }
 0x5e8   : > { %v1735_v23 = vadd.f32 %v1734_v28, %v1733_v46  ;;  %v2167_v27 = vrot.slane %v2166_v31, 2  ;;  %v2433_v63 = vadd.f32 %v2432_v16, %v2431_v12  ;;  %v2171_v24 = vsel %vm1332_vm2, %v2139_v4, 0.0  ;;  %v6733_v46 = vpop.permute.xlu1 %1686  ;;  %v6735_v59 = vpop.permute.xlu0 %2797 }
 0x5e9   : > { %vm2777_vm11 = vcmp.eq.s32.totalorder %v7796_v17, %v5855_v21  ;;  %v1763_v33 = vadd.f32 %v1762_v0, %v1761_v36  ;;  %v2469_v10 = vrot.slane %v2468_v52, 2  ;;  %v2482_v47 = vadd.f32 %v2481_v38, %v2480_v56 }
 0x5ea   : > { %v2172_v29 = vrot.slane %v2171_v24, 4  ;;  %v1736_v34 = vrot.slane %v1735_v23, 1  ;;  %v2168_v8 = vadd.f32 %v2167_v27, %v2166_v31  ;;  %v2434_v44 = vrot.slane %v2433_v63, 2 }
 0x5eb   : > { %v2815_v22 = vsel %vm2775_vm9, %v2786_v3, 0.0  ;;  %vm1266_vm13 = vcmp.eq.s32.totalorder %v7797_v54, %v5855_v21  ;;  %vm3455_vm12 = vcmp.eq.s32.totalorder %v7798_v49, %v5855_v21  ;;  %v6737_v20 = vunpack.c.l.b16 %v1976_v7  ;;  %v7805_v54 = vld [vmem:[#allocation27_spill] sm:$0xff] }
 0x5ec   : > { %vm2003_vm15 = vcmask 1042434   ;;  %v1764_v14 = vrot.slane %v1763_v33, 1  ;;  %v6739_v36 = vadd.f32 %v2469_v10, %v2468_v52  ;;  %v2173_v11 = vadd.f32 %v2172_v29, %v2171_v24  ;;  %v6746_v27 = vpop.permute.xlu1 %2125  ;;  %v6748_v52 = vpop.permute.xlu0 %3073  ;;  %v7801_v10 = vld [vmem:[#allocation115_spill] sm:$0xff] }
 0x5ed   : > { %v1737_v12 = vadd.f32 %v1736_v34, %v1735_v23  ;;  %v2169_v25 = vrot.slane %v2168_v8, 1  ;;  %v2435_v3 = vadd.f32 %v2434_v44, %v2433_v63  ;;  %v2823_v6 = vsel %vm1332_vm2, %v2815_v22, 0.0 }
 0x5ee   : > { %v6742_v28 = vunpack.c.l.b16 %v1978_v40  ;;  %v2465_v31 = vadd.f32 %v2464_v61, %v6670_v37  ;;  %v2483_v16 = vrot.slane %v2482_v47, 2  ;;  %v2174_v56 = vrot.slane %v2173_v11, 2  ;;  %v7799_v40 = vld [vmem:[#allocation70_spill] sm:$0xff] }
 0x5ef   : > { %v1775_v0 = vadd.f32 %v1737_v12, %v6513_v57  ;;  %v2170_v7 = vadd.f32 %v2169_v25, %v2168_v8  ;;  %v2436_v38 = vrot.slane %v2435_v3, 1  ;;  %v2824_v4 = vrot.slane %v2823_v6, 4  ;;  %v7800_v57 = vld [vmem:[#allocation76_spill] sm:$0xff] }
 0x5f0   : > { %v6750_v23 = vadd.f32 %v1764_v14, %v1763_v33  ;;  %v2471_v63 = vrot.slane %v6739_v36, 1  ;;  %v2175_v24 = vadd.f32 %v2174_v56, %v2173_v11  ;;  %v2425_v37 = vsel %vm2385_vm10, %v6694_v5, 0.0  ;;  %v6771_v25 = vpop.permute.xlu1 %2405  ;;  %v7803_v56 = vld [vmem:[#allocation52_spill] sm:$0xff] }
 0x5f1   : > { %vm1649_vm3 = vcmp.eq.s32.totalorder %v7799_v40, %v5855_v21  ;;  %v1967_v61 = vadd.f32 %v7800_v57, %v1775_v0  ;;  %v6761_v29 = vadd.f32 %v7801_v10, %v2170_v7  ;;  %v2437_v34 = vadd.f32 %v2436_v38, %v2435_v3  ;;  %v6773_v3 = vpop.permute.xlu0 %2801 }
 0x5f2   : > { %v2825_v8 = vadd.f32 %v2824_v4, %v2823_v6  ;;  %v6763_v33 = vadd.f32 %v2483_v16, %v2482_v47  ;;  %v2176_v44 = vrot.slane %v2175_v24, 1  ;;  %v2445_v22 = vsel %vm1332_vm2, %v2425_v37, 0.0  ;;  %v7804_v4 = vld [vmem:[#allocation111_spill] sm:$0xff] }
 0x5f3   : > { %v2817_v5 = vsel %vm2777_vm11, %v6696_v18, 0.0  ;;  %vm2005_vm4 = vcmask 1043459   ;;  %v1975_v53 = vpack.c.bf16 %v1967_v61, %v1967_v61  ;;  %v2487_v14 = vadd.f32 %v2437_v34, %v6538_v39  ;;  %v7802_v39 = vld [vmem:[#allocation37_spill] sm:$0xff] }
 0x5f4   : > { %v2826_v11 = vrot.slane %v2825_v8, 2  ;;  %v2446_v12 = vrot.slane %v2445_v22, 4  ;;  %v2177_v47 = vadd.f32 %v2176_v44, %v2175_v24  ;;  %v2837_v6 = vsel %vm1332_vm2, %v2817_v5, 0.0  ;;  %v6794_v34 = vpop.permute.xlu1 %1322 }
 0x5f5   : > { %v1330_v16 = vsel %vm1266_vm13, %v6716_v32, 0.0  ;;  %v3495_v18 = vsel %vm3455_vm12, %v6718_v26, 0.0  ;;  %vm2778_vm5 = vcmp.eq.s32.totalorder %v7802_v39, %v5855_v21  ;;  %v1995_v17 = vunpack.c.l.b16 %v1975_v53 }
 0x5f6   : > { %v2631_v0 = vadd.f32 %v7803_v56, %v2487_v14  ;;  %v2827_v7 = vadd.f32 %v2826_v11, %v2825_v8  ;;  %v2447_v38 = vadd.f32 %v2446_v12, %v2445_v22  ;;  %v2347_v24 = vadd.f32 %v7804_v4, %v2177_v47  ;;  %v6796_v8 = vpop.permute.xlu0 %3081  ;;  %v7806_v14 = vld [vmem:[#allocation87_spill] sm:$0xff] }
 0x5f7   : > { %v2838_v37 = vrot.slane %v2837_v6, 4  ;;  %v1375_v57 = vsel %vm1332_vm2, %v1330_v16, 0.0  ;;  %v3503_v32 = vsel %vm1332_vm2, %v3495_v18, 0.0  ;;  %vm2100_vm6 = vcmp.eq.s32.totalorder %v7805_v54, %v5855_v21 }
 0x5f8   : > { %v2004_v26 = vsel %vm2003_vm15, %v1995_v17, %v6673_v50  ;;  %v2639_v49 = vpack.c.bf16 %v2631_v0, %v2631_v0  ;;  %v2828_v61 = vrot.slane %v2827_v7, 1  ;;  %v2448_v10 = vrot.slane %v2447_v38, 2 }
 0x5f9   : > { %v2491_v44 = vadd.f32 %v2465_v31, %v2347_v24  ;;  %v2839_v22 = vadd.f32 %v2838_v37, %v2837_v6  ;;  %v1376_v5 = vrot.slane %v1375_v57, 4  ;;  %v3504_v53 = vrot.slane %v3503_v32, 4  ;;  %v7807_v37 = vld [vmem:[#allocation66_spill] sm:$0xff] }
 0x5fa   : > { %vm3063_vm7 = vcmp.eq.s32.totalorder %v7806_v14, %v5855_v21  ;;  %v2659_v11 = vunpack.c.l.b16 %v2639_v49  ;;  %v2829_v12 = vadd.f32 %v2828_v61, %v2827_v7  ;;  %v2449_v47 = vadd.f32 %v2448_v10, %v2447_v38  ;;  %v6813_v38 = vpop.permute.xlu1 %2133  ;;  %v6815_v4 = vpop.permute.xlu0 %3477  ;;  %v7811_v14 = vld [vmem:[#allocation44_spill] sm:$0xff] }
 0x5fb   : > { %v1713_v50 = vsel %vm1649_vm3, %v6733_v46, 0.0  ;;  %v6805_v16 = vadd.f32 %v6260_v41, %v2491_v44  ;;  %v2840_v18 = vrot.slane %v2839_v22, 2  ;;  %v1377_v17 = vadd.f32 %v1376_v5, %v1375_v57 }
 0x5fc   : > { %v3505_v31 = vadd.f32 %v3504_v53, %v3503_v32  ;;  %v2667_v6 = vsel %vm2001_vm14, %v6668_v35, %v2659_v11  ;;  %v6810_v56 = vadd.f32 %v6334_v13, %v2829_v12  ;;  %v2450_v0 = vrot.slane %v2449_v47, 1 }
 0x5fd   : > { %v1745_v7 = vsel %vm1332_vm2, %v1713_v50, 0.0  ;;  %v6818_v46 = vadd.f32 %v2471_v63, %v6739_v36  ;;  %v2841_v41 = vadd.f32 %v2840_v18, %v2839_v22  ;;  %v1378_v40 = vrot.slane %v1377_v17, 2 }
 0x5fe   : > { %v3506_v24 = vrot.slane %v3505_v31, 2  ;;  %vm2386_vm8 = vcmp.eq.s32.totalorder %v7807_v37, %v5855_v21  ;;  %v2451_v35 = vadd.f32 %v2450_v0, %v2449_v47  ;;  %v1746_v57 = vrot.slane %v1745_v7, 4  ;;  %v6839_v39 = vpop.permute.xlu1 %1707 }
 0x5ff   : > { %v6824_v13 = vsel %vm2005_vm4, %v6737_v20, %v2004_v26  ;;  %v2818_v32 = vsel %vm2778_vm5, %v6735_v59, 0.0  ;;  %v2485_v36 = vrot.slane %v6763_v33, 1  ;;  %v2842_v63 = vrot.slane %v2841_v41, 1  ;;  %v7808_v26 = vld [vmem:[#allocation42_spill] sm:$0xff]  ;;  %v6841_v59 = vpop.permute.xlu0 %3753 }
 0x600   : > { %v1379_v49 = vadd.f32 %v1378_v40, %v1377_v17  ;;  %v3507_v61 = vadd.f32 %v3506_v24, %v3505_v31  ;;  %v2489_v10 = vadd.f32 %v2451_v35, %v6661_v1  ;;  %v1747_v44 = vadd.f32 %v1746_v57, %v1745_v7  ;;  %v7809_v1 = vld [vmem:[#allocation122_spill] sm:$0xff]  ;;  %v7810_v7 = vld [vmem:[#allocation29_spill] sm:$0xff] }
 0x601   : > { %v2844_v22 = vsel %vm1332_vm2, %v2818_v32, 0.0  ;;  %v2140_v20 = vsel %vm2100_vm6, %v6746_v27, 0.0  ;;  %vm2779_vm9 = vcmp.eq.s32.totalorder %v7808_v26, %v5855_v21  ;;  %v2843_v5 = vadd.f32 %v2842_v63, %v2841_v41  ;;  %v7815_v26 = vld [vmem:[#allocation41_spill] sm:$0xff] }
 0x602   : > { %v1380_v53 = vrot.slane %v1379_v49, 1  ;;  %v3508_v11 = vrot.slane %v3507_v61, 1  ;;  %v2845_v12 = vrot.slane %v2844_v22, 4  ;;  %v2633_v47 = vadd.f32 %v7809_v1, %v2489_v10  ;;  %v6855_v57 = vpop.permute.xlu1 %2417 }
 0x603   : > { %v1748_v50 = vrot.slane %v1747_v44, 2  ;;  %v2178_v18 = vsel %vm1332_vm2, %v2140_v20, 0.0  ;;  %v3103_v27 = vsel %vm3063_vm7, %v6748_v52, 0.0  ;;  %v6850_v54 = vadd.f32 %v6250_v2, %v2843_v5  ;;  %v6857_v32 = vpop.permute.xlu0 %3481  ;;  %v7812_v20 = vld [vmem:[#allocation89_spill] sm:$0xff] }
 0x604   : > { %v1381_v17 = vadd.f32 %v1380_v53, %v1379_v49  ;;  %v3509_v31 = vadd.f32 %v3508_v11, %v3507_v61  ;;  %v2846_v0 = vadd.f32 %v2845_v12, %v2844_v22  ;;  %vm1267_vm10 = vcmp.eq.s32.totalorder %v7810_v7, %v5855_v21 }
 0x605   : > { %v2641_v41 = vpack.c.bf16 %v2633_v47, %v2633_v47  ;;  %v1749_v40 = vadd.f32 %v1748_v50, %v1747_v44  ;;  %v2179_v24 = vrot.slane %v2178_v18, 4  ;;  %v3111_v35 = vsel %vm1332_vm2, %v3103_v27, 0.0 }
 0x606   : > { %v1587_v52 = vadd.f32 %v7811_v14, %v1381_v17  ;;  %v6861_v2 = vadd.f32 %v6363_v30, %v3509_v31  ;;  %v2847_v63 = vrot.slane %v2846_v0, 2  ;;  %v3112_v49 = vrot.slane %v3111_v35, 4 }
 0x607   : > { %v2661_v61 = vunpack.c.l.b16 %v2641_v41  ;;  %v1750_v10 = vrot.slane %v1749_v40, 1  ;;  %v2180_v22 = vadd.f32 %v2179_v24, %v2178_v18  ;;  %v2426_v44 = vsel %vm2386_vm8, %v6771_v25, 0.0  ;;  %v6874_v18 = vpop.permute.xlu1 %2789  ;;  %v6876_v37 = vpop.permute.xlu0 %3761 }
 0x608   : > { %vm3065_vm11 = vcmp.eq.s32.totalorder %v7812_v20, %v5855_v21  ;;  %v1779_v5 = vadd.f32 %v6750_v23, %v1587_v52  ;;  %vm2007_vm13 = vcmask 1044484   ;;  %v2848_v53 = vadd.f32 %v2847_v63, %v2846_v0  ;;  %v7814_v52 = vld [vmem:[#allocation45_spill] sm:$0xff] }
 0x609   : > { %v3113_v11 = vadd.f32 %v3112_v49, %v3111_v35  ;;  %v2452_v30 = vsel %vm1332_vm2, %v2426_v44, 0.0  ;;  %v6872_v12 = vsel %vm2003_vm15, %v2661_v61, %v2667_v6  ;;  %v1751_v1 = vadd.f32 %v1750_v10, %v1749_v40  ;;  %v7813_v6 = vld [vmem:[#allocation28_spill] sm:$0xff] }
 0x60a   : > { %v2181_v47 = vrot.slane %v2180_v22, 2  ;;  %v2453_v50 = vrot.slane %v2452_v30, 4  ;;  %v6879_v25 = vadd.f32 %v6274_v15, %v1779_v5  ;;  %v2849_v27 = vrot.slane %v2848_v53, 1 }
 0x60b   : > { %v3114_v23 = vrot.slane %v3113_v11, 2  ;;  %v2819_v17 = vsel %vm2779_vm9, %v6773_v3, 0.0  ;;  %vm2102_vm12 = vcmp.eq.s32.totalorder %v7813_v6, %v5855_v21  ;;  %v1777_v31 = vadd.f32 %v1751_v1, %v6702_v58  ;;  %v6898_v61 = vpop.permute.xlu1 %3469  ;;  %v6900_v10 = vpop.permute.xlu0 %2809 }
 0x60c   : > { %v2182_v0 = vadd.f32 %v2181_v47, %v2180_v22  ;;  %v2454_v41 = vadd.f32 %v2453_v50, %v2452_v30  ;;  %v2851_v40 = vsel %vm1332_vm2, %v2819_v17, 0.0  ;;  %v2643_v15 = vpack.c.bf16 %v6805_v16, %v6805_v16 }
 0x60d   : > { %v2850_v24 = vadd.f32 %v2849_v27, %v2848_v53  ;;  %v3115_v35 = vadd.f32 %v3114_v23, %v3113_v11  ;;  %v2852_v14 = vrot.slane %v2851_v40, 4  ;;  %vm3458_vm3 = vcmp.eq.s32.totalorder %v7814_v52, %v5855_v21 }
 0x60e   : > { %v1969_v3 = vadd.f32 %v7815_v26, %v1777_v31  ;;  %v2183_v63 = vrot.slane %v2182_v0, 1  ;;  %v2455_v49 = vrot.slane %v2454_v41, 2  ;;  %v1331_v58 = vsel %vm1267_vm10, %v6794_v34, 0.0  ;;  %v7817_v31 = vld [vmem:[#allocation77_spill] sm:$0xff] }
 0x60f   : > { %v1979_v16 = vpack.c.bf16 %v6879_v25, %v6879_v25  ;;  %v6905_v22 = vadd.f32 %v6272_v60, %v2850_v24  ;;  %v3116_v44 = vrot.slane %v3115_v35, 1  ;;  %v2853_v5 = vadd.f32 %v2852_v14, %v2851_v40  ;;  %v7816_v25 = vld [vmem:[#allocation82_spill] sm:$0xff]  ;;  %v6920_v40 = vpop.permute.xlu0 %3089 }
 0x610   : > { %v1977_v53 = vpack.c.bf16 %v1969_v3, %v1969_v3  ;;  %v2184_v11 = vadd.f32 %v2183_v63, %v2182_v0  ;;  %v2456_v30 = vadd.f32 %v2455_v49, %v2454_v41  ;;  %v1382_v1 = vsel %vm1332_vm2, %v1331_v58, 0.0  ;;  %v7818_v0 = vld [vmem:[#allocation79_spill] sm:$0xff]  ;;  %v6918_v41 = vpop.permute.xlu1 %3077 }
 0x611   : > { %v3117_v47 = vadd.f32 %v3116_v44, %v3115_v35  ;;  %v2854_v7 = vrot.slane %v2853_v5, 2  ;;  %v1383_v34 = vrot.slane %v1382_v1, 4  ;;  %v3105_v50 = vsel %vm3065_vm11, %v6796_v8, 0.0 }
 0x612   : > { %v1997_v27 = vunpack.c.l.b16 %v1977_v53  ;;  %v2348_v23 = vadd.f32 %v7816_v25, %v2184_v11  ;;  %v2457_v60 = vrot.slane %v2456_v30, 1  ;;  %v3125_v17 = vsel %vm1332_vm2, %v3105_v50, 0.0 }
 0x613   : > { %vm1652_vm5 = vcmp.eq.s32.totalorder %v7817_v31, %v5855_v21  ;;  %vm3743_vm6 = vcmp.eq.s32.totalorder %v7818_v0, %v5855_v21  ;;  %v3167_v24 = vadd.f32 %v3117_v47, %v6810_v56  ;;  %v2855_v20 = vadd.f32 %v2854_v7, %v2853_v5  ;;  %v7819_v5 = vld [vmem:[#allocation47_spill] sm:$0xff]  ;;  %v6948_v6 = vpop.permute.xlu0 %3485 }
 0x614   : > { %v1384_v8 = vadd.f32 %v1383_v34, %v1382_v1  ;;  %v3126_v35 = vrot.slane %v3125_v17, 4  ;;  %v6925_v14 = vsel %vm2007_vm13, %v1997_v27, %v6824_v13  ;;  %v2492_v26 = vadd.f32 %v6818_v46, %v2348_v23  ;;  %v7821_v34 = vld [vmem:[#allocation72_spill] sm:$0xff]  ;;  %v7822_v27 = vld [vmem:[#allocation50_spill] sm:$0xff]  ;;  %v7823_v23 = vld [vmem:[#allocation43_spill] sm:$0xff] }
 0x615   : > { %v2458_v3 = vadd.f32 %v2457_v60, %v2456_v30  ;;  %v2142_v63 = vsel %vm2102_vm12, %v6813_v38, 0.0  ;;  %v6933_v49 = vadd.f32 %v6413_v43, %v3167_v24  ;;  %v2856_v58 = vrot.slane %v2855_v20, 1  ;;  %v7820_v38 = vld [vmem:[#allocation81_spill] sm:$0xff]  ;;  %v6946_v43 = vpop.permute.xlu1 %3473 }
 0x616   : > { %v1385_v56 = vrot.slane %v1384_v8, 2  ;;  %v3127_v44 = vadd.f32 %v3126_v35, %v3125_v17  ;;  %v6936_v53 = vadd.f32 %v7819_v5, %v2492_v26  ;;  %v2192_v11 = vsel %vm1332_vm2, %v2142_v63, 0.0 }
 0x617   : > { %v2490_v13 = vadd.f32 %v2458_v3, %v6761_v29  ;;  %v3498_v46 = vsel %vm3458_vm3, %v6815_v4, 0.0  ;;  %vm2389_vm7 = vcmp.eq.s32.totalorder %v7820_v38, %v5855_v21  ;;  %v6953_v30 = vadd.f32 %v2485_v36, %v6763_v33  ;;  %v6968_v35 = vpop.permute.xlu0 %3765 }
 0x618   : > { %v2857_v29 = vadd.f32 %v2856_v58, %v2855_v20  ;;  %v1386_v1 = vadd.f32 %v1385_v56, %v1384_v8  ;;  %v3128_v47 = vrot.slane %v3127_v44, 2  ;;  %v2663_v7 = vunpack.c.l.b16 %v2643_v15 }
 0x619   : > { %v2634_v50 = vadd.f32 %v7821_v34, %v2490_v13  ;;  %v2193_v52 = vrot.slane %v2192_v11, 4  ;;  %v3524_v4 = vsel %vm1332_vm2, %v3498_v46, 0.0  ;;  %vm3459_vm8 = vcmp.eq.s32.totalorder %v7822_v27, %v5855_v21  ;;  %v6966_v8 = vpop.permute.xlu1 %3757  ;;  %v7828_v27 = vld [vmem:[#allocation118_spill] sm:$0xff] }
 0x61a   : > { %v6959_v25 = vunpack.c.l.b16 %v1979_v16  ;;  %v6962_v60 = vadd.f32 %v7823_v23, %v2857_v29  ;;  %v1387_v17 = vrot.slane %v1386_v1, 1  ;;  %v3129_v33 = vadd.f32 %v3128_v47, %v3127_v44  ;;  %v7826_v23 = vld [vmem:[#allocation39_spill] sm:$0xff] }
 0x61b   : > { %v3319_v36 = vpack.c.bf16 %v6933_v49, %v6933_v49  ;;  %v2642_v24 = vpack.c.bf16 %v2634_v50, %v2634_v50  ;;  %v2194_v15 = vadd.f32 %v2193_v52, %v2192_v11  ;;  %v3525_v20 = vrot.slane %v3524_v4, 4  ;;  %v7824_v49 = vld [vmem:[#allocation35_spill] sm:$0xff]  ;;  %v6988_v34 = vpop.permute.xlu0 %2813 }
 0x61c   : > { %v2644_v26 = vpack.c.bf16 %v6936_v53, %v6936_v53  ;;  %v3130_v16 = vrot.slane %v3129_v33, 1  ;;  %v1716_v3 = vsel %vm1652_vm5, %v6839_v39, 0.0  ;;  %v3783_v63 = vsel %vm3743_vm6, %v6841_v59, 0.0 }
 0x61d   : > { %vm2776_vm9 = vcmp.eq.s32.totalorder %v7824_v49, %v5855_v21  ;;  %v2662_v58 = vunpack.c.l.b16 %v2642_v24  ;;  %v2195_v56 = vrot.slane %v2194_v15, 2  ;;  %v3526_v44 = vadd.f32 %v3525_v20, %v3524_v4  ;;  %v6986_v59 = vpop.permute.xlu1 %2805 }
 0x61e   : > { %v1766_v5 = vsel %vm1332_vm2, %v1716_v3, 0.0  ;;  %v1388_v13 = vadd.f32 %v1387_v17, %v1386_v1  ;;  %v3131_v11 = vadd.f32 %v3130_v16, %v3129_v33  ;;  %v3791_v29 = vsel %vm1332_vm2, %v3783_v63, 0.0 }
 0x61f   : > { %v1767_v46 = vrot.slane %v1766_v5, 4  ;;  %v2669_v39 = vsel %vm2005_vm4, %v2662_v58, %v6872_v12  ;;  %v2196_v31 = vadd.f32 %v2195_v56, %v2194_v15  ;;  %v3527_v47 = vrot.slane %v3526_v44, 2  ;;  %v7825_v12 = vld [vmem:[#allocation97_spill] sm:$0xff]  ;;  %v7013_v56 = vpop.permute.xlu0 %3097 }
 0x620   : > { %v3792_v0 = vrot.slane %v3791_v29, 4  ;;  %v6991_v50 = vsel %vm2007_vm13, %v2663_v7, %v2669_v39  ;;  %v3169_v52 = vadd.f32 %v3131_v11, %v6850_v54  ;;  %v2429_v4 = vsel %vm2389_vm7, %v6855_v57, 0.0 }
 0x621   : > { %v1768_v1 = vadd.f32 %v1767_v46, %v1766_v5  ;;  %vm3745_vm10 = vcmp.eq.s32.totalorder %v7825_v12, %v5855_v21  ;;  %vm3456_vm11 = vcmp.eq.s32.totalorder %v7826_v23, %v5855_v21  ;;  %v2197_v17 = vrot.slane %v2196_v31, 1  ;;  %v7011_v58 = vpop.permute.xlu1 %3085  ;;  %v7827_v46 = vld [vmem:[#allocation83_spill] sm:$0xff] }
 0x622   : > { %v3528_v33 = vadd.f32 %v3527_v47, %v3526_v44  ;;  %v3793_v24 = vadd.f32 %v3792_v0, %v3791_v29  ;;  %v2473_v7 = vsel %vm1332_vm2, %v2429_v4, 0.0  ;;  %v7004_v15 = vadd.f32 %v6378_v9, %v3169_v52 }
 0x623   : > { %v1769_v54 = vrot.slane %v1768_v1, 2  ;;  %v2474_v20 = vrot.slane %v2473_v7, 4  ;;  %v3499_v57 = vsel %vm3459_vm8, %v6857_v32, 0.0  ;;  %v2198_v38 = vadd.f32 %v2197_v17, %v2196_v31  ;;  %v7830_v17 = vld [vmem:[#allocation116_spill] sm:$0xff]  ;;  %v7032_v49 = vpop.permute.xlu0 %3773 }
 0x624   : > { %v3529_v16 = vrot.slane %v3528_v33, 1  ;;  %v3794_v3 = vrot.slane %v3793_v24, 2  ;;  %v3531_v63 = vsel %vm1332_vm2, %v3499_v57, 0.0  ;;  %v7015_v44 = vunpack.c.l.b16 %v3319_v36  ;;  %v7829_v36 = vld [vmem:[#allocation49_spill] sm:$0xff] }
 0x625   : > { %v1770_v9 = vadd.f32 %v1769_v54, %v1768_v1  ;;  %v2475_v5 = vadd.f32 %v2474_v20, %v2473_v7  ;;  %v3532_v11 = vrot.slane %v3531_v63, 4  ;;  %v2350_v29 = vadd.f32 %v7827_v46, %v2198_v38  ;;  %v7030_v54 = vpop.permute.xlu1 %3093  ;;  %v7831_v38 = vld [vmem:[#allocation85_spill] sm:$0xff] }
 0x626   : > { %v3530_v39 = vadd.f32 %v3529_v16, %v3528_v33  ;;  %v3795_v47 = vadd.f32 %v3794_v3, %v3793_v24  ;;  %v2816_v32 = vsel %vm2776_vm9, %v6874_v18, 0.0  ;;  %v1588_v31 = vadd.f32 %v7828_v27, %v1388_v13  ;;  %v7834_v27 = vld [vmem:[#allocation51_spill] sm:$0xff] }
 0x627   : > { %v1771_v0 = vrot.slane %v1770_v9, 1  ;;  %v2476_v52 = vrot.slane %v2475_v5, 2  ;;  %v3533_v4 = vadd.f32 %v3532_v11, %v3531_v63  ;;  %vm2781_vm12 = vcmp.eq.s32.totalorder %v7829_v36, %v5855_v21  ;;  %v7832_v11 = vld [vmem:[#allocation78_spill] sm:$0xff] }
 0x628   : > { %v2494_v1 = vadd.f32 %v6953_v30, %v2350_v29  ;;  %v7027_v7 = vadd.f32 %v7830_v17, %v3530_v39  ;;  %v3796_v33 = vrot.slane %v3795_v47, 1  ;;  %v2830_v24 = vsel %vm1332_vm2, %v2816_v32, 0.0  ;;  %v7833_v39 = vld [vmem:[#allocation84_spill] sm:$0xff]  ;;  %v7056_v32 = vpop.permute.xlu0 %3781 }
 0x629   : > { %v1772_v18 = vadd.f32 %v1771_v0, %v1770_v9  ;;  %v2477_v13 = vadd.f32 %v2476_v52, %v2475_v5  ;;  %v3534_v20 = vrot.slane %v3533_v4, 2  ;;  %v2831_v57 = vrot.slane %v2830_v24, 4 }
 0x62a   : > { %v7035_v16 = vadd.f32 %v7831_v38, %v2494_v1  ;;  %v3797_v3 = vadd.f32 %v3796_v33, %v3795_v47  ;;  %v3785_v30 = vsel %vm3745_vm10, %v6876_v37, 0.0  ;;  %v3496_v63 = vsel %vm3456_vm11, %v6898_v61, 0.0  ;;  %v7054_v61 = vpop.permute.xlu1 %3489  ;;  %v7835_v1 = vld [vmem:[#allocation40_spill] sm:$0xff] }
 0x62b   : > { %vm3064_vm3 = vcmp.eq.s32.totalorder %v7832_v11, %v5855_v21  ;;  %v1780_v9 = vadd.f32 %v1772_v18, %v1588_v31  ;;  %v2478_v5 = vrot.slane %v2477_v13, 1  ;;  %v3535_v46 = vadd.f32 %v3534_v20, %v3533_v4 }
 0x62c   : > { %v2832_v29 = vadd.f32 %v2831_v57, %v2830_v24  ;;  %vm3067_vm5 = vcmp.eq.s32.totalorder %v7833_v39, %v5855_v21  ;;  %v3321_v47 = vpack.c.bf16 %v7004_v15, %v7004_v15  ;;  %v3847_v37 = vadd.f32 %v3797_v3, %v6861_v2 }
 0x62d   : > { %v3805_v12 = vsel %vm1332_vm2, %v3785_v30, 0.0  ;;  %v3510_v23 = vsel %vm1332_vm2, %v3496_v63, 0.0  ;;  %v1972_v31 = vadd.f32 %v7834_v27, %v1780_v9  ;;  %v2479_v0 = vadd.f32 %v2478_v5, %v2477_v13  ;;  %v7836_v13 = vld [vmem:[#allocation54_spill] sm:$0xff]  ;;  %v7837_v9 = vld [vmem:[#allocation48_spill] sm:$0xff] }
 0x62e   : > { %v3536_v52 = vrot.slane %v3535_v46, 1  ;;  %v2833_v4 = vrot.slane %v2832_v29, 2  ;;  %vm3457_vm6 = vcmp.eq.s32.totalorder %v7835_v1, %v5855_v21  ;;  %v7064_v2 = vunpack.c.l.b16 %v2644_v26  ;;  %v2684_v26 = vpop.permute.xlu0 %2683 }
 0x62f   : > { %v3991_v15 = vadd.f32 %v6420_v55, %v3847_v37  ;;  %v3806_v17 = vrot.slane %v3805_v12, 4  ;;  %v3511_v33 = vrot.slane %v3510_v23, 4  ;;  %v1980_v24 = vpack.c.bf16 %v1972_v31, %v1972_v31  ;;  %v7076_v55 = vpop.permute.xlu1 %3769  ;;  %4642 = vmatpush3.bf16.msra.mxu1 %v2684_v26 }
 0x630   : > { %v2493_v18 = vadd.f32 %v2479_v0, %v6699_v42  ;;  %v3537_v20 = vadd.f32 %v3536_v52, %v3535_v46  ;;  %v2834_v57 = vadd.f32 %v2833_v4, %v2832_v29  ;;  %vm3460_vm7 = vcmp.eq.s32.totalorder %v7836_v13, %v5855_v21  ;;  %v7838_v29 = vld [vmem:[#allocation91_spill] sm:$0xff] }
 0x631   : > { %v7070_v38 = vunpack.c.l.b16 %v3321_v47  ;;  %v3807_v3 = vadd.f32 %v3806_v17, %v3805_v12  ;;  %v3512_v30 = vadd.f32 %v3511_v33, %v3510_v23  ;;  %v2821_v53 = vsel %vm2781_vm12, %v6900_v10, 0.0  ;;  %v7840_v0 = vld [vmem:[#allocation99_spill] sm:$0xff] }
 0x632   : > { %v3999_v63 = vpack.c.bf16 %v3991_v15, %v3991_v15  ;;  %v7079_v42 = vadd.f32 %v6321_v45, %v2493_v18  ;;  %v7082_v5 = vadd.f32 %v7837_v9, %v3537_v20  ;;  %v2835_v46 = vrot.slane %v2834_v57, 1  ;;  %v7841_v20 = vld [vmem:[#allocation31_spill] sm:$0xff] }
 0x633   : > { %vm3744_vm8 = vcmp.eq.s32.totalorder %v7838_v29, %v5855_v21  ;;  %v2646_v47 = vpack.c.bf16 %v7035_v16, %v7035_v16  ;;  %v3808_v36 = vrot.slane %v3807_v3, 2  ;;  %v3513_v10 = vrot.slane %v3512_v30, 2  ;;  %v7103_v33 = vpop.permute.xlu1 %3493 }
 0x634   : > { %v2865_v37 = vsel %vm1332_vm2, %v2821_v53, 0.0  ;;  %v7839_v12 = vmov 0.0   ;;  %v7090_v23 = vunpack.c.l.b16 %v1980_v24  ;;  %v2836_v45 = vadd.f32 %v2835_v46, %v2834_v57  ;;  %v2686_v24 = vpop.permute.xlu0 %2685 }
 0x635   : > { %4643 = vmatprep.subr.bf16.mxu1 %v7839_v12  ;;  %v2866_v27 = vrot.slane %v2865_v37, 4  ;;  %v3104_v31 = vsel %vm3064_vm3, %v6918_v41, 0.0  ;;  %vm3746_vm9 = vcmp.eq.s32.totalorder %v7840_v0, %v5855_v21  ;;  %v3809_v52 = vadd.f32 %v3808_v36, %v3807_v3 }
 0x636   : > { %v3514_v4 = vadd.f32 %v3513_v10, %v3512_v30  ;;  %v3118_v15 = vsel %vm1332_vm2, %v3104_v31, 0.0  ;;  %v3107_v17 = vsel %vm3067_vm5, %v6920_v40, 0.0  ;;  %v7105_v18 = vunpack.c.l.b16 %v3999_v63  ;;  %4644 = vmatpush3.bf16.msra.mxu1 %v2686_v24 }
 0x637   : > { %v3024_v11 = vadd.f32 %v7841_v20, %v2836_v45  ;;  %v2867_v41 = vadd.f32 %v2866_v27, %v2865_v37  ;;  %v3119_v57 = vrot.slane %v3118_v15, 4  ;;  %v3810_v53 = vrot.slane %v3809_v52, 1  ;;  %4661 = vmatprep.subr.bf16.mxu1 %v7839_v12  ;;  %v7121_v45 = vpop.permute.xlu1 %3101 }
 0x638   : > { %v3515_v3 = vrot.slane %v3514_v4, 1  ;;  %v3139_v30 = vsel %vm1332_vm2, %v3107_v17, 0.0  ;;  %v3497_v39 = vsel %vm3457_vm6, %v6946_v43, 0.0  ;;  %v3500_v37 = vsel %vm3460_vm7, %v6948_v6, 0.0 }
 0x639   : > { %v2868_v40 = vrot.slane %v2867_v41, 2  ;;  %v3120_v26 = vadd.f32 %v3119_v57, %v3118_v15  ;;  %v3140_v63 = vrot.slane %v3139_v30, 4  ;;  %v3517_v9 = vsel %vm1332_vm2, %v3497_v39, 0.0  ;;  %v7842_v15 = vld [vmem:[#allocation36_spill] sm:$0xff] }
 0x63a   : > { %v7115_v46 = vadd.f32 %v3810_v53, %v3809_v52  ;;  %v3516_v36 = vadd.f32 %v3515_v3, %v3514_v4  ;;  %v3518_v10 = vrot.slane %v3517_v9, 4  ;;  %v3538_v31 = vsel %vm1332_vm2, %v3500_v37, 0.0  ;;  %v7843_v37 = vld [vmem:[#allocation46_spill] sm:$0xff] }
 0x63b   : > { %v2869_v1 = vadd.f32 %v2868_v40, %v2867_v41  ;;  %v3121_v43 = vrot.slane %v3120_v26, 2  ;;  %v3141_v27 = vadd.f32 %v3140_v63, %v3139_v30  ;;  %v3539_v52 = vrot.slane %v3538_v31, 4  ;;  %v7136_v39 = vpop.permute.xlu1 %3777 }
 0x63c   : > { %v7125_v17 = vadd.f32 %v7842_v15, %v3516_v36  ;;  %v3519_v24 = vadd.f32 %v3518_v10, %v3517_v9  ;;  %v3784_v4 = vsel %vm3744_vm8, %v6966_v8, 0.0  ;;  %v3786_v30 = vsel %vm3746_vm9, %v6968_v35, 0.0 }
 0x63d   : > { %v2870_v20 = vrot.slane %v2869_v1, 1  ;;  %v3122_v13 = vadd.f32 %v3121_v43, %v3120_v26  ;;  %v3142_v6 = vrot.slane %v3141_v27, 2  ;;  %v3798_v57 = vsel %vm1332_vm2, %v3784_v4, 0.0  ;;  %v7844_v43 = vld [vmem:[#allocation56_spill] sm:$0xff] }
 0x63e   : > { %v3520_v41 = vrot.slane %v3519_v24, 2  ;;  %v3540_v53 = vadd.f32 %v3539_v52, %v3538_v31  ;;  %v3799_v3 = vrot.slane %v3798_v57, 4  ;;  %v3812_v8 = vsel %vm1332_vm2, %v3786_v30, 0.0 }
 0x63f   : > { %v2871_v40 = vadd.f32 %v2870_v20, %v2869_v1  ;;  %v3123_v63 = vrot.slane %v3122_v13, 1  ;;  %v3143_v9 = vadd.f32 %v3142_v6, %v3141_v27  ;;  %v3813_v10 = vrot.slane %v3812_v8, 4  ;;  %v7845_v27 = vld [vmem:[#allocation58_spill] sm:$0xff] }
 0x640   : > { %v3521_v29 = vadd.f32 %v3520_v41, %v3519_v24  ;;  %v3541_v26 = vrot.slane %v3540_v53, 2  ;;  %v3800_v36 = vadd.f32 %v3799_v3, %v3798_v57  ;;  %vm2780_vm10 = vcmp.eq.s32.totalorder %v7843_v37, %v5855_v21  ;;  %v7146_v24 = vpop.permute.xlu1 %3925 }
 0x641   : > { %v7142_v31 = vadd.f32 %v7844_v43, %v2871_v40  ;;  %v3124_v15 = vadd.f32 %v3123_v63, %v3122_v13  ;;  %v3144_v0 = vrot.slane %v3143_v9, 1  ;;  %vm2009_vm11 = vcmask 1045509   ;;  %v7847_v40 = vld [vmem:[#allocation86_spill] sm:$0xff] }
 0x642   : > { %v3522_v35 = vrot.slane %v3521_v29, 1  ;;  %v3542_v52 = vadd.f32 %v3541_v26, %v3540_v53  ;;  %v3801_v1 = vrot.slane %v3800_v36, 2  ;;  %v3814_v4 = vadd.f32 %v3813_v10, %v3812_v8  ;;  %v7846_v53 = vld [vmem:[#allocation93_spill] sm:$0xff] }
 0x643   : > { %vm2782_vm12 = vcmp.eq.s32.totalorder %v7845_v27, %v5855_v21  ;;  %v3168_v20 = vadd.f32 %v3124_v15, %v3024_v11  ;;  %v3145_v6 = vadd.f32 %v3144_v0, %v3143_v9  ;;  %v2010_v57 = vsel %vm2009_vm11, %v6742_v28, %v6925_v14  ;;  %v7848_v9 = vld [vmem:[#allocation95_spill] sm:$0xff]  ;;  %v7855_v27 = vld [vmem:[#allocation62_spill] sm:$0xff] }
 0x644   : > { %vm2011_vm3 = vcmask 1046534   ;;  %v3523_v41 = vadd.f32 %v3522_v35, %v3521_v29  ;;  %v3543_v13 = vrot.slane %v3542_v52, 1  ;;  %v3802_v3 = vadd.f32 %v3801_v1, %v3800_v36  ;;  %v7849_v29 = vld [vmem:[#allocation90_spill] sm:$0xff]  ;;  %v3360_v36 = vpop.permute.xlu1 %3359  ;;  %v7851_v35 = vld [vmem:[#allocation88_spill] sm:$0xff] }
 0x645   : > { %v3815_v30 = vrot.slane %v3814_v4, 2  ;;  %vm3066_vm5 = vcmp.eq.s32.totalorder %v7846_v53, %v5855_v21  ;;  %v3312_v63 = vadd.f32 %v7847_v40, %v3168_v20  ;;  %v3171_v8 = vadd.f32 %v3145_v6, %v6962_v60 }
 0x646   : > { %v2012_v11 = vsel %vm2011_vm3, %v6959_v25, %v2010_v57  ;;  %vm2013_vm6 = vcmask 1047559   ;;  %v3705_v26 = vadd.f32 %v7848_v9, %v3523_v41  ;;  %v3544_v10 = vadd.f32 %v3543_v13, %v3542_v52  ;;  %v7850_v25 = vld [vmem:[#allocation103_spill] sm:$0xff]  ;;  %v7852_v57 = vld [vmem:[#allocation94_spill] sm:$0xff]  ;;  %v7853_v41 = vld [vmem:[#allocation108_spill] sm:$0xff] }
 0x647   : > { %v3803_v28 = vrot.slane %v3802_v3, 1  ;;  %v3816_v14 = vadd.f32 %v3815_v30, %v3814_v4  ;;  %vm3069_vm7 = vcmp.eq.s32.totalorder %v7849_v29, %v5855_v21  ;;  %v3320_v43 = vpack.c.bf16 %v3312_v63, %v3312_v63 }
 0x648   : > { %v7161_v15 = vadd.f32 %v6438_v62, %v3171_v8  ;;  %v2014_v60 = vsel %vm2013_vm6, %v7090_v23, %v2012_v11  ;;  %vm2016_vm8 = vcmask 523264   ;;  %vm3068_vm9 = vcmp.eq.s32.totalorder %v7850_v25, %v5855_v21  ;;  %v3362_v40 = vpop.permute.xlu1 %3361 }
 0x649   : > { %v3849_v0 = vadd.f32 %v7115_v46, %v3705_v26  ;;  %v7169_v52 = vadd.f32 %v7851_v35, %v3544_v10  ;;  %v3804_v1 = vadd.f32 %v3803_v28, %v3802_v3  ;;  %v3817_v4 = vrot.slane %v3816_v14, 1 }
 0x64a   : > { %v2645_v20 = vpack.c.bf16 %v7079_v42, %v7079_v42  ;;  %v3340_v6 = vunpack.c.l.b16 %v3320_v43  ;;  %v2015_v62 = vpack.c.b16 %v2014_v60, %v2014_v60  ;;  %v2820_v23 = vsel %vm2780_vm10, %v6986_v59, 0.0  ;;  %v7857_v60 = vld [vmem:[#allocation96_spill] sm:$0xff] }
 0x64b   : > { %vm3748_vm0 = vcmp.eq.s32.totalorder %v7852_v57, %v5855_v21  ;;  %v3993_v46 = vadd.f32 %v7853_v41, %v3849_v0  ;;  %v3848_v13 = vadd.f32 %v3804_v1, %v7125_v17  ;;  %v3818_v30 = vadd.f32 %v3817_v4, %v3816_v14  ;;  %v7854_v17 = vld [vmem:[#allocation92_spill] sm:$0xff] }
 0x64c   : > { %v2858_v3 = vsel %vm1332_vm2, %v2820_v23, 0.0  ;;  %v3347_v63 = vsel %vm2001_vm14, %v3340_v6, %v7015_v44  ;;  %v3323_v8 = vpack.c.bf16 %v7161_v15, %v7161_v15  ;;  %4634 = vmatmul.mubr.msk.bf16.vlgmr.msra.gmra.mrb[12].mxu0 %vm2016_vm8, %v2015_v62  ;;  %v2822_v37 = vsel %vm2782_vm12, %v6988_v34, 0.0  ;;  %v3364_v4 = vpop.permute.xlu1 %3363 }
 0x64d   : > { %v2859_v59 = vrot.slane %v2858_v3, 4  ;;  %v4001_v11 = vpack.c.bf16 %v3993_v46, %v3993_v46  ;;  %v3992_v9 = vadd.f32 %v7854_v17, %v3848_v13  ;;  %v3850_v26 = vadd.f32 %v3818_v30, %v7027_v7  ;;  %4650 = vmatpush3.bf16.msra.mxu0 %v3360_v36  ;;  %4657 = vmatprep.mubr.msk.bf16.mxu0 %vm4895_vm1, %v7839_v12  ;;  %v7856_v7 = vld [vmem:[#allocation100_spill] sm:$0xff] }
 0x64e   : > { %v2872_v10 = vsel %vm1332_vm2, %v2822_v37, 0.0  ;;  %v3106_v14 = vsel %vm3066_vm5, %v7011_v58, 0.0  ;;  %v7202_v34 = vsel %vm2003_vm15, %v7070_v38, %v3347_v63  ;;  %vm3461_vm10 = vcmp.eq.s32.totalorder %v7855_v27, %v5855_v21  ;;  %4651 = vmatprep.subr.bf16.mxu0 %v7839_v12  ;;  %v7858_v63 = vld [vmem:[#allocation107_spill] sm:$0xff] }
 0x64f   : > { %v2860_v44 = vadd.f32 %v2859_v59, %v2858_v3  ;;  %v2873_v28 = vrot.slane %v2872_v10, 4  ;;  %vm3750_vm12 = vcmp.eq.s32.totalorder %v7856_v7, %v5855_v21  ;;  %v4021_v36 = vunpack.c.l.b16 %v4001_v11 }
 0x650   : > { %v4000_v43 = vpack.c.bf16 %v3992_v9, %v3992_v9  ;;  %v3994_v0 = vadd.f32 %v7857_v60, %v3850_v26  ;;  %v3132_v35 = vsel %vm1332_vm2, %v3106_v14, 0.0  ;;  %v3109_v38 = vsel %vm3069_vm7, %v7013_v56, 0.0  ;;  %v3366_v14 = vpop.permute.xlu1 %3365 }
 0x651   : > { %v2861_v53 = vrot.slane %v2860_v44, 2  ;;  %v2874_v58 = vadd.f32 %v2873_v28, %v2872_v10  ;;  %v3133_v1 = vrot.slane %v3132_v35, 4  ;;  %v3153_v23 = vsel %vm1332_vm2, %v3109_v38, 0.0  ;;  %4652 = vmatpush3.bf16.msra.mxu0 %v3362_v40  ;;  %v7859_v10 = vld [vmem:[#allocation53_spill] sm:$0xff] }
 0x652   : > { %v4020_v6 = vunpack.c.l.b16 %v4000_v43  ;;  %v4002_v62 = vpack.c.bf16 %v3994_v0, %v3994_v0  ;;  %v3108_v41 = vsel %vm3068_vm9, %v7030_v54, 0.0  ;;  %v3154_v3 = vrot.slane %v3153_v23, 4  ;;  %4653 = vmatprep.subr.bf16.mxu0 %v7839_v12 }
 0x653   : > { %v2862_v46 = vadd.f32 %v2861_v53, %v2860_v44  ;;  %v2875_v13 = vrot.slane %v2874_v58, 2  ;;  %v3134_v30 = vadd.f32 %v3133_v1, %v3132_v35  ;;  %vm3747_vm5 = vcmp.eq.s32.totalorder %v7858_v63, %v5855_v21  ;;  %v7860_v35 = vld [vmem:[#allocation101_spill] sm:$0xff] }
 0x654   : > { %v4027_v56 = vsel %vm2001_vm14, %v4020_v6, %v7105_v18  ;;  %v4022_v29 = vunpack.c.l.b16 %v4002_v62  ;;  %v3146_v59 = vsel %vm1332_vm2, %v3108_v41, 0.0  ;;  %v3788_v54 = vsel %vm3748_vm0, %v7032_v49, 0.0  ;;  %v7861_v41 = vld [vmem:[#allocation60_spill] sm:$0xff] }
 0x655   : > { %v4028_v25 = vsel %vm2003_vm15, %v4021_v36, %v4027_v56  ;;  %v2863_v40 = vrot.slane %v2862_v46, 1  ;;  %v2876_v37 = vadd.f32 %v2875_v13, %v2874_v58  ;;  %v3135_v11 = vrot.slane %v3134_v30, 2  ;;  %4654 = vmatpush3.bf16.msra.mxu0 %v3364_v4 }
 0x656   : > { %v7232_v17 = vsel %vm2005_vm4, %v4022_v29, %v4028_v25  ;;  %v3155_v9 = vadd.f32 %v3154_v3, %v3153_v23  ;;  %v3147_v26 = vrot.slane %v3146_v59, 4  ;;  %v3826_v18 = vsel %vm1332_vm2, %v3788_v54, 0.0  ;;  %4655 = vmatprep.subr.bf16.mxu0 %v7839_v12 }
 0x657   : > { %vm3462_vm14 = vcmp.eq.s32.totalorder %v7859_v10, %v5855_v21  ;;  %v2864_v44 = vadd.f32 %v2863_v40, %v2862_v46  ;;  %v2877_v28 = vrot.slane %v2876_v37, 1  ;;  %v3136_v57 = vadd.f32 %v3135_v11, %v3134_v30 }
 0x658   : > { %v3827_v49 = vrot.slane %v3826_v18, 4  ;;  %v3156_v36 = vrot.slane %v3155_v9, 2  ;;  %v3148_v43 = vadd.f32 %v3147_v26, %v3146_v59  ;;  %v3501_v60 = vsel %vm3461_vm10, %v7054_v61, 0.0 }
 0x659   : > { %v3790_v0 = vsel %vm3750_vm12, %v7056_v32, 0.0  ;;  %v3028_v53 = vadd.f32 %v7860_v35, %v2864_v44  ;;  %v2878_v58 = vadd.f32 %v2877_v28, %v2876_v37  ;;  %v3137_v1 = vrot.slane %v3136_v57, 1  ;;  %4656 = vmatpush3.bf16.msra.mxu0 %v3366_v14  ;;  %v7865_v35 = vld [vmem:[#allocation17_spill] sm:$0xff] }
 0x65a   : > { %v3828_v38 = vadd.f32 %v3827_v49, %v3826_v18  ;;  %v3157_v4 = vadd.f32 %v3156_v36, %v3155_v9  ;;  %v3149_v6 = vrot.slane %v3148_v43, 2  ;;  %v3545_v62 = vsel %vm1332_vm2, %v3501_v60, 0.0  ;;  %4673 = vmatprep.subr.bf16.mxu0 %v7839_v12  ;;  %v7862_v9 = vld [vmem:[#allocation105_spill] sm:$0xff] }
 0x65b   : > { %v3840_v23 = vsel %vm1332_vm2, %v3790_v0, 0.0  ;;  %v7250_v27 = vadd.f32 %v7861_v41, %v2878_v58  ;;  %v3138_v61 = vadd.f32 %v3137_v1, %v3136_v57  ;;  %v3546_v13 = vrot.slane %v3545_v62, 4 }
 0x65c   : > { %v3829_v46 = vrot.slane %v3828_v38, 2  ;;  %v3158_v32 = vrot.slane %v3157_v4, 1  ;;  %v3150_v7 = vadd.f32 %v3149_v6, %v3148_v43  ;;  %v3841_v30 = vrot.slane %v3840_v23, 4 }
 0x65d   : > { %v3787_v3 = vsel %vm3747_vm5, %v7076_v55, 0.0  ;;  %v3170_v56 = vadd.f32 %v3138_v61, %v6905_v22  ;;  %v3547_v59 = vadd.f32 %v3546_v13, %v3545_v62  ;;  %v3502_v63 = vsel %vm3462_vm14, %v7103_v33, 0.0  ;;  %v7863_v55 = vld [vmem:[#allocation109_spill] sm:$0xff]  ;;  %v7864_v22 = vld [vmem:[#allocation112_spill] sm:$0xff] }
 0x65e   : > { %v3830_v29 = vadd.f32 %v3829_v46, %v3828_v38  ;;  %v3819_v54 = vsel %vm1332_vm2, %v3787_v3, 0.0  ;;  %v3159_v25 = vadd.f32 %v3158_v32, %v3157_v4  ;;  %v3151_v40 = vrot.slane %v3150_v7, 1  ;;  %v7867_v61 = vld [vmem:[#allocation16_spill] sm:$0xff]  ;;  %v7868_v32 = vld [vmem:[#allocation102_spill] sm:$0xff] }
 0x65f   : > { %v3842_v37 = vadd.f32 %v3841_v30, %v3840_v23  ;;  %v3820_v11 = vrot.slane %v3819_v54, 4  ;;  %v3314_v26 = vadd.f32 %v7862_v9, %v3170_v56  ;;  %v3548_v44 = vrot.slane %v3547_v59, 2 }
 0x660   : > { %v3831_v18 = vrot.slane %v3830_v29, 1  ;;  %vm3070_vm0 = vcmp.eq.s32.totalorder %v7863_v55, %v5855_v21  ;;  %vm3749_vm15 = vcmp.eq.s32.totalorder %v7864_v22, %v5855_v21  ;;  %v3173_v28 = vadd.f32 %v3159_v25, %v7142_v31  ;;  %v7866_v31 = vld [vmem:[#allocation106_spill] sm:$0xff] }
 0x661   : > { %v3152_v57 = vadd.f32 %v3151_v40, %v3150_v7  ;;  %v3843_v49 = vrot.slane %v3842_v37, 2  ;;  %v3821_v14 = vadd.f32 %v3820_v11, %v3819_v54  ;;  %v3322_v36 = vpack.c.bf16 %v3314_v26, %v3314_v26 }
 0x662   : > { %v3832_v43 = vadd.f32 %v3831_v18, %v3830_v29  ;;  %v3549_v60 = vadd.f32 %v3548_v44, %v3547_v59  ;;  %v3552_v0 = vsel %vm1332_vm2, %v3502_v63, 0.0  ;;  %v3317_v58 = vadd.f32 %v7865_v35, %v3173_v28  ;;  %v4040_v29 = vpop.permute.xlu0 %4039  ;;  %v7869_v59 = vld [vmem:[#allocation63_spill] sm:$0xff] }
 0x663   : > { %v3172_v10 = vadd.f32 %v3152_v57, %v3028_v53  ;;  %v3844_v33 = vadd.f32 %v3843_v49, %v3842_v37  ;;  %v3822_v1 = vrot.slane %v3821_v14, 2  ;;  %v3342_v38 = vunpack.c.l.b16 %v3322_v36  ;;  %v7870_v36 = vld [vmem:[#allocation110_spill] sm:$0xff] }
 0x664   : > { %v3852_v4 = vadd.f32 %v3832_v43, %v7169_v52  ;;  %v3550_v6 = vrot.slane %v3549_v60, 1  ;;  %v3553_v62 = vrot.slane %v3552_v0, 4  ;;  %vm3894_vm7 = vcmp.eq.s32.totalorder %v7866_v31, %v5855_v21 }
 0x665   : > { %v3343_v23 = vunpack.c.l.b16 %v3323_v8  ;;  %v3325_v41 = vpack.c.bf16 %v3317_v58, %v3317_v58  ;;  %v3316_v46 = vadd.f32 %v7867_v61, %v3172_v10  ;;  %v3823_v13 = vadd.f32 %v3822_v1, %v3821_v14 }
 0x666   : > { %v3349_v53 = vsel %vm2005_vm4, %v3342_v38, %v7202_v34  ;;  %v3996_v7 = vadd.f32 %v7868_v32, %v3852_v4  ;;  %v3551_v30 = vadd.f32 %v3550_v6, %v3549_v60  ;;  %v3554_v52 = vadd.f32 %v3553_v62, %v3552_v0  ;;  %v4042_v57 = vpop.permute.xlu0 %4041 }
 0x667   : > { %v2666_v3 = vunpack.c.l.b16 %v2646_v47  ;;  %v2665_v15 = vunpack.c.l.b16 %v2645_v20  ;;  %v3324_v8 = vpack.c.bf16 %v3316_v46, %v3316_v46  ;;  %v3350_v56 = vsel %vm2007_vm13, %v3343_v23, %v3349_v53 }
 0x668   : > { %v7289_v54 = vadd.f32 %v7869_v59, %v3551_v30  ;;  %v3845_v34 = vrot.slane %v3844_v33, 1  ;;  %v3824_v25 = vrot.slane %v3823_v13, 1  ;;  %v3555_v40 = vrot.slane %v3554_v52, 2 }
 0x669   : > { %v3344_v37 = vunpack.c.l.b16 %v3324_v8  ;;  %v3110_v16 = vsel %vm3070_vm0, %v7121_v45, 0.0  ;;  %v2671_v42 = vsel %vm2009_vm11, %v7064_v2, %v6991_v50  ;;  %v3789_v47 = vsel %vm3749_vm15, %v7136_v39, 0.0 }
 0x66a   : > { %v3345_v20 = vunpack.c.l.b16 %v3325_v41  ;;  %v3825_v11 = vadd.f32 %v3824_v25, %v3823_v13  ;;  %v3556_v9 = vadd.f32 %v3555_v40, %v3554_v52  ;;  %v3160_v26 = vsel %vm1332_vm2, %v3110_v16, 0.0  ;;  %v4044_v13 = vpop.permute.xlu0 %4043 }
 0x66b   : > { %v3351_v18 = vsel %vm2009_vm11, %v3344_v37, %v3350_v56  ;;  %v3161_v44 = vrot.slane %v3160_v26, 4  ;;  %v2672_v63 = vsel %vm2011_vm3, %v2665_v15, %v2671_v42  ;;  %v3833_v45 = vsel %vm1332_vm2, %v3789_v47, 0.0 }
 0x66c   : > { %v3851_v55 = vadd.f32 %v3825_v11, %v7082_v5  ;;  %v3557_v50 = vrot.slane %v3556_v9, 1  ;;  %v2673_v2 = vsel %vm2013_vm6, %v2666_v3, %v2672_v63  ;;  %v3834_v28 = vrot.slane %v3833_v45, 4 }
 0x66d   : > { %v3162_v22 = vadd.f32 %v3161_v44, %v3160_v26  ;;  %v2674_v39 = vpack.c.b16 %v2673_v2, %v2673_v2  ;;  %v3934_v49 = vsel %vm3894_vm7, %v7146_v24, 0.0  ;;  %v3352_v14 = vsel %vm2011_vm3, %v3345_v20, %v3351_v18  ;;  %v7871_v24 = vld [vmem:[#allocation55_spill] sm:$0xff] }
 0x66e   : > { %v3995_v43 = vadd.f32 %v7870_v36, %v3851_v55  ;;  %v3558_v60 = vadd.f32 %v3557_v50, %v3556_v9  ;;  %v3835_v0 = vadd.f32 %v3834_v28, %v3833_v45  ;;  %v3984_v5 = vsel %vm1332_vm2, %v3934_v49, 0.0  ;;  %v4046_v40 = vpop.permute.xlu0 %4045  ;;  %v4782_v36 = vld [vmem:[%s7449_s8 + $0x28] sm:$0xff]  }
 0x66f   : > { %v3981_v35 = vadd.f32 %v3980_v48, %v6598_v19  ;;  %v4004_v58 = vpack.c.bf16 %v3996_v7, %v3996_v7  ;;  %v3163_v10 = vrot.slane %v3162_v22, 2  ;;  %4646 = vmatmul.mubr.msk.bf16.vlgmr.msra.gmra.mrb[12].mxu1 %vm2016_vm8, %v2674_v39  ;;  %v3985_v1 = vrot.slane %v3984_v5, 4 }
 0x670   : > { %v3846_v38 = vadd.f32 %v3845_v34, %v3844_v33  ;;  %v4003_v21 = vpack.c.bf16 %v3995_v43, %v3995_v43  ;;  %v3710_v4 = vadd.f32 %v7871_v24, %v3558_v60  ;;  %4662 = vmatpush3.bf16.msra.mxu1 %v4040_v29  ;;  %v3836_v6 = vrot.slane %v3835_v0, 2  ;;  %4669 = vmatprep.mubr.msk.bf16.mxu1 %vm4895_vm1, %v7839_v12  ;;  %v4783_v60 = vld [vmem:[%s7449_s8 + $0x30] sm:$0xff]  }
 0x671   : > { %v3164_v62 = vadd.f32 %v3163_v10, %v3162_v22  ;;  %4663 = vmatprep.subr.bf16.mxu1 %v7839_v12  ;;  %v3986_v31 = vadd.f32 %v3985_v1, %v3984_v5  ;;  %v3309_v41 = vrot.slane %v6649_v51, 1  ;;  %v4024_v61 = vunpack.c.l.b16 %v4004_v58 }
 0x672   : > { %v4023_v23 = vunpack.c.l.b16 %v4003_v21  ;;  %v3837_v19 = vadd.f32 %v3836_v6, %v3835_v0  ;;  %v3854_v48 = vadd.f32 %v3846_v38, %v3710_v4  ;;  %v3982_v53 = vrot.slane %v3981_v35, 1 }
 0x673   : > { %v3165_v46 = vrot.slane %v3164_v62, 1  ;;  %v3987_v33 = vrot.slane %v3986_v31, 2  ;;  %v3310_v8 = vadd.f32 %v3309_v41, %v6649_v51  ;;  %vm2061_vm2 = vcmask 60416  }
 0x674   : > { %v4030_v32 = vsel %vm2007_vm13, %v4023_v23, %v7232_v17  ;;  %v3838_v7 = vrot.slane %v3837_v19, 1  ;;  %4664 = vmatpush3.bf16.msra.mxu1 %v4042_v57  ;;  %v3983_v59 = vadd.f32 %v3982_v53, %v3981_v35  ;;  %vm2741_vm4 = vcmask 126016   ;;  %v4784_v23 = vld [vmem:[%s7449_s8 + $0x38] sm:$0xff]  }
 0x675   : > { %v3166_v30 = vadd.f32 %v3165_v46, %v3164_v62  ;;  %v3988_v52 = vadd.f32 %v3987_v33, %v3986_v31  ;;  %4665 = vmatprep.subr.bf16.mxu1 %v7839_v12  ;;  %v4031_v3 = vsel %vm2009_vm11, %v4024_v61, %v4030_v32  ;;  %vm3421_vm13 = vcmask 191616  }
 0x676   : > { %v3839_v15 = vadd.f32 %v3838_v7, %v3837_v19  ;;  %vm4101_vm11 = vcmask 257216   ;;  %v4811_v19 = vld [vmem:[%s7450_s9] sm:$0xff]  ;;  %v7875_v7 = vld [vmem:[#allocation11_spill] sm:$0xff] }
 0x677   : > { %v3174_v56 = vadd.f32 %v3166_v30, %v7250_v27  ;;  %v3989_v29 = vrot.slane %v3988_v52, 1  ;;  %v4175_v30 = vrot.slane %v4811_v19, %v7875_v7 }
 0x678   : > { %v3853_v34 = vadd.f32 %v3839_v15, %v7289_v54  ;;  %4666 = vmatpush3.bf16.msra.mxu1 %v4044_v13 }
 0x679   : > { %v3318_v25 = vadd.f32 %v3310_v8, %v3174_v56  ;;  %v3990_v17 = vadd.f32 %v3989_v29, %v3988_v52  ;;  %4667 = vmatprep.subr.bf16.mxu1 %v7839_v12  ;;  %v4812_v56 = vld [vmem:[%s5059_s22] sm:$0xff] }
 0x67a   : > { %v3997_v37 = vadd.f32 %v3983_v59, %v3853_v34 }
 0x67b   : > { %v3326_v16 = vpack.c.bf16 %v3318_v25, %v3318_v25  ;;  %v3998_v42 = vadd.f32 %v3990_v17, %v3854_v48  ;;  %v7873_v48 = vld [vmem:[#allocation12_spill] sm:$0xff] }
 0x67c   : > { %v4005_v47 = vpack.c.bf16 %v3997_v37, %v3997_v37  ;;  %4668 = vmatpush3.bf16.msra.mxu1 %v4046_v40  ;;  %v4111_v41 = vrot.slane %v4811_v19, %v7873_v48 }
 0x67d   : > { %v3346_v20 = vunpack.c.l.b16 %v3326_v16  ;;  %v4006_v11 = vpack.c.bf16 %v3998_v42, %v3998_v42  ;;  %4681 = vmatprep.subr.bf16.mxu1 %v7839_v12  ;;  %v4785_v42 = vld [vmem:[%s7449_s8 + $0x40] sm:$0xff]  }
 0x67e   : > { %v4025_v51 = vunpack.c.l.b16 %v4005_v47  ;;  %v4786_v47 = vld [vmem:[%s7449_s8 + $0x48] sm:$0xff]  }
 0x67f   : > { %v4026_v27 = vunpack.c.l.b16 %v4006_v11  ;;  %v3353_v9 = vsel %vm2013_vm6, %v3346_v20, %v3352_v14  ;;  %v4781_v14 = vld [vmem:[%s7449_s8 + $0x20] sm:$0xff]  }
 0x680   : > { %v3354_v54 = vpack.c.b16 %v3353_v9, %v3353_v9  ;;  %v4032_v26 = vsel %vm2011_vm3, %v4025_v51, %v4031_v3  ;;  %vm7872_vm3 = vcmask 261120  }
 0x681   : > { %v4033_v18 = vsel %vm2013_vm6, %v4026_v27, %v4032_v26  ;;  %vm7874_vm6 = vmmov %vm7872_vm3  ;;  %v7878_v27 = vld [vmem:[#allocation13_spill] sm:$0xff] }
 0x682   : > { %4658 = vmatmul.mubr.msk.bf16.vlgmr.msra.gmra.mrb[16].mxu0 %vm2016_vm8, %v3354_v54  ;;  %v4034_v44 = vpack.c.b16 %v4033_v18, %v4033_v18  ;;  %v4249_v9 = vrot.slane %v4811_v19, %v7878_v27  ;;  %v7879_v18 = vld [vmem:[#allocation14_spill] sm:$0xff] }
 0x683   : > { %4677 = vmatprep.mubr.msk.bf16.mxu0 %vm4895_vm1, %v7839_v12  ;;  %4674 = vmatpush3.bf16.msra.mxu0 %v4781_v14 }
 0x684   : > { %4670 = vmatmul.mubr.msk.bf16.vlgmr.msra.gmra.mrb[16].mxu1 %vm2016_vm8, %v4034_v44  ;;  %4675 = vmatprep.subr.bf16.mxu0 %v7839_v12  ;;  %v4254_v44 = vrot.slane %v4811_v19, %v7879_v18 }
 0x685   : > { %4685 = vmatprep.mubr.msk.bf16.mxu1 %vm4895_vm1, %v7839_v12  ;;  %4682 = vmatpush3.bf16.msra.mxu1 %v4783_v60 }
 0x686   : > { %4683 = vmatprep.subr.bf16.mxu1 %v7839_v12 }
 0x687   : > { %4676 = vmatpush3.bf16.msra.mxu0 %v4782_v36 }
 0x688   : > { %4689 = vmatprep.subr.bf16.mxu0 %v7839_v12 }
 0x689   : > { %4684 = vmatpush3.bf16.msra.mxu1 %v4784_v23 }
 0x71f   : > { %v2054_v63 = vpop.f32.mrb[12].mxu0 }
 0x720   : > { %v2060_v45 = vpack.c.bf16 %v2054_v63, %v2054_v63  ;;  %v4635_v55 = vpop.f32.mrb[13].mxu0 }
 0x721   : > { %v2057_v50 = vpop.f32.mrb[14].mxu0 }
 0x722   : > { %2062 = vst.msk [vmem:[#allocation3] sm:$0xf] %vm2061_vm2, %v2060_v45  ;;  %v4636_v2 = vpop.f32.mrb[15].mxu0  ;;  %v7881_v50 = vld [vmem:[#allocation8_spill] sm:$0xff] }
 0x742   : > { %v2728_v28 = vpop.f32.mrb[12].mxu1 }
 0x743   : > { %v4529_v22 = vpack.c.bf16 %v2728_v28, %v2728_v28  ;;  %v4647_v39 = vpop.f32.mrb[13].mxu1 }
 0x744   : > { %v2731_v57 = vpop.f32.mrb[14].mxu1 }
 0x745   : > { %2738 = vrot.lane.b32.xlu1 %v4529_v22, %s4903_s29  ;;  %v4648_v49 = vpop.f32.mrb[15].mxu1 }
 0x755   : > { %v3408_v43 = vpop.f32.mrb[16].mxu0 }
 0x756   : > { %v4530_v0 = vpack.c.bf16 %v3408_v43, %v3408_v43  ;;  %v4659_v5 = vpop.f32.mrb[17].mxu0 }
 0x757   : > { %v3411_v35 = vpop.f32.mrb[18].mxu0  ;;  %v4088_v58 = vpop.f32.mrb[16].mxu1 }
 0x758   : > { %3418 = vrot.lane.b32.xlu0 %v4530_v0, %s4894_s12  ;;  %v4660_v10 = vpop.f32.mrb[19].mxu0  ;;  %v4531_v1 = vpack.c.bf16 %v4088_v58, %v4088_v58  ;;  %v4671_v38 = vpop.f32.mrb[17].mxu1 }
 0x759   : > { %v4091_v21 = vpop.f32.mrb[18].mxu1 }
 0x75a   : > { %4098 = vrot.lane.b32.xlu1 %v4531_v1, %s4904_s21  ;;  %v4672_v24 = vpop.f32.mrb[19].mxu1  ;;  %s427_s21 = sand.u32 1, %s4875_s14   ;;  %v7884_v21 = vld [vmem:[#allocation9_spill] sm:$0xff] }
 0x75b   : > { %s4479_s12 = sshll.u32 %s427_s21, 3  ;;  %s4347_s27 = scalar_lea.sflag [#allocation5], %s427_s21 }
 0x75c   : > { %s429_s29 = scalar_lea.vmem [#allocation4], %s4479_s12  ;;  %s4819_s12 = scalar_lea.vmem %s4818_s28, 256 }
 0x75d   : > { %s4361_s30 = sshll.u32 %s429_s29, 4  ;;  %s7395_s30 = int_to_ptr.vmem [resolvable:$true] %s4361_s30 }
 0x75e   : > { %s4813_s22 = scalar_lea.vmem %s7395_s30, 128  ;;  %p4820_p1 = scmp.lt.s32.totalorder %s7395_s30, %s4818_s28 }
 0x75f   : > { %p4814_p12 = scmp.ne.s32.totalorder %s7395_s30, %s4813_s22  ;;  %p4821_p2 = scmp.lt.s32.totalorder %s4819_s12, %s4813_s22 }
 0x761   : > { %p4815_p13 = pnand %p4814_p12, %p5001_p4  ;;  %p4822_p3 = por %p4821_p2, %p4820_p1 }
 0x763   : > { %p4816_p0 = pneg %p4815_p13 }
 0x765   : > { %p4823_p5 = pnand %p4822_p3, %p4816_p0 }
 0x7b7   : > { %v2739_v4 = vpop.permute.xlu1 %2738 }
 0x7b8   : > { %2742 = vst.msk [vmem:[#allocation3] sm:$0xf] %vm2741_vm4, %v2739_v4 }
 0x7ca   : > { %v3419_v6 = vpop.permute.xlu0 %3418 }
 0x7cb   : > { %3422 = vst.msk [vmem:[#allocation3] sm:$0xf] %vm3421_vm13, %v3419_v6  ;;  %v7885_v6 = vld [vmem:[#allocation10_spill] sm:$0xff] }
 0x7cc   : > { %v4099_v62 = vpop.permute.xlu1 %4098 }
 0x7cd   : > { %4102 = vst.msk [vmem:[#allocation3] sm:$0xf] %vm4101_vm11, %v4099_v62 }
 0x7d4   : > { %v4103_v31 = vld [vmem:[#allocation3] sm:$0xf] }
 0x7d5   : > { %4678 = vmatmul.mubr.msk.bf16.vlgmr.msra.gmra.mrb[20].mxu0 %vm7872_vm3, %v4103_v31 }
 0x7d6   : > { %4693 = vmatprep.mubr.msk.bf16.mxu0 %vm4895_vm1, %v7839_v12  ;;  %vm7876_vm1 = vmmov %vm7872_vm3  ;;  %4690 = vmatpush3.bf16.msra.mxu0 %v4785_v42 }
 0x7d7   : > { %vm7877_vm8 = vmmov %vm7876_vm1  ;;  %4691 = vmatprep.subr.bf16.mxu0 %v7839_v12  ;;  %v461_v12 = vld [vmem:[%s7450_s9 + $0x8] sm:$0x7] }
 0x7d8   : > { %vm7880_vm9 = vmmov %vm7876_vm1  ;;  %v4264_v2 = vrot.slane %v461_v12, %v7881_v50  ;;  %v4338_v24 = vrot.slane %v461_v12, %v7884_v21  ;;  %v4343_v62 = vrot.slane %v461_v12, %v7885_v6 }
 0x7d9   : > { %vm7882_vm10 = vmmov %vm7876_vm1 }
 0x7da   : > { %4692 = vmatpush3.bf16.msra.mxu0 %v4786_v47  ;;  %vm7883_vm12 = vmmov %vm7876_vm1 }
 0x7db   : > { %vm7886_vm5 = vmmov %vm7876_vm1 }
 0x8a8   : > { %v4161_v61 = vpop.f32.mrb[20].mxu0 }
 0x8a9   : > { %v4162_v46 = vadd.f32 %v4161_v61, %v4111_v41  ;;  %v4679_v33 = vpop.f32.mrb[21].mxu0 }
 0x8aa   : > { %v4164_v13 = vpop.f32.mrb[22].mxu0 }
 0x8ab   : > { %v4167_v53 = vpack.c.bf16 %v4162_v46, %v4162_v46  ;;  %v4680_v32 = vpop.f32.mrb[23].mxu0 }
 0x8ad   : > { %4686 = vmatmul.mubr.msk.bf16.vlgmr.msra.gmra.mrb[20].mxu1 %vm7874_vm6, %v4167_v53 }
 0x980   : > { %v4225_v52 = vpop.f32.mrb[20].mxu1 }
 0x981   : > { %v4226_v3 = vadd.f32 %v4225_v52, %v4175_v30  ;;  %v4687_v15 = vpop.f32.mrb[21].mxu1 }
 0x982   : > { %v4228_v8 = vpop.f32.mrb[22].mxu1 }
 0x983   : > { %v4231_v29 = vadd.f32 %v4812_v56, %v4226_v3  ;;  %v4688_v59 = vpop.f32.mrb[23].mxu1 }
 0x985   : > { %v4232_v34 = vsel %vm7876_vm1, %v4231_v29, 0.0 }
 0x986   : > { %4233 = vadd.xlane.f32.xlu0 %v4232_v34 }
 0xa13   : > { %v4234_v25 = vpop.xlane.xlu0 %4233 }
 0xa14   : > { %v4236_v17 = vmul.f32 0.03125, %v4234_v25 }
 0xa16   : > { %v4237_v40 = vsub.f32 %v4231_v29, %v4236_v17 }
 0xa18   : > { %v4238_v37 = vmul.f32 %v4237_v40, %v4237_v40 }
 0xa1a   : > { %v4239_v16 = vsel %vm7877_vm8, %v4238_v37, 0.0 }
 0xa1b   : > { %4240 = vadd.xlane.f32.xlu1 %v4239_v16 }
 0xaa8   : > { %v4241_v20 = vpop.xlane.xlu1 %4240 }
 0xaa9   : > { %v4242_v11 = vmul.f32 0.03125, %v4241_v20 }
 0xaab   : > { %v4243_v51 = vadd.f32 1e-05, %v4242_v11 }
 0xaad   : > { %4807 = vrsqrt.f32 %v4243_v51 }
 0xab7   : > { %v4808_v54 = vpop.eup %4807 }
 0xab8   : > { %v4245_v26 = vmul.f32 %v4808_v54, %v4237_v40 }
 0xaba   : > { %v4250_v63 = vmul.f32 %v4249_v9, %v4245_v26 }
 0xabc   : > { %v4255_v45 = vadd.f32 %v4254_v44, %v4250_v63 }
 0xabe   : > { %v4256_v55 = vpack.c.bf16 %v4255_v45, %v4255_v45 }
 0xac0   : > { %4694 = vmatmul.mubr.msk.bf16.vlgmr.msra.gmra.mrb[24].mxu0 %vm7880_vm9, %v4256_v55 }
 0xb93   : > { %v4314_v28 = vpop.f32.mrb[24].mxu0 }
 0xb94   : > { %v4315_v22 = vadd.f32 %v4314_v28, %v4264_v2  ;;  %v4695_v39 = vpop.f32.mrb[25].mxu0 }
 0xb95   : > { %v4317_v57 = vpop.f32.mrb[26].mxu0 }
 0xb96   : > { %v4320_v49 = vmax.f32 %v4315_v22, 0.0  ;;  %v4696_v14 = vpop.f32.mrb[27].mxu0 }
 0xb98   : > { %v4321_v36 = vadd.f32 %v4320_v49, %v4255_v45 }
 0xb9a   : > { %v4322_v43 = vsel %vm7882_vm10, %v4321_v36, 0.0 }
 0xb9b   : > { %4323 = vadd.xlane.f32.xlu0 %v4322_v43 }
 0xc28   : > { %v4324_v60 = vpop.xlane.xlu0 %4323 }
 0xc29   : > { %v4325_v0 = vmul.f32 0.03125, %v4324_v60 }
 0xc2b   : > { %v4326_v5 = vsub.f32 %v4321_v36, %v4325_v0 }
 0xc2d   : > { %v4327_v35 = vmul.f32 %v4326_v5, %v4326_v5 }
 0xc2f   : > { %v4328_v58 = vsel %vm7883_vm12, %v4327_v35, 0.0 }
 0xc30   : > { %4329 = vadd.xlane.f32.xlu0 %v4328_v58 }
 0xcbd   : > { %v4330_v10 = vpop.xlane.xlu0 %4329 }
 0xcbe   : > { %v4331_v1 = vmul.f32 0.03125, %v4330_v10 }
 0xcc0   : > { %v4332_v38 = vadd.f32 1e-05, %v4331_v1 }
 0xcc2   : > { %4809 = vrsqrt.f32 %v4332_v38 }
 0xccc   : > { %v4810_v4 = vpop.eup %4809 }
 0xccd   : > { %v4334_v31 = vmul.f32 %v4810_v4, %v4326_v5 }
 0xccf   : > { %v4339_v23 = vmul.f32 %v4338_v24, %v4334_v31 }
 0xcd1   : > { %v4344_v19 = vadd.f32 %v4343_v62, %v4339_v23 }
 0xcd3   : > { %4345 = vst.msk [vmem:[%s429_s29] sm:$0xff] %vm7886_vm5, %v4344_v19 }
 0xcd4   : > { %4826 = shalt.err (!%p4823_p5)
}
 0xcd5   : > { %s4827_s21 = scalar_lea.hbm %s7393_s24, 128  ;;  %s4831_s19 = scalar_lea.hbm %s7451_s10, 256 }
 0xcd6   : > { %p4828_p6 = scmp.ne.s32.totalorder %s7393_s24, %s4827_s21  ;;  %p4832_p10 = scmp.lt.u32.totalorder %s7393_s24, %s7451_s10 }
 0xcd7   : > { %p4833_p11 = scmp.lt.u32.totalorder %s4831_s19, %s4827_s21  ;;  %p4835_p13 = scmp.lt.u32.totalorder %s4827_s21, %s7393_s24 }
 0xcd8   : > { %p4829_p7 = pnand %p4828_p6, %p5001_p4 }
 0xcd9   : > { %p4834_p12 = por %p4833_p11, %p4832_p10 }
 0xcda   : > { %p4830_p9 = pneg %p4829_p7 }
 0xcdb   : > { %p4836_p0 = por %p4835_p13, %p4834_p12 }
 0xcdd   : > { %p4837_p1 = pnand %p4836_p0, %p4830_p9 }
 0xcdf   : > { %4840 = shalt.err (!%p4837_p1)
}
 0xce0   : > { %4708 = dma.vmem_to_hbm [thread:$0]  (%p5001_p4), %s7395_s30, 128, %s7393_s24, %s4347_s27  }
 0xce1 PF: > { %p4714_p2 = scmp.ge.s32.totalorder %s4891_s18, 2  ;;  %s4373_s22 = sand.u32 1, %s4871_s13  }
 0xce2   : > { %s4374_s28 = scalar_lea.sflag [#allocation5], %s4373_s22 }
 0xce3   : > { %p4711_p3 = pnand %p4714_p2, %p5008_p8 }
 0xce5   : > { %4866 = dma.done.wait (!%p4711_p3), %s4374_s28, 128  }
 0xce6   : > { %4868 = vsyncadd (!%p4711_p3), %s4374_s28, 4294967168  ;;  %s23_s18 = sadd.s32 1, %s4891_s18   ;;  %s7887_s23 = sld [smem:[#allocation7_spill]] }
 0xce7   : > { %p20_p5 = scmp.ge.s32.totalorder %s23_s18, 4   ;;  %s7888_s13 = smov %s4875_s14 }
 0xce8   : > { %s7889_s14 = smov %s4879_s15  ;;  %s7890_s15 = smov %s5014_s26 }
 0xce9   : > { %s7891_s16 = smov %s4887_s17  ;;  %22 = sbr.rel (!%p20_p5) target bundleno = 4 (0x4), region = 108 }
 0xcec   : > { %s7892_s17 = smov %s7887_s23 }
 0xcf0   :  { %4379 = vsyncpa [#allocation5], 1 }
 0xcf1   :  { %4381 = vsyncpa [#allocation5 + $0x1], 1 }

</bundles_post_ra>
